<compile_context>
chip_gen: v7x
topology: tpu7x:2x2x1
jax: 0.10.0
libtpu: 0.0.40
codegen_flags: <defaults>
</compile_context>

<pallas_src>
import jax
import jax.numpy as jnp
from jax.experimental import pallas as pl
from jax.experimental.pallas import tpu as pltpu


def _features_kernel(feat_ref, coords_ref, w1_ref, b1_ref, w2_ref, b2_ref,
                     out_ref):
    tn, HW, C = feat_ref.shape
    feats = feat_ref[...].astype(jnp.float32)             # [tn, HW, C] channels-last

    # ---- spatial softmax over HW (the sublane axis), per (row, channel) ----
    m = jnp.max(feats, axis=1, keepdims=True)              # [tn, 1, C]
    e = jnp.exp(feats - m)                                  # [tn, HW, C]

    # ---- weighted reductions on the (otherwise idle) MXU ----
    # coords_ref rows: [ones, coord_h, coord_w, 0, 0, 0, 0, 0] -> [8, HW]
    # sums[:,0]=sum(e), sums[:,1]=sum(e*coord_h), sums[:,2]=sum(e*coord_w)
    coords_b = jnp.broadcast_to(coords_ref[...][None, :, :], (tn, 8, HW))
    sums = jnp.einsum('nkh,nhc->nkc', coords_b, e,
                      preferred_element_type=jnp.float32)   # [tn, 8, C]
    inv = pl.reciprocal(sums[:, 0, :], approx=False)        # [tn, C], exact
    kp_h = sums[:, 1, :] * inv                               # expected row coordinate
    kp_w = sums[:, 2, :] * inv                               # expected col coordinate

    # ---- _to_embed MLP: cat((h, w), -1) @ W1 == h @ W1[:C] + w @ W1[C:] ----
    h1 = (jnp.dot(kp_h, w1_ref[:C, :], preferred_element_type=jnp.float32)
          + jnp.dot(kp_w, w1_ref[C:, :], preferred_element_type=jnp.float32)
          + b1_ref[...])
    h1 = jnp.maximum(h1, 0.0)                # ReLU (Dropout = identity in eval)
    y = jnp.dot(h1, w2_ref[...], preferred_element_type=jnp.float32) + b2_ref[...]

    # ---- F.normalize(y, p=2, dim=-1, eps=1e-12) ----
    norm = jnp.sqrt(jnp.sum(y * y, axis=-1, keepdims=True))
    out_ref[...] = (y / jnp.maximum(norm, 1e-12)).astype(out_ref.dtype)


def _vmem_capacity_bytes():
    try:
        return int(pltpu.get_tpu_info().vmem_capacity_bytes)
    except Exception:
        return 64 << 20          # v7x per-core figure: the most conservative default


def _pick_tile_n(N, HW, C, feat_itemsize):
    """Batch-tile so the double-buffered feature DMA *plus* the f32 in-kernel
    temporaries (upcast + exp) fit a generation-aware VMEM budget, while keeping
    the grid >= ~8 steps so both v7x TensorCores see >= 4 pipelined steps."""
    hw_pad = pl.cdiv(HW, 8) * 8          # sublane padding (channels-last layout)
    c_pad = pl.cdiv(C, 128) * 128        # lane padding (none for C=512)
    row_bytes = (2 * hw_pad * c_pad * feat_itemsize   # double-buffered input tile
                 + 2 * hw_pad * c_pad * 4)            # f32 upcast + exp temporaries
    cap = _vmem_capacity_bytes()
    budget = min(max(cap // 3, 8 << 20), 32 << 20)    # ~32 MiB on 128 MiB parts, ~21 MiB on v7x
    t = max(1, int(budget) // int(row_bytes))
    t = min(t, 512, N)
    if N >= 64:
        t = min(t, max(8, (N // 8) // 8 * 8))         # keep >= ~8 grid steps
    if t >= 8:
        t = (t // 8) * 8                              # sublane-aligned output rows
    return int(max(t, 1))


def _vmem_limit_bytes(tn, HW, C, feat_itemsize, resident_bytes):
    """Scoped-VMEM limit from the actual footprint + headroom (not a flat 48 MiB)."""
    hw_pad = pl.cdiv(HW, 8) * 8
    c_pad = pl.cdiv(C, 128) * 128
    feat_tile = 2 * tn * hw_pad * c_pad * feat_itemsize     # double-buffered input
    temps = 2 * tn * hw_pad * c_pad * 4                     # f32 upcast + exp
    out_tile = 2 * tn * 128 * 4
    total = feat_tile + temps + 2 * resident_bytes + out_tile
    return int(min(total + (16 << 20), _vmem_capacity_bytes()))


def transformer_features_forward(features_cl, w1, b1, w2, b2, *, tile_n=None):
    """features_cl: [B, T, H, W, C] channels-last backbone features (f32 or bf16).
    Returns [B, T, latent] L2-normalized embeddings."""
    assert features_cl.ndim == 5, 'expects [B, T, H, W, C] tensor!'
    B, T, H, W, C = features_cl.shape
    N, HW = B * T, H * W
    embed_hidden = w1.shape[1]
    latent = w2.shape[1]
    assert w1.shape[0] == 2 * C, "use_ss=True expects in_dim == 2*C"

    feats = features_cl.reshape(N, HW, C)          # free row-major reshape, no transpose
    b1r = b1.reshape(1, embed_hidden)
    b2r = b2.reshape(1, latent)

    # Host-precomputed MXU reduction table: row 0 = ones (softmax denominator),
    # row 1 = h coordinate, row 2 = w coordinate per flattened hw index, rows 3..7
    # zero so the batched-matmul LHS is exactly one 8-sublane vreg tall.
    lin_h = jnp.linspace(-1.0, 1.0, H, dtype=jnp.float32)
    lin_w = jnp.linspace(-1.0, 1.0, W, dtype=jnp.float32)
    coord_h = jnp.broadcast_to(lin_h[:, None], (H, W)).reshape(1, HW)
    coord_w = jnp.broadcast_to(lin_w[None, :], (H, W)).reshape(1, HW)
    coords = jnp.concatenate(
        [jnp.ones((1, HW), jnp.float32), coord_h, coord_w,
         jnp.zeros((5, HW), jnp.float32)], axis=0)                      # [8, HW]

    feat_itemsize = jnp.dtype(features_cl.dtype).itemsize
    tn = tile_n if tile_n is not None else _pick_tile_n(N, HW, C, feat_itemsize)
    grid = (pl.cdiv(N, tn),)

    resident_bytes = 4 * (coords.size + w1.size + w2.size + b1.size + b2.size)
    vmem_limit = _vmem_limit_bytes(tn, HW, C, feat_itemsize, resident_bytes)

    cost = pl.CostEstimate(
        flops=int(N * (2 * C * HW                    # max + subtract
                       + 2 * 3 * C * HW              # MXU weighted reductions
                       + 2 * (2 * C * embed_hidden + embed_hidden * latent)
                       + 6 * latent)),
        transcendentals=int(N * C * HW),             # exp
        bytes_accessed=int(feats.size * feat_itemsize
                           + 4 * (coords.size + w1.size + w2.size
                                  + b1.size + b2.size + N * latent)),
    )

    out = pl.pallas_call(
        _features_kernel,
        out_shape=jax.ShapeDtypeStruct((N, latent), jnp.float32),
        grid=grid,
        in_specs=[
            pl.BlockSpec((tn, HW, C), lambda i: (i, 0, 0)),   # streamed over N
            pl.BlockSpec((8, HW), lambda i: (0, 0)),          # resident (tiny)
            pl.BlockSpec(w1.shape, lambda i: (0, 0)),         # resident weights
            pl.BlockSpec((1, embed_hidden), lambda i: (0, 0)),
            pl.BlockSpec(w2.shape, lambda i: (0, 0)),
            pl.BlockSpec((1, latent), lambda i: (0, 0)),
        ],
        out_specs=pl.BlockSpec((tn, latent), lambda i: (i, 0)),
        compiler_params=pltpu.CompilerParams(
            # Rows are independent -> shard the N axis across TensorCores (v7x).
            dimension_semantics=("parallel",),
            vmem_limit_bytes=vmem_limit,
        ),
        cost_estimate=cost,
    )(feats, coords, w1, b1r, w2, b2r)
    return out.reshape(B, T, latent)


def _reference(features_cl, w1, b1, w2, b2):
    # Mirrors the PyTorch code path on NCHW features (verification only).
    f_nchw = jnp.transpose(features_cl, (0, 1, 4, 2, 3))
    B, T, C, H, W = f_nchw.shape
    p = jax.nn.softmax(f_nchw.reshape(B, T, C, H * W), axis=-1).reshape(B, T, C, H, W)
    lh = jnp.linspace(-1.0, 1.0, H).reshape(1, 1, 1, H)
    lw = jnp.linspace(-1.0, 1.0, W).reshape(1, 1, 1, W)
    h = jnp.sum(lh * jnp.sum(p, axis=4), axis=3)
    w = jnp.sum(lw * jnp.sum(p, axis=3), axis=3)
    kp = jnp.concatenate([h, w], axis=2)                    # [B, T, 2C]
    y = jnp.maximum(kp @ w1 + b1, 0.0) @ w2 + b2
    n = jnp.sqrt(jnp.sum(y * y, axis=-1, keepdims=True))
    return y / jnp.maximum(n, 1e-12)


if __name__ == "__main__":
    # resnet18 backbone -> 512 channels; use_ss=True -> in_dim=1024;
    # embed_hidden=256 (module default); latent_dim chosen small.
    # B*T=64 so the auto-picked tile gives a >=8-step grid.
    B, T, C, H, W = 4, 16, 512, 8, 8
    EMBED_HIDDEN, LATENT = 256, 32
    IN_DIM = 2 * C                      # 1024 spatial-softmax keypoints (h ++ w)

    key = jax.random.PRNGKey(0)
    kf, k1, k2, k3, k4 = jax.random.split(key, 5)

    # Synthetic post-backbone features, emitted channels-last ([B,T,H,W,C]) so the
    # kernel sees a lane-dense [N, HW, C=512] layout without a wrapper transpose.
    features = jax.random.normal(kf, (B, T, H, W, C), dtype=jnp.float32)

    # _to_embed parameters, deterministic init (stored as [in, out] = weight.T)
    s1 = 1.0 / jnp.sqrt(jnp.float32(IN_DIM))
    s2 = 1.0 / jnp.sqrt(jnp.float32(EMBED_HIDDEN))
    w1 = jax.random.uniform(k1, (IN_DIM, EMBED_HIDDEN), jnp.float32, -s1, s1)
    b1 = jax.random.uniform(k2, (EMBED_HIDDEN,), jnp.float32, -s1, s1)
    w2 = jax.random.uniform(k3, (EMBED_HIDDEN, LATENT), jnp.float32, -s2, s2)
    b2 = jax.random.uniform(k4, (LATENT,), jnp.float32, -s2, s2)

    out = jax.block_until_ready(transformer_features_forward(features, w1, b1, w2, b2))
    ref = jax.block_until_ready(_reference(features, w1, b1, w2, b2))
    assert out.shape == (B, T, LATENT), out.shape
    # 2e-4: the MXU reduction reorders the f32 accumulation vs the pure-JAX ref.
    err = float(jnp.max(jnp.abs(out - ref)))
    assert jnp.allclose(out, ref, atol=2e-4, rtol=2e-4), err

    print("KERNEL_OK")
</pallas_src>

<mosaic_0001>
module attributes {stable_mosaic.version = 11 : i64} {
  func.func @_features_kernel(%arg0: i32, %arg1: memref<8x64x512xf32, #tpu.memory_space<vmem>>, %arg2: memref<8x64xf32, #tpu.memory_space<vmem>>, %arg3: memref<1024x256xf32, #tpu.memory_space<vmem>>, %arg4: memref<1x256xf32, #tpu.memory_space<vmem>>, %arg5: memref<256x32xf32, #tpu.memory_space<vmem>>, %arg6: memref<1x32xf32, #tpu.memory_space<vmem>>, %arg7: memref<8x32xf32, #tpu.memory_space<vmem>>) attributes {dimension_semantics = [#tpu.dimension_semantics<parallel>], iteration_bounds = array<i64: 8>, scalar_prefetch = 0 : i64, scratch_operands = 0 : i64, tpu.core_type = #tpu.core_type<tc>, window_params = [{transform_indices = @transform_0, window_bounds = array<i64: 8, 64, 512>}, {pipeline_mode = #tpu.pipeline_mode<synchronous>, transform_indices = @transform_1, window_bounds = array<i64: 8, 64>}, {pipeline_mode = #tpu.pipeline_mode<synchronous>, transform_indices = @transform_2, window_bounds = array<i64: 1024, 256>}, {pipeline_mode = #tpu.pipeline_mode<synchronous>, transform_indices = @transform_3, window_bounds = array<i64: 1, 256>}, {pipeline_mode = #tpu.pipeline_mode<synchronous>, transform_indices = @transform_4, window_bounds = array<i64: 256, 32>}, {pipeline_mode = #tpu.pipeline_mode<synchronous>, transform_indices = @transform_5, window_bounds = array<i64: 1, 32>}, {transform_indices = @transform_6, window_bounds = array<i64: 8, 32>}]} {
    %c0 = arith.constant 0 : index
    %c0_0 = arith.constant 0 : index
    %c0_1 = arith.constant 0 : index
    %0 = vector.load %arg1[%c0, %c0_0, %c0_1] : memref<8x64x512xf32, #tpu.memory_space<vmem>>, vector<8x64x512xf32>
    %cst = arith.constant dense<0xFF800000> : vector<8x512xf32>
    %1 = vector.multi_reduction <maximumf>, %0, %cst [1] : vector<8x64x512xf32> to vector<8x512xf32>
    %2 = vector.shape_cast %1 : vector<8x512xf32> to vector<8x1x512xf32>
    %3 = vector.broadcast %2 : vector<8x1x512xf32> to vector<8x64x512xf32>
    %4 = arith.subf %0, %3 : vector<8x64x512xf32>
    %5 = math.exp %4 : vector<8x64x512xf32>
    %c0_2 = arith.constant 0 : index
    %c0_3 = arith.constant 0 : index
    %6 = vector.load %arg2[%c0_2, %c0_3] : memref<8x64xf32, #tpu.memory_space<vmem>>, vector<8x64xf32>
    %7 = vector.shape_cast %6 : vector<8x64xf32> to vector<1x8x64xf32>
    %8 = vector.shape_cast %7 : vector<1x8x64xf32> to vector<1x8x64xf32>
    %9 = vector.broadcast %8 : vector<1x8x64xf32> to vector<8x8x64xf32>
    "tpu.trace_start"() <{level = 10 : i32, message = "nkh,nhc->nkc"}> : () -> ()
    %cst_4 = arith.constant dense<0.000000e+00> : vector<8x8x512xf32>
    %10 = tpu.matmul %9, %5, %cst_4 {dimension_numbers = #tpu.dot_dimension_numbers<[2], [1], [1], [2], [0, 0, 0, 1, 1, 2], [0], [0]>} : vector<8x8x64xf32>, vector<8x64x512xf32>, vector<8x8x512xf32> -> vector<8x8x512xf32>
    "tpu.trace_stop"() : () -> ()
    %11 = vector.extract_strided_slice %10 {offsets = [0, 0, 0], sizes = [8, 1, 512], strides = [1, 1, 1]} : vector<8x8x512xf32> to vector<8x1x512xf32>
    %12 = vector.shape_cast %11 : vector<8x1x512xf32> to vector<8x512xf32>
    %13 = tpu.reciprocal %12 : vector<8x512xf32> -> vector<8x512xf32>
    %14 = vector.extract_strided_slice %10 {offsets = [0, 1, 0], sizes = [8, 1, 512], strides = [1, 1, 1]} : vector<8x8x512xf32> to vector<8x1x512xf32>
    %15 = vector.shape_cast %14 : vector<8x1x512xf32> to vector<8x512xf32>
    %16 = arith.mulf %15, %13 : vector<8x512xf32>
    %17 = vector.extract_strided_slice %10 {offsets = [0, 2, 0], sizes = [8, 1, 512], strides = [1, 1, 1]} : vector<8x8x512xf32> to vector<8x1x512xf32>
    %18 = vector.shape_cast %17 : vector<8x1x512xf32> to vector<8x512xf32>
    %19 = arith.mulf %18, %13 : vector<8x512xf32>
    %c0_5 = arith.constant 0 : index
    %c0_6 = arith.constant 0 : index
    %20 = vector.load %arg3[%c0_5, %c0_6] : memref<1024x256xf32, #tpu.memory_space<vmem>>, vector<512x256xf32>
    %cst_7 = arith.constant dense<0.000000e+00> : vector<8x256xf32>
    %21 = tpu.matmul %16, %20, %cst_7 {dimension_numbers = #tpu.dot_dimension_numbers<[1], [0], [0], [1], [0, 0, 1, 1], [], []>} : vector<8x512xf32>, vector<512x256xf32>, vector<8x256xf32> -> vector<8x256xf32>
    %c512 = arith.constant 512 : index
    %c0_8 = arith.constant 0 : index
    %22 = vector.load %arg3[%c512, %c0_8] : memref<1024x256xf32, #tpu.memory_space<vmem>>, vector<512x256xf32>
    %cst_9 = arith.constant dense<0.000000e+00> : vector<8x256xf32>
    %23 = tpu.matmul %19, %22, %cst_9 {dimension_numbers = #tpu.dot_dimension_numbers<[1], [0], [0], [1], [0, 0, 1, 1], [], []>} : vector<8x512xf32>, vector<512x256xf32>, vector<8x256xf32> -> vector<8x256xf32>
    %24 = arith.addf %21, %23 : vector<8x256xf32>
    %c0_10 = arith.constant 0 : index
    %c0_11 = arith.constant 0 : index
    %25 = vector.load %arg4[%c0_10, %c0_11] : memref<1x256xf32, #tpu.memory_space<vmem>>, vector<1x256xf32>
    %26 = vector.broadcast %25 : vector<1x256xf32> to vector<8x256xf32>
    %27 = arith.addf %24, %26 : vector<8x256xf32>
    %cst_12 = arith.constant 0.000000e+00 : f32
    %28 = vector.broadcast %cst_12 : f32 to vector<8x256xf32>
    %29 = arith.maximumf %27, %28 : vector<8x256xf32>
    %c0_13 = arith.constant 0 : index
    %c0_14 = arith.constant 0 : index
    %30 = vector.load %arg5[%c0_13, %c0_14] : memref<256x32xf32, #tpu.memory_space<vmem>>, vector<256x32xf32>
    %cst_15 = arith.constant dense<0.000000e+00> : vector<8x32xf32>
    %31 = tpu.matmul %29, %30, %cst_15 {dimension_numbers = #tpu.dot_dimension_numbers<[1], [0], [0], [1], [0, 0, 1, 1], [], []>} : vector<8x256xf32>, vector<256x32xf32>, vector<8x32xf32> -> vector<8x32xf32>
    %c0_16 = arith.constant 0 : index
    %c0_17 = arith.constant 0 : index
    %32 = vector.load %arg6[%c0_16, %c0_17] : memref<1x32xf32, #tpu.memory_space<vmem>>, vector<1x32xf32>
    %33 = vector.broadcast %32 : vector<1x32xf32> to vector<8x32xf32>
    %34 = arith.addf %31, %33 : vector<8x32xf32>
    %35 = arith.mulf %34, %34 : vector<8x32xf32>
    %cst_18 = arith.constant dense<0.000000e+00> : vector<8xf32>
    %36 = vector.multi_reduction <add>, %35, %cst_18 [1] : vector<8x32xf32> to vector<8xf32>
    %37 = vector.shape_cast %36 : vector<8xf32> to vector<8x1xf32>
    %38 = math.sqrt %37 : vector<8x1xf32>
    %cst_19 = arith.constant 9.99999996E-13 : f32
    %39 = vector.broadcast %cst_19 : f32 to vector<8x1xf32>
    %40 = arith.maximumf %38, %39 : vector<8x1xf32>
    %41 = vector.broadcast %40 : vector<8x1xf32> to vector<8x32xf32>
    %42 = arith.divf %34, %41 : vector<8x32xf32>
    %c0_20 = arith.constant 0 : index
    %c0_21 = arith.constant 0 : index
    %43 = vector.load %arg7[%c0_20, %c0_21] : memref<8x32xf32, #tpu.memory_space<vmem>>, vector<8x32xf32>
    tpu.vector_store %arg7[%c0_20, %c0_21], %42 {strides = array<i32>} : memref<8x32xf32, #tpu.memory_space<vmem>>, vector<8x32xf32>,
    return
  }
  func.func @transform_0(%arg0: i32) -> (i32, i32, i32) {
    %c0_i32 = arith.constant 0 : i32
    %c0_i32_0 = arith.constant 0 : i32
    %c0_i32_1 = arith.constant 0 : i32
    return %arg0, %c0_i32, %c0_i32_0 : i32, i32, i32
  }
  func.func @transform_1(%arg0: i32) -> (i32, i32) {
    %c0_i32 = arith.constant 0 : i32
    %c0_i32_0 = arith.constant 0 : i32
    %c0_i32_1 = arith.constant 0 : i32
    return %c0_i32, %c0_i32_0 : i32, i32
  }
  func.func @transform_2(%arg0: i32) -> (i32, i32) {
    %c0_i32 = arith.constant 0 : i32
    %c0_i32_0 = arith.constant 0 : i32
    %c0_i32_1 = arith.constant 0 : i32
    return %c0_i32, %c0_i32_0 : i32, i32
  }
  func.func @transform_3(%arg0: i32) -> (i32, i32) {
    %c0_i32 = arith.constant 0 : i32
    %c0_i32_0 = arith.constant 0 : i32
    %c0_i32_1 = arith.constant 0 : i32
    return %c0_i32, %c0_i32_0 : i32, i32
  }
  func.func @transform_4(%arg0: i32) -> (i32, i32) {
    %c0_i32 = arith.constant 0 : i32
    %c0_i32_0 = arith.constant 0 : i32
    %c0_i32_1 = arith.constant 0 : i32
    return %c0_i32, %c0_i32_0 : i32, i32
  }
  func.func @transform_5(%arg0: i32) -> (i32, i32) {
    %c0_i32 = arith.constant 0 : i32
    %c0_i32_0 = arith.constant 0 : i32
    %c0_i32_1 = arith.constant 0 : i32
    return %c0_i32, %c0_i32_0 : i32, i32
  }
  func.func @transform_6(%arg0: i32) -> (i32, i32) {
    %c0_i32 = arith.constant 0 : i32
    %c0_i32_0 = arith.constant 0 : i32
    return %arg0, %c0_i32 : i32, i32
  }
}

</mosaic_0001>

<bundles_post_ra>
// kernel: tpu_custom_call.1
= control target key start
LH: loop header
LB: loop body
LE: loop exit
PB: predicated region body
PF: predicated region fallthrough
CT: control target
= control target key end

     0   :  { %11 = vsyncpa [#allocation3], 0  ;;  %s8131_s0 = inlined_call_operand.hbm [shape: f32[64,64,512], index: 0, kind: input, shape index: {}]   ;;  %s8132_s1 = inlined_call_operand.hbm [shape: f32[8,64], index: 1, kind: input, shape index: {}]   ;;  %s8133_s2 = inlined_call_operand.hbm [shape: f32[1024,256], index: 2, kind: input, shape index: {}]   ;;  %s8134_s3 = inlined_call_operand.hbm [shape: f32[1,256], index: 3, kind: input, shape index: {}]   ;;  %s8135_s4 = inlined_call_operand.vmem [shape: f32[256,32], index: 4, kind: input, shape index: {}]   ;;  %s8136_s5 = inlined_call_operand.hbm [shape: f32[1,32], index: 5, kind: input, shape index: {}]   ;;  %s8137_s6 = inlined_call_operand.vmem [shape: f32[64,32], index: 6, kind: output, shape index: {}]  }
   0x1   :  { %13 = vsyncpa [#allocation3 + $0x1], 0 }
   0x2   :  { %14 = vsyncpa [#allocation5], 0 }
   0x3   :  { %15 = vsyncpa [#allocation8], 0  ;;  %s5658_s21 = smov 0   ;;  %s5660_s22 = smov 0  }
   0x4   :  { %s5662_s23 = smov 0   ;;  %s5664_s24 = smov 0  }
   0x5 LB: > { %s5677_s25 = sadd.s32 4294967295, %s5611_s24   ;;  %p41_p0 = scmp.ne.s32.totalorder %s5603_s22, %s5599_s21  ;;  %s5611_s24 = sphi %s5664_s24, %s8278_s24   ;;  %s5607_s23 = sphi %s5662_s23, %s8277_s23   ;;  %s5603_s22 = sphi %s5660_s22, %s8276_s22   ;;  %s5599_s21 = sphi %s5658_s21, %s8275_s21  }
   0x6   : > { %p8138_p1 = scmp.eq.s32.totalorder %s5677_s25, 0  ;;  %p4137_p2 = scmp.ge.s32.totalorder %s5611_s24, 1 }
   0x7   : > { %p183_p3 = scmp.lt.s32.totalorder %s5611_s24, 9  ;;  %s5613_s28 = smov [#allocation4]  }
   0x8   : > { %p5685_p4 = por %p8138_p1, %p41_p0  ;;  %s196_s29 = sshll.u32 %s5613_s28, 4  ;;  %s197_s29 = int_to_ptr.vmem [resolvable:$true] %s196_s29 }
   0x9   : > { %p5689_p5 = pnand %p4137_p2, %p183_p3  ;;  %s5614_s30 = smov [#allocation7]  }
   0xa   : > { %s8182_s26 = scalar_select %p5685_p4, 1, 0 }
   0xb   : > { %s8183_s27 = scalar_select %p5689_p5, 1, 0 }
   0xc   : > { %p4778_p6 = pneg %p5689_p5  ;;  %s220_s7 = sshll.u32 %s5614_s30, 4  ;;  %s5701_s7 = int_to_ptr.vmem [resolvable:$true] %s220_s7 }
   0xd   : > { %s5615_s9 = smov [#allocation6]   ;;  %s5427_s13 = scalar_lea.hbm %s8132_s1, 128 }
   0xe   : > { %p5697_p7 = pnand %p4778_p6, %p8138_p1  ;;  %s206_s10 = sshll.u32 %s5615_s9, 4  ;;  %s5703_s10 = int_to_ptr.vmem [resolvable:$true] %s206_s10 }
   0xf   : > { %p5428_p8 = scmp.ne.s32.totalorder %s8132_s1, %s5427_s13  ;;  %p5434_p12 = scmp.lt.u32.totalorder %s5427_s13, %s8132_s1 }
  0x10   : > { %p5713_p9 = pneg %p5697_p7 }
  0x12   : > { %p5430_p10 = pnand %p5713_p9, %p5428_p8 }
  0x14   : > { %p5431_p11 = pneg %p5430_p10 }
  0x16   : > { %p5436_p13 = pnand %p5434_p12, %p5431_p11 }
  0x18   : > { %5439 = shalt.err (!%p5436_p13)
}
  0x19   : > { %s5440_s19 = scalar_lea.vmem %s197_s29, 128  ;;  %p5448_p6 = scmp.lt.s32.totalorder %s197_s29, %s197_s29 }
  0x1a   : > { %p5441_p0 = scmp.ne.s32.totalorder %s197_s29, %s5440_s19  ;;  %p5449_p1 = scmp.lt.s32.totalorder %s5440_s19, %s5440_s19 }
  0x1c   : > { %p5443_p2 = pnand %p5441_p0, %p5713_p9  ;;  %p5450_p4 = por %p5449_p1, %p5448_p6 }
  0x1e   : > { %p5444_p3 = pneg %p5443_p2 }
  0x20   : > { %p5451_p5 = pnand %p5450_p4, %p5444_p3 }
  0x22   : > { %5454 = shalt.err (!%p5451_p5)
}
  0x23   : > { %4781 = dma.hbm_to_vmem [thread:$0]  (!%p5697_p7), %s8132_s1, 128, %s197_s29, [#allocation5]  }
  0x24   : > { %s5455_s9 = scalar_lea.hbm %s8134_s3, 32 }
  0x25   : > { %p5456_p8 = scmp.ne.s32.totalorder %s8134_s3, %s5455_s9  ;;  %p5462_p4 = scmp.lt.u32.totalorder %s5455_s9, %s8134_s3 }
  0x27   : > { %p5458_p10 = pnand %p5456_p8, %p5713_p9 }
  0x29   : > { %p5459_p1 = pneg %p5458_p10 }
  0x2b   : > { %p5464_p5 = pnand %p5462_p4, %p5459_p1 }
  0x2d   : > { %5467 = shalt.err (!%p5464_p5)
}
  0x2e   : > { %s5468_s29 = scalar_lea.vmem %s5701_s7, 32  ;;  %p5476_p0 = scmp.lt.s32.totalorder %s5701_s7, %s5701_s7 }
  0x2f   : > { %p5469_p11 = scmp.ne.s32.totalorder %s5701_s7, %s5468_s29  ;;  %p5477_p2 = scmp.lt.s32.totalorder %s5468_s29, %s5468_s29 }
  0x31   : > { %p5471_p12 = pnand %p5469_p11, %p5713_p9  ;;  %p5478_p3 = por %p5477_p2, %p5476_p0 }
  0x33   : > { %p5472_p13 = pneg %p5471_p12 }
  0x35   : > { %p5479_p6 = pnand %p5478_p3, %p5472_p13 }
  0x37   : > { %5482 = shalt.err (!%p5479_p6)
}
  0x38   : > { %4787 = dma.hbm_to_vmem [thread:$0]  (!%p5697_p7), %s8134_s3, 32, %s5701_s7, [#allocation8]  }
  0x39   : > { %s5483_s20 = scalar_lea.hbm %s8133_s2, 32768 }
  0x3a   : > { %p5484_p8 = scmp.ne.s32.totalorder %s8133_s2, %s5483_s20  ;;  %p5490_p4 = scmp.lt.u32.totalorder %s5483_s20, %s8133_s2 }
  0x3c   : > { %p5486_p10 = pnand %p5484_p8, %p5713_p9 }
  0x3e   : > { %p5487_p1 = pneg %p5486_p10 }
  0x40   : > { %p5492_p5 = pnand %p5490_p4, %p5487_p1 }
  0x42   : > { %5495 = shalt.err (!%p5492_p5)
}
  0x43   : > { %s5496_s7 = scalar_lea.vmem %s5703_s10, 32768  ;;  %p5504_p0 = scmp.lt.s32.totalorder %s5703_s10, %s5703_s10 }
  0x44   : > { %p5497_p11 = scmp.ne.s32.totalorder %s5703_s10, %s5496_s7  ;;  %p5505_p2 = scmp.lt.s32.totalorder %s5496_s7, %s5496_s7 }
  0x46   : > { %p5499_p12 = pnand %p5497_p11, %p5713_p9  ;;  %p5506_p3 = por %p5505_p2, %p5504_p0 }
  0x48   : > { %p5500_p13 = pneg %p5499_p12 }
  0x4a   : > { %p5507_p6 = pnand %p5506_p3, %p5500_p13 }
  0x4c   : > { %5510 = shalt.err (!%p5507_p6)
}
  0x4d   : > { %s5616_s11 = smov 256   ;;  %s5617_s12 = smov 16  }
  0x4e   : > { %4784 = dma.hbm_to_vmem [thread:$0]  (!%p5697_p7), %s8133_s2, 32768, %s5703_s10, [#allocation5], %s5616_s11, %s5616_s11, %s5617_s12  }
  0x4f   : > { %s5618_s29 = smov [#allocation9]   ;;  %s5511_s19 = scalar_lea.hbm %s8136_s5, 16 }
  0x50   : > { %s234_s15 = sshll.u32 %s5618_s29, 4  ;;  %p5512_p8 = scmp.ne.s32.totalorder %s8136_s5, %s5511_s19  ;;  %s235_s15 = int_to_ptr.vmem [resolvable:$true] %s234_s15 }
  0x51   : > { %p5518_p4 = scmp.lt.u32.totalorder %s5511_s19, %s8136_s5 }
  0x52   : > { %p5514_p10 = pnand %p5512_p8, %p5713_p9 }
  0x54   : > { %p5515_p1 = pneg %p5514_p10 }
  0x56   : > { %p5520_p5 = pnand %p5518_p4, %p5515_p1 }
  0x58   : > { %5523 = shalt.err (!%p5520_p5)
}
  0x59   : > { %s5524_s10 = scalar_lea.vmem %s235_s15, 16  ;;  %s5531_s9 = scalar_lea.vmem %s235_s15, 32 }
  0x5a   : > { %p5525_p11 = scmp.ne.s32.totalorder %s235_s15, %s5524_s10  ;;  %p5532_p0 = scmp.lt.s32.totalorder %s235_s15, %s235_s15 }
  0x5b   : > { %p5533_p2 = scmp.lt.s32.totalorder %s5531_s9, %s5524_s10 }
  0x5c   : > { %p5527_p12 = pnand %p5525_p11, %p5713_p9 }
  0x5d   : > { %p5534_p3 = por %p5533_p2, %p5532_p0 }
  0x5e   : > { %p5528_p13 = pneg %p5527_p12 }
  0x60   : > { %p5535_p6 = pnand %p5534_p3, %p5528_p13 }
  0x62   : > { %5538 = shalt.err (!%p5535_p6)
}
  0x63   : > { %4790 = dma.hbm_to_vmem [thread:$0]  (!%p5697_p7), %s8136_s5, 16, %s235_s15, [#allocation8]  }
  0x64   : > { %s5794_s16 = sadd.s32 1, %s5611_s24   ;;  %s28_s12 = sadd.s32 1, %s5607_s23 }
  0x65   : > { %s25_s13 = ssub.s32 %s5611_s24, %s5794_s16  ;;  %p35_p9 = scmp.ne.s32.totalorder %s5607_s23, %s5603_s22 }
  0x66   : > { %p26_p8 = scmp.eq.s32.totalorder %s25_s13, 0  ;;  %p36_p10 = scmp.eq.s32.totalorder %s5611_s24, 0 }
  0x67   : > { %p4799_p1 = scmp.lt.s32.totalorder %s5611_s24, 8  ;;  %s245_s8 = sand.u32 1, %s5607_s23  }
  0x68   : > { %s5805_s14 = scalar_select %p26_p8, %s5607_s23, %s28_s12  }
  0x69   : > { %p37_p4 = por %p36_p10, %p35_p9  ;;  %s4143_s29 = sshll.u32 %s245_s8, 11 }
  0x6a   : > { %s4174_s17 = sshll.u32 %s5611_s24, 15  ;;  %s249_s15 = scalar_lea.vmem [#allocation2], %s4143_s29 }
  0x6b   : > { %s5811_s20 = scalar_lea.hbm %s8131_s0, %s4174_s17  ;;  %s257_s21 = sshll.u32 %s249_s15, 4  ;;  %s5817_s21 = int_to_ptr.vmem [resolvable:$true] %s257_s21 }
  0x6c   : > { %p5813_p7 = pnand %p4799_p1, %p37_p4  ;;  %s5819_s24 = scalar_lea.sflag [#allocation3], %s245_s8 }
  0x6d   : > { %s5539_s30 = scalar_lea.hbm %s5811_s20, 32768  ;;  %s5544_s7 = scalar_lea.hbm %s8131_s0, 262144 }
  0x6e   : > { %p5540_p5 = scmp.ne.s32.totalorder %s5811_s20, %s5539_s30  ;;  %p5541_p11 = pneg %p5813_p7 }
  0x6f   : > { %p5545_p0 = scmp.lt.u32.totalorder %s5811_s20, %s8131_s0  ;;  %p5546_p2 = scmp.lt.u32.totalorder %s5544_s7, %s5539_s30 }
  0x70   : > { %p5542_p12 = pnand %p5541_p11, %p5540_p5  ;;  %p5548_p6 = scmp.lt.u32.totalorder %s5539_s30, %s5811_s20 }
  0x71   : > { %p5547_p3 = por %p5546_p2, %p5545_p0 }
  0x72   : > { %p5543_p13 = pneg %p5542_p12 }
  0x73   : > { %p5549_p9 = por %p5548_p6, %p5547_p3 }
  0x75   : > { %p5550_p8 = pnand %p5549_p9, %p5543_p13 }
  0x77   : > { %5553 = shalt.err (!%p5550_p8)
}
  0x78   : > { %s5554_s13 = scalar_lea.vmem %s5817_s21, 32768  ;;  %s5619_s8 = smov [#allocation2]  }
  0x79   : > { %p5555_p10 = scmp.ne.s32.totalorder %s5817_s21, %s5554_s13  ;;  %s5559_s29 = sshll.u32 %s5619_s8, 4  ;;  %s5560_s29 = int_to_ptr.vmem [resolvable:$false] %s5559_s29 }
  0x7a   : > { %s5561_s17 = scalar_lea.vmem %s5560_s29, 65536  ;;  %p5562_p5 = scmp.lt.s32.totalorder %s5817_s21, %s5560_s29 }
  0x7b   : > { %p5557_p1 = pnand %p5555_p10, %p5541_p11  ;;  %p5563_p12 = scmp.lt.s32.totalorder %s5561_s17, %s5554_s13 }
  0x7d   : > { %p5558_p4 = pneg %p5557_p1  ;;  %p5564_p0 = por %p5563_p12, %p5562_p5 }
  0x7f   : > { %p5565_p2 = pnand %p5564_p0, %p5558_p4 }
  0x81   : > { %5568 = shalt.err (!%p5565_p2)
}
  0x82   : > { %s5620_s18 = smov 512   ;;  %s5621_s19 = smov 32  }
  0x83   : > { %4794 = dma.hbm_to_vmem [thread:$0]  (!%p5813_p7), %s5811_s20, 32768, %s5817_s21, %s5819_s24, %s5620_s18, %s5620_s18, %s5621_s19  }
  0x84   : > { %p8187_p11 = scmp.ne.s32.totalorder %s8183_s27, 0 }
  0x86   : > { %269 = sbr.rel (%p8187_p11) target bundleno = 1428 (0x594), region = 44 }
  0x8d   : > { %s271_s15 = sand.u32 1, %s5603_s22   ;;  %p8188_p13 = scmp.ne.s32.totalorder %s8182_s26, 0 }
  0x8e   : > { %s4148_s30 = sshll.u32 %s271_s15, 11  ;;  %s272_s10 = scalar_lea.sflag [#allocation3], %s271_s15 }
  0x8f   : > { %s5850_s9 = scalar_lea.vmem [#allocation2], %s4148_s30 }
  0x90   : > { %5586 = dma.done.wait (%p8188_p13), %s272_s10, 32768  }
  0x91   : > { %5588 = vsyncadd (%p8188_p13), %s272_s10, 4294934528  ;;  %p8189_p3 = scmp.eq.s32.totalorder %s5677_s25, 0 }
  0x93   : > { %5590 = dma.done.wait (%p8189_p3), [#allocation5], 32896   ;;  %p8190_p7 = pmov %p8189_p3 }
  0x94   : > { %p8191_p6 = pmov %p8189_p3 }
  0x95   : > { %5592 = vsyncadd (%p8190_p7), [#allocation5], 4294934400 }
  0x96   : > { %5594 = dma.done.wait (%p8191_p6), [#allocation8], 48   ;;  %p8192_p9 = pmov %p8189_p3 }
  0x97   : > { %v8141_v0 = vmov 0.0   ;;  %v5867_v1 = vld [vmem:[%s5850_s9 + $0x8] sm:$0xff]  ;;  %v5881_v6 = vld [vmem:[%s5850_s9 + $0x118] sm:$0xff]  ;;  %v5900_v14 = vld [vmem:[%s5850_s9] sm:$0xff]  ;;  %vm1765_vm0 = vcmask 523264   ;;  %vm3451_vm1 = vcmask 1041409  }
  0x98   : > { %5596 = vsyncadd (%p8192_p9), [#allocation8], 4294967248  ;;  %1833 = vmatprep.mubr.f32.mxu0 %v8141_v0  ;;  %2046 = vmatprep.mubr.f32.mxu1 %v8141_v0  ;;  %v5870_v2 = vld [vmem:[%s5850_s9 + $0x28] sm:$0xff]  ;;  %v5885_v8 = vld [vmem:[%s5850_s9 + $0x138] sm:$0xff]  ;;  %vm3453_vm2 = vcmask 1042434   ;;  %vm3456_vm3 = vcmask 1043459  }
  0x99   : > { %v5873_v3 = vld [vmem:[%s5850_s9 + $0x48] sm:$0xff]  ;;  %v593_v4 = vmax.f32 %v5867_v1, %v5870_v2  ;;  %v5888_v9 = vld [vmem:[%s5850_s9 + $0x158] sm:$0xff]  ;;  %v671_v11 = vmax.f32 %v5881_v6, %v5885_v8  ;;  %v5903_v15 = vld [vmem:[%s5850_s9 + $0x20] sm:$0xff]  ;;  %vm3459_vm4 = vcmask 1044484   ;;  %vm3462_vm5 = vcmask 1045509   ;;  %p320_p8 = scmp.lt.s32.totalorder %s5677_s25, 7 }
  0x9a   : > { %v5878_v5 = vld [vmem:[%s5850_s9 + $0x68] sm:$0xff]  ;;  %v5897_v13 = vld [vmem:[%s5850_s9 + $0x178] sm:$0xff]  ;;  %v5910_v18 = vld [vmem:[%s5850_s9 + $0x40] sm:$0xff]  ;;  %v580_v19 = vmax.f32 %v5900_v14, %v5903_v15  ;;  %vm3465_vm6 = vcmask 1046534   ;;  %vm3468_vm7 = vcmask 1047559   ;;  %vm4018_vm8 = vcmask 261120  }
  0x9b   : > { %v594_v7 = vmax.f32 %v593_v4, %v5873_v3  ;;  %v5891_v10 = vld [vmem:[%s5850_s9 + $0x88] sm:$0xff]  ;;  %v672_v17 = vmax.f32 %v671_v11, %v5888_v9  ;;  %v5919_v22 = vld [vmem:[%s5850_s9 + $0x198] sm:$0xff]  ;;  %v5922_v23 = vld [vmem:[%s5850_s9 + $0x60] sm:$0xff]  ;;  %s8280_s25 = smov (!%p320_p8, %s5677_s25), 7 }
  0x9c   : > { %v5906_v16 = vld [vmem:[%s5850_s9 + $0xa8] sm:$0xff]  ;;  %v581_v25 = vmax.f32 %v580_v19, %v5910_v18  ;;  %v5927_v26 = vld [vmem:[%s5850_s9 + $0x110] sm:$0xff]  ;;  %v5940_v31 = vld [vmem:[%s5850_s9 + $0x1b8] sm:$0xff]  ;;  %s4153_s11 = sshll.u32 %s8280_s25, 3 }
  0x9d   : > { %v595_v12 = vmax.f32 %v594_v7, %v5878_v5  ;;  %v5915_v20 = vld [vmem:[%s5850_s9 + $0xc8] sm:$0xff]  ;;  %v673_v24 = vmax.f32 %v672_v17, %v5897_v13  ;;  %v5930_v27 = vld [vmem:[%s5850_s9 + $0x130] sm:$0xff]  ;;  %v5943_v32 = vld [vmem:[%s5850_s9 + $0x80] sm:$0xff]  ;;  %s323_s8 = scalar_lea.vmem %s8137_s6, %s4153_s11 }
  0x9e   : > { %v5933_v28 = vld [vmem:[%s5850_s9 + $0x150] sm:$0xff]  ;;  %v5936_v29 = vld [vmem:[%s5850_s9 + $0xe8] sm:$0xff]  ;;  %v658_v33 = vmax.f32 %v5927_v26, %v5930_v27  ;;  %v5948_v34 = vld [vmem:[%s5850_s9 + $0x1d8] sm:$0xff]  ;;  %v582_v37 = vmax.f32 %v581_v25, %v5922_v23 }
  0x9f   : > { %v596_v21 = vmax.f32 %v595_v12, %v5891_v10  ;;  %v674_v35 = vmax.f32 %v673_v24, %v5919_v22  ;;  %v5952_v36 = vld [vmem:[%s5850_s9 + $0xa0] sm:$0xff]  ;;  %v5956_v38 = vld [vmem:[%s5850_s9 + $0x170] sm:$0xff]  ;;  %v5961_v41 = vld [vmem:[%s5850_s9 + $0x18] sm:$0xff] }
  0xa0   : > { %v659_v40 = vmax.f32 %v658_v33, %v5933_v28  ;;  %v5964_v42 = vld [vmem:[%s5850_s9 + $0x38] sm:$0xff]  ;;  %v583_v46 = vmax.f32 %v582_v37, %v5943_v32  ;;  %v5975_v47 = vld [vmem:[%s5850_s9 + $0x190] sm:$0xff]  ;;  %v5981_v50 = vld [vmem:[%s5850_s9 + $0xc0] sm:$0xff] }
  0xa1   : > { %v597_v30 = vmax.f32 %v596_v21, %v5906_v16  ;;  %v5967_v43 = vld [vmem:[%s5850_s9 + $0x58] sm:$0xff]  ;;  %v675_v45 = vmax.f32 %v674_v35, %v5940_v31  ;;  %v619_v48 = vmax.f32 %v5961_v41, %v5964_v42  ;;  %v5993_v56 = vld [vmem:[%s5850_s9 + $0x1b0] sm:$0xff]  ;;  %v6003_v61 = vld [vmem:[%s5850_s9 + $0xe0] sm:$0xff] }
  0xa2   : > { %v5970_v44 = vld [vmem:[%s5850_s9 + $0x1f8] sm:$0xff]  ;;  %v660_v51 = vmax.f32 %v659_v40, %v5956_v38  ;;  %v584_v55 = vmax.f32 %v583_v46, %v5952_v36  ;;  %v6006_v62 = vld [vmem:[%s5850_s9 + $0x1d0] sm:$0xff] }
  0xa3   : > { %v598_v39 = vmax.f32 %v597_v30, %v5915_v20  ;;  %v5985_v52 = vld [vmem:[%s5850_s9 + $0x78] sm:$0xff]  ;;  %v676_v54 = vmax.f32 %v675_v45, %v5948_v34  ;;  %v620_v57 = vmax.f32 %v619_v48, %v5967_v43  ;;  %v6021_v21 = vld [vmem:[%s5850_s9 + $0x10] sm:$0xff] }
  0xa4   : > { %8193 = vst [vmem:[#allocation13_spill] sm:$0xff] %v5985_v52  ;;  %v5988_v53 = vld [vmem:[%s5850_s9 + $0x218] sm:$0xff]  ;;  %v661_v63 = vmax.f32 %v660_v51, %v5975_v47  ;;  %v585_v12 = vmax.f32 %v584_v55, %v5981_v50  ;;  %8199 = vst [vmem:[#allocation19_spill] sm:$0xff] %v6021_v21  ;;  %v6024_v24 = vld [vmem:[%s5850_s9 + $0x30] sm:$0xff] }
  0xa5   : > { %v599_v49 = vmax.f32 %v598_v39, %v5936_v29  ;;  %8194 = vst [vmem:[#allocation14_spill] sm:$0xff] %v5988_v53  ;;  %v5997_v58 = vld [vmem:[%s5850_s9 + $0x238] sm:$0xff]  ;;  %v677_v11 = vmax.f32 %v676_v54, %v5970_v44  ;;  %v621_v17 = vmax.f32 %v620_v57, %v5985_v52  ;;  %8200 = vst [vmem:[#allocation20_spill] sm:$0xff] %v6024_v24  ;;  %v6027_v30 = vld [vmem:[%s5850_s9 + $0x1f0] sm:$0xff] }
  0xa6   : > { %8195 = vst [vmem:[#allocation15_spill] sm:$0xff] %v5997_v58  ;;  %v6000_v59 = vld [vmem:[%s5850_s9 + $0x258] sm:$0xff]  ;;  %v723_v7 = vmax.f32 %v5988_v53, %v5997_v58  ;;  %v662_v33 = vmax.f32 %v661_v63, %v5993_v56  ;;  %v6035_v39 = vld [vmem:[%s5850_s9 + $0x50] sm:$0xff]  ;;  %v606_v40 = vmax.f32 %v6021_v21, %v6024_v24  ;;  %v586_v46 = vmax.f32 %v585_v12, %v6003_v61 }
  0xa7   : > { %8196 = vst [vmem:[#allocation16_spill] sm:$0xff] %v6000_v59  ;;  %v600_v60 = vrot.slane %v599_v49, 4  ;;  %v6010_v4 = vld [vmem:[%s5850_s9 + $0x98] sm:$0xff]  ;;  %8202 = vst [vmem:[#allocation22_spill] sm:$0xff] %v6035_v39  ;;  %v678_v45 = vrot.slane %v677_v11, 4  ;;  %v6048_v54 = vld [vmem:[%s5850_s9 + $0x70] sm:$0xff] }
  0xa8   : > { %8197 = vst [vmem:[#allocation17_spill] sm:$0xff] %v6010_v4  ;;  %v6018_v19 = vld [vmem:[%s5850_s9 + $0x278] sm:$0xff]  ;;  %v724_v37 = vmax.f32 %v723_v7, %v6000_v59  ;;  %v663_v57 = vmax.f32 %v662_v33, %v6006_v62  ;;  %v607_v63 = vmax.f32 %v606_v40, %v6035_v39  ;;  %v6054_v7 = vld [vmem:[%s5850_s9 + $0x210] sm:$0xff] }
  0xa9   : > { %8198 = vst [vmem:[#allocation18_spill] sm:$0xff] %v6018_v19  ;;  %v601_v25 = vmax.f32 %v599_v49, %v600_v60  ;;  %v6031_v35 = vld [vmem:[%s5850_s9 + $0xb8] sm:$0xff]  ;;  %v622_v49 = vmax.f32 %v621_v17, %v6010_v4  ;;  %8205 = vst [vmem:[#allocation25_spill] sm:$0xff] %v6054_v7  ;;  %v6057_v12 = vld [vmem:[%s5850_s9 + $0x230] sm:$0xff]  ;;  %v679_v17 = vmax.f32 %v677_v11, %v678_v45  ;;  %v587_v4 = vrot.slane %v586_v46, 4 }
  0xaa   : > { %8201 = vst [vmem:[#allocation21_spill] sm:$0xff] %v6031_v35  ;;  %v6041_v48 = vld [vmem:[%s5850_s9 + $0xd8] sm:$0xff]  ;;  %v725_v60 = vmax.f32 %v724_v37, %v6018_v19  ;;  %8206 = vst [vmem:[#allocation26_spill] sm:$0xff] %v6057_v12  ;;  %v6060_v0 = vld [vmem:[%s5850_s9 + $0x250] sm:$0xff]  ;;  %v710_v37 = vmax.f32 %v6054_v7, %v6057_v12  ;;  %v664_v39 = vmax.f32 %v663_v57, %v6027_v30 }
  0xab   : > { %8203 = vst [vmem:[#allocation23_spill] sm:$0xff] %v6041_v48  ;;  %v6045_v51 = vld [vmem:[%s5850_s9 + $0x298] sm:$0xff]  ;;  %v602_v55 = vrot.slane %v601_v25, 2  ;;  %v623_v24 = vmax.f32 %v622_v49, %v6031_v35  ;;  %v6067_v33 = vld [vmem:[%s5850_s9 + $0x90] sm:$0xff]  ;;  %v608_v11 = vmax.f32 %v607_v63, %v6048_v54  ;;  %v680_v49 = vrot.slane %v679_v17, 2 }
  0xac   : > { %8204 = vst [vmem:[#allocation24_spill] sm:$0xff] %v6045_v51  ;;  %v6064_v21 = vld [vmem:[%s5850_s9 + $0x2b8] sm:$0xff]  ;;  %8208 = vst [vmem:[#allocation28_spill] sm:$0xff] %v6067_v33  ;;  %v726_v59 = vmax.f32 %v725_v60, %v6045_v51  ;;  %v6078_v45 = vld [vmem:[%s5850_s9 + $0x270] sm:$0xff]  ;;  %v588_v35 = vmax.f32 %v586_v46, %v587_v4  ;;  %v665_v57 = vrot.slane %v664_v39, 4 }
  0xad   : > { %8207 = vst [vmem:[#allocation27_spill] sm:$0xff] %v6064_v21  ;;  %v603_v40 = vmax.f32 %v601_v25, %v602_v55  ;;  %v6073_v19 = vld [vmem:[%s5850_s9 + $0xf8] sm:$0xff]  ;;  %v624_v52 = vmax.f32 %v623_v24, %v6041_v48  ;;  %v6085_v53 = vld [vmem:[%s5850_s9 + $0xb0] sm:$0xff]  ;;  %v711_v25 = vmax.f32 %v710_v37, %v6060_v0  ;;  %v6090_v60 = vmax.f32 %v608_v11, %v6067_v33 }
  0xae   : > { %v6082_v58 = vld [vmem:[%s5850_s9 + $0x2d8] sm:$0xff]  ;;  %v727_v12 = vmax.f32 %v726_v59, %v6064_v21  ;;  %v6093_v63 = vld [vmem:[%s5850_s9 + $0x290] sm:$0xff]  ;;  %v681_v51 = vmax.f32 %v679_v17, %v680_v49  ;;  %v589_v7 = vrot.slane %v588_v35, 2  ;;  %v666_v48 = vmax.f32 %v664_v39, %v665_v57 }
  0xaf   : > { %v604_v55 = vrot.slane %v603_v40, 1  ;;  %v6096_v4 = vmax.f32 %v624_v52, %v6073_v19  ;;  %v712_v24 = vmax.f32 %v711_v25, %v6078_v45 }
  0xb0   : > { %v6102_v37 = vmax.f32 %v727_v12, %v6082_v58  ;;  %v682_v11 = vrot.slane %v681_v51, 1  ;;  %v590_v33 = vmax.f32 %v588_v35, %v589_v7  ;;  %v667_v39 = vrot.slane %v666_v48, 2 }
  0xb1   : > { %v6099_v46 = vmax.f32 %v603_v40, %v604_v55  ;;  %v626_v21 = vrot.slane %v6096_v4, 4  ;;  %v6108_v17 = vmax.f32 %v712_v24, %v6093_v63 }
  0xb2   : > { %v6116_v49 = vmax.f32 %v681_v51, %v682_v11  ;;  %v591_v25 = vrot.slane %v590_v33, 1  ;;  %v668_v24 = vmax.f32 %v666_v48, %v667_v39 }
  0xb3   : > { %v997_v52 = vsub.f32 %v5867_v1, %v6099_v46  ;;  %v1001_v40 = vsub.f32 %v5870_v2, %v6099_v46  ;;  %v1005_v12 = vsub.f32 %v5873_v3, %v6099_v46  ;;  %v1009_v35 = vsub.f32 %v5878_v5, %v6099_v46 }
  0xb4   : > { %v1013_v7 = vsub.f32 %v5891_v10, %v6099_v46  ;;  %v1031_v2 = vsub.f32 %v5881_v6, %v6116_v49  ;;  %v1035_v59 = vsub.f32 %v5885_v8, %v6116_v49  ;;  %v6126_v3 = vmax.f32 %v590_v33, %v591_v25 }
  0xb5   : > { %v1254_v55 = vmul.f32 1.442695, %v997_v52  ;;  %v1262_v57 = vmul.f32 1.442695, %v1001_v40  ;;  %v1270_v1 = vmul.f32 1.442695, %v1005_v12  ;;  %v1039_v5 = vsub.f32 %v5888_v9, %v6116_v49 }
  0xb6   : > { %v1278_v51 = vmul.f32 1.442695, %v1009_v35  ;;  %v669_v11 = vrot.slane %v668_v24, 1  ;;  %v1043_v10 = vsub.f32 %v5897_v13, %v6116_v49  ;;  %v1322_v48 = vmul.f32 1.442695, %v1031_v2 }
  0xb7   : > { %4845 = vpow2.f32 %v1254_v55  ;;  %v1330_v52 = vmul.f32 1.442695, %v1035_v59  ;;  %v996_v6 = vsub.f32 %v5900_v14, %v6126_v3  ;;  %v1000_v8 = vsub.f32 %v5903_v15, %v6126_v3 }
  0xb8   : > { %4847 = vpow2.f32 %v1262_v57  ;;  %v6136_v33 = vmax.f32 %v668_v24, %v669_v11  ;;  %v1338_v40 = vmul.f32 1.442695, %v1039_v5  ;;  %v1346_v12 = vmul.f32 1.442695, %v1043_v10 }
  0xb9   : > { %4849 = vpow2.f32 %v1270_v1  ;;  %v1252_v39 = vmul.f32 1.442695, %v996_v6  ;;  %v1004_v9 = vsub.f32 %v5910_v18, %v6126_v3  ;;  %v1260_v13 = vmul.f32 1.442695, %v1000_v8 }
  0xba   : > { %4851 = vpow2.f32 %v1322_v48  ;;  %v1030_v59 = vsub.f32 %v5927_v26, %v6136_v33  ;;  %v1034_v14 = vsub.f32 %v5930_v27, %v6136_v33  ;;  %v1008_v15 = vsub.f32 %v5922_v23, %v6126_v3 }
  0xbb   : > { %4853 = vpow2.f32 %v1330_v52  ;;  %v1268_v25 = vmul.f32 1.442695, %v1004_v9  ;;  %v1038_v35 = vsub.f32 %v5933_v28, %v6136_v33  ;;  %v1042_v18 = vsub.f32 %v5956_v38, %v6136_v33 }
  0xbc   : > { %4855 = vpow2.f32 %v1252_v39  ;;  %v1320_v55 = vmul.f32 1.442695, %v1030_v59  ;;  %v1328_v57 = vmul.f32 1.442695, %v1034_v14  ;;  %v1276_v24 = vmul.f32 1.442695, %v1008_v15 }
  0xbd   : > { %4857 = vpow2.f32 %v1260_v13  ;;  %v1336_v26 = vmul.f32 1.442695, %v1038_v35  ;;  %v1017_v27 = vsub.f32 %v5906_v16, %v6099_v46  ;;  %v1344_v1 = vmul.f32 1.442695, %v1042_v18 }
  0xbe   : > { %4859 = vpow2.f32 %v1278_v51  ;;  %v1286_v2 = vmul.f32 1.442695, %v1013_v7  ;;  %v1047_v23 = vsub.f32 %v5919_v22, %v6116_v49  ;;  %v1051_v11 = vsub.f32 %v5940_v31, %v6116_v49 }
  0xbf   : > { %4861 = vpow2.f32 %v1320_v55  ;;  %v1294_v28 = vmul.f32 1.442695, %v1017_v27  ;;  %v1012_v38 = vsub.f32 %v5943_v32, %v6126_v3  ;;  %v1016_v16 = vsub.f32 %v5952_v36, %v6126_v3 }
  0xc0   : > { %4863 = vpow2.f32 %v1328_v57  ;;  %v1354_v5 = vmul.f32 1.442695, %v1047_v23  ;;  %v1046_v7 = vsub.f32 %v5975_v47, %v6136_v33  ;;  %v1362_v22 = vmul.f32 1.442695, %v1051_v11  ;;  %v6188_v57 = vld [vmem:[%s5850_s9 + $0xd0] sm:$0xff] }
  0xc1   : > { %v4846_v51 = vpop.eup %4845  ;;  %4865 = vpow2.f32 %v1338_v40  ;;  %v1284_v48 = vmul.f32 1.442695, %v1012_v38  ;;  %v1050_v52 = vsub.f32 %v5993_v56, %v6136_v33  ;;  %v1292_v32 = vmul.f32 1.442695, %v1016_v16  ;;  %v6205_v23 = vld [vmem:[%s5850_s9 + $0xf0] sm:$0xff] }
  0xc2   : > { %v4848_v10 = vpop.eup %4847  ;;  %4867 = vpow2.f32 %v1346_v12  ;;  %v1352_v8 = vmul.f32 1.442695, %v1046_v7  ;;  %v1021_v36 = vsub.f32 %v5915_v20, %v6099_v46  ;;  %v1025_v47 = vsub.f32 %v5936_v29, %v6099_v46 }
  0xc3   : > { %v4850_v31 = vpop.eup %4849  ;;  %v4210_v6 = vpack.c.bf16 %v4848_v10, %v4846_v51  ;;  %4869 = vpow2.f32 %v1268_v25  ;;  %v1360_v39 = vmul.f32 1.442695, %v1050_v52  ;;  %v1055_v56 = vsub.f32 %v5948_v34, %v6116_v49  ;;  %v6218_v51 = vld [vmem:[%s5850_s9 + $0x2d0] sm:$0xff]  ;;  %v6223_v10 = vld [vmem:[%s5850_s9 + $0x148] sm:$0xff] }
  0xc4   : > { %v4852_v40 = vpop.eup %4851  ;;  %4871 = vpow2.f32 %v1276_v24  ;;  %v1059_v9 = vsub.f32 %v5970_v44, %v6116_v49  ;;  %v1020_v13 = vsub.f32 %v5981_v50, %v6126_v3  ;;  %v1302_v20 = vmul.f32 1.442695, %v1021_v36  ;;  %v6181_v44 = vld [vmem:[%s5850_s9 + $0x2f8] sm:$0xff]  ;;  %v6233_v36 = vld [vmem:[%s5850_s9 + $0x168] sm:$0xff] }
  0xc5   : > { %v4854_v12 = vpop.eup %4853  ;;  %4211 = vmatprep.subr.bf16.mxu0 %v4210_v6  ;;  %4873 = vpow2.f32 %v1336_v26  ;;  %v1310_v15 = vmul.f32 1.442695, %v1025_v47  ;;  %v6174_v46 = vmul.f32 1.442695, %v1055_v56  ;;  %v1024_v34 = vsub.f32 %v6003_v61, %v6126_v3  ;;  %v6195_v26 = vld [vmem:[%s5850_s9 + $0x2b0] sm:$0xff] }
  0xc6   : > { %v4856_v59 = vpop.eup %4855  ;;  %v4258_v14 = vpack.c.bf16 %v4854_v12, %v4852_v40  ;;  %4875 = vpow2.f32 %v1344_v1  ;;  %v6176_v25 = vmul.f32 1.442695, %v1059_v9  ;;  %v6183_v35 = vmul.f32 1.442695, %v1020_v13 }
  0xc7   : > { %v4858_v29 = vpop.eup %4857  ;;  %4877 = vpow2.f32 %v1286_v2  ;;  %v1054_v55 = vsub.f32 %v6006_v62, %v6136_v33  ;;  %v6190_v61 = vmul.f32 1.442695, %v1024_v34  ;;  %v1058_v3 = vsub.f32 %v6027_v30, %v6136_v33  ;;  %v6211_v30 = vld [vmem:[%s5850_s9 + $0x128] sm:$0xff] }
  0xc8   : > { %v4860_v49 = vpop.eup %4859  ;;  %4259 = vmatprep.subr.bf16.mxu1 %v4258_v14  ;;  %v4212_v50 = vpack.c.bf16 %v4858_v29, %v4856_v59  ;;  %4879 = vpow2.f32 %v1294_v28  ;;  %v627_v62 = vmax.f32 %v6096_v4, %v626_v21  ;;  %v729_v2 = vmax.f32 %v6102_v37, %v6181_v44  ;;  %v6208_v28 = vld [vmem:[%s5850_s9 + $0x108] sm:$0xff] }
  0xc9   : > { %v4862_v18 = vpop.eup %4861  ;;  %v4214_v24 = vpack.c.bf16 %v4860_v49, %v4850_v31  ;;  %4881 = vpow2.f32 %v1354_v5  ;;  %v6197_v1 = vmul.f32 1.442695, %v1054_v55  ;;  %v1376_v38 = vmul.f32 1.442695, %v1058_v3  ;;  %v6238_v14 = vld [vmem:[%s5850_s9 + $0x188] sm:$0xff] }
  0xca   : > { %v4864_v27 = vpop.eup %4863  ;;  %4213 = vmatpush1.bf16.msra.mxu0 %v4212_v50  ;;  %4883 = vpow2.f32 %v1362_v22  ;;  %v8209_v21 = vmax.f32 %v6090_v60, %v6085_v53  ;;  %v628_v5 = vrot.slane %v627_v62, 2  ;;  %v730_v16 = vrot.slane %v729_v2, 4  ;;  %v6227_v60 = vld [vmem:[%s5850_s9 + $0x2f0] sm:$0xff] }
  0xcb   : > { %v4866_v33 = vpop.eup %4865  ;;  %v4260_v11 = vpack.c.bf16 %v4864_v27, %v4862_v18  ;;  %4215 = vmatprep.subr.bf16.mxu0 %v4214_v24  ;;  %4885 = vpow2.f32 %v1284_v48  ;;  %v714_v7 = vmax.f32 %v6108_v17, %v6195_v26  ;;  %v645_v31 = vmax.f32 %v6208_v28, %v6211_v30 }
  0xcc   : > { %v611_v4 = vmax.f32 %v8209_v21, %v6188_v57  ;;  %v4868_v37 = vpop.eup %4867  ;;  %4887 = vpow2.f32 %v1292_v32  ;;  %v629_v32 = vmax.f32 %v627_v62, %v628_v5  ;;  %v731_v40 = vmax.f32 %v729_v2, %v730_v16 }
  0xcd   : > { %v4870_v22 = vpop.eup %4869  ;;  %4261 = vmatpush1.bf16.msra.mxu1 %v4260_v11  ;;  %v4262_v48 = vpack.c.bf16 %v4868_v37, %v4866_v33  ;;  %4889 = vpow2.f32 %v1352_v8  ;;  %v715_v17 = vmax.f32 %v714_v7, %v6218_v51  ;;  %v646_v56 = vmax.f32 %v645_v31, %v6223_v10 }
  0xce   : > { %v612_v52 = vmax.f32 %v611_v4, %v6205_v23  ;;  %v4872_v6 = vpop.eup %4871  ;;  %4891 = vpow2.f32 %v1360_v39  ;;  %v630_v13 = vrot.slane %v629_v32, 1  ;;  %v732_v59 = vrot.slane %v731_v40, 2 }
  0xcf   : > { %v4874_v47 = vpop.eup %4873  ;;  %4263 = vmatprep.subr.bf16.mxu1 %v4262_v48  ;;  %v4216_v12 = vpack.c.bf16 %v4872_v6, %v4870_v22  ;;  %4893 = vpow2.f32 %v1302_v20  ;;  %v716_v39 = vmax.f32 %v715_v17, %v6227_v60  ;;  %v647_v50 = vmax.f32 %v646_v56, %v6233_v36  ;;  %v8211_v6 = vld [vmem:[#allocation15_spill] sm:$0xff] }
  0xd0   : > { %v613_v8 = vrot.slane %v612_v52, 4  ;;  %v4876_v9 = vpop.eup %4875  ;;  %4895 = vpow2.f32 %v1310_v15  ;;  %v6243_v55 = vmax.f32 %v629_v32, %v630_v13  ;;  %v733_v15 = vmax.f32 %v731_v40, %v732_v59  ;;  %v8212_v32 = vld [vmem:[#allocation13_spill] sm:$0xff]  ;;  %v8213_v59 = vld [vmem:[#allocation16_spill] sm:$0xff] }
  0xd1   : > { %v4878_v29 = vpop.eup %4877  ;;  %4217 = vmatpush1.bf16.msra.mxu0 %v4216_v12  ;;  %v4264_v34 = vpack.c.bf16 %v4876_v9, %v4874_v47  ;;  %4897 = vpow2.f32 %v6174_v46  ;;  %v717_v18 = vrot.slane %v716_v39, 4  ;;  %v6247_v62 = vmax.f32 %v647_v50, %v6238_v14 }
  0xd2   : > { %v614_v49 = vmax.f32 %v612_v52, %v613_v8  ;;  %v4880_v20 = vpop.eup %4879  ;;  %4899 = vpow2.f32 %v6176_v25  ;;  %v999_v2 = vsub.f32 %v5961_v41, %v6243_v55  ;;  %v1003_v25 = vsub.f32 %v5964_v42, %v6243_v55 }
  0xd3   : > { %v4882_v24 = vpop.eup %4881  ;;  %4265 = vmatpush1.bf16.msra.mxu1 %v4264_v34  ;;  %v4218_v3 = vpack.c.bf16 %v4880_v20, %v4878_v29  ;;  %4901 = vpow2.f32 %v6183_v35  ;;  %v734_v33 = vrot.slane %v733_v15, 1  ;;  %v718_v4 = vmax.f32 %v716_v39, %v717_v18  ;;  %v8215_v20 = vld [vmem:[#allocation20_spill] sm:$0xff] }
  0xd4   : > { %v615_v27 = vrot.slane %v614_v49, 2  ;;  %v4884_v46 = vpop.eup %4883  ;;  %4903 = vpow2.f32 %v6190_v61  ;;  %v1258_v5 = vmul.f32 1.442695, %v999_v2  ;;  %v1266_v16 = vmul.f32 1.442695, %v1003_v25 }
  0xd5   : > { %v4886_v11 = vpop.eup %4885  ;;  %4219 = vmatprep.subr.bf16.mxu0 %v4218_v3  ;;  %v4266_v21 = vpack.c.bf16 %v4884_v46, %v4882_v24  ;;  %4905 = vpow2.f32 %v6197_v1  ;;  %v6255_v7 = vmax.f32 %v733_v15, %v734_v33  ;;  %v719_v48 = vrot.slane %v718_v4, 2  ;;  %v8210_v1 = vld [vmem:[#allocation14_spill] sm:$0xff] }
  0xd6   : > { %v616_v35 = vmax.f32 %v614_v49, %v615_v27  ;;  %v4888_v37 = vpop.eup %4887  ;;  %4907 = vpow2.f32 %v1376_v38  ;;  %v1007_v42 = vsub.f32 %v5967_v43, %v6243_v55  ;;  %v1011_v40 = vsub.f32 %v8212_v32, %v6243_v55  ;;  %v8214_v49 = vld [vmem:[#allocation19_spill] sm:$0xff]  ;;  %v8216_v27 = vld [vmem:[#allocation18_spill] sm:$0xff] }
  0xd7   : > { %v4890_v61 = vpop.eup %4889  ;;  %4267 = vmatprep.subr.bf16.mxu1 %v4266_v21  ;;  %v4220_v41 = vpack.c.bf16 %v4888_v37, %v4886_v11  ;;  %4909 = vpow2.f32 %v1258_v5  ;;  %v1063_v31 = vsub.f32 %v8210_v1, %v6255_v7  ;;  %v1067_v38 = vsub.f32 %v8211_v6, %v6255_v7  ;;  %v8217_v5 = vld [vmem:[#allocation22_spill] sm:$0xff]  ;;  %v8219_v1 = vld [vmem:[#allocation25_spill] sm:$0xff] }
  0xd8   : > { %v617_v22 = vrot.slane %v616_v35, 1  ;;  %v4892_v52 = vpop.eup %4891  ;;  %4911 = vpow2.f32 %v1266_v16  ;;  %v720_v8 = vmax.f32 %v718_v4, %v719_v48  ;;  %v1274_v13 = vmul.f32 1.442695, %v1007_v42  ;;  %v8218_v48 = vld [vmem:[#allocation17_spill] sm:$0xff]  ;;  %v8220_v6 = vld [vmem:[#allocation26_spill] sm:$0xff] }
  0xd9   : > { %v4894_v17 = vpop.eup %4893  ;;  %4221 = vmatpush1.bf16.msra.mxu0 %v4220_v41  ;;  %v4268_v47 = vpack.c.bf16 %v4892_v52, %v4890_v61  ;;  %v1386_v56 = vmul.f32 1.442695, %v1063_v31  ;;  %v1394_v9 = vmul.f32 1.442695, %v1067_v38  ;;  %v1071_v39 = vsub.f32 %v8213_v59, %v6255_v7 }
  0xda   : > { %v6265_v12 = vmax.f32 %v616_v35, %v617_v22  ;;  %v4896_v43 = vpop.eup %4895  ;;  %v721_v18 = vrot.slane %v720_v8, 1  ;;  %v1282_v3 = vmul.f32 1.442695, %v1011_v40  ;;  %v1075_v46 = vsub.f32 %v8216_v27, %v6255_v7 }
  0xdb   : > { %v4898_v29 = vpop.eup %4897  ;;  %4269 = vmatpush1.bf16.msra.mxu1 %v4268_v47  ;;  %v4222_v34 = vpack.c.bf16 %v4896_v43, %v4894_v17  ;;  %4913 = vpow2.f32 %v1386_v56  ;;  %v1402_v2 = vmul.f32 1.442695, %v1071_v39  ;;  %v1015_v42 = vsub.f32 %v8218_v48, %v6243_v55  ;;  %v6287_v17 = vld [vmem:[#allocation4] sm:$0xff]  ;;  %v8221_v39 = vld [vmem:[#allocation21_spill] sm:$0xff] }
  0xdc   : > { %v998_v50 = vsub.f32 %v8214_v49, %v6265_v12  ;;  %v1002_v15 = vsub.f32 %v8215_v20, %v6265_v12  ;;  %v4900_v24 = vpop.eup %4899  ;;  %4915 = vpow2.f32 %v1394_v9  ;;  %v6275_v4 = vmax.f32 %v720_v8, %v721_v18 }
  0xdd   : > { %v4902_v25 = vpop.eup %4901  ;;  %4223 = vmatprep.subr.bf16.mxu0 %v4222_v34  ;;  %v4270_v33 = vpack.c.bf16 %v4900_v24, %v4898_v29  ;;  %4917 = vpow2.f32 %v1274_v13  ;;  %v1410_v37 = vmul.f32 1.442695, %v1075_v46  ;;  %v1006_v16 = vsub.f32 %v8217_v5, %v6265_v12  ;;  %v8224_v24 = vld [vmem:[#allocation28_spill] sm:$0xff] }
  0xde   : > { %v1256_v11 = vmul.f32 1.442695, %v998_v50  ;;  %v1264_v21 = vmul.f32 1.442695, %v1002_v15  ;;  %v4904_v35 = vpop.eup %4903  ;;  %v1010_v22 = vsub.f32 %v6048_v54, %v6265_v12  ;;  %v1062_v31 = vsub.f32 %v8219_v1, %v6275_v4  ;;  %v8222_v50 = vld [vmem:[#allocation24_spill] sm:$0xff] }
  0xdf   : > { %v4906_v61 = vpop.eup %4905  ;;  %4271 = vmatprep.subr.bf16.mxu1 %v4270_v33  ;;  %v4224_v41 = vpack.c.bf16 %v4904_v35, %v4902_v25  ;;  %v1066_v38 = vsub.f32 %v8220_v6, %v6275_v4  ;;  %v1272_v32 = vmul.f32 1.442695, %v1006_v16  ;;  %v1070_v54 = vsub.f32 %v6060_v0, %v6275_v4 }
  0xe0   : > { %4919 = vpow2.f32 %v1256_v11  ;;  %v4908_v52 = vpop.eup %4907  ;;  %v1280_v47 = vmul.f32 1.442695, %v1010_v22  ;;  %v1384_v43 = vmul.f32 1.442695, %v1062_v31  ;;  %v1074_v9 = vsub.f32 %v6078_v45, %v6275_v4  ;;  %v8223_v45 = vld [vmem:[#allocation27_spill] sm:$0xff] }
  0xe1   : > { %4921 = vpow2.f32 %v1264_v21  ;;  %4225 = vmatpush1.bf16.msra.mxu0 %v4224_v41  ;;  %v4272_v40 = vpack.c.bf16 %v4908_v52, %v4906_v61  ;;  %v4910_v8 = vpop.eup %4909  ;;  %v1392_v56 = vmul.f32 1.442695, %v1066_v38  ;;  %v1400_v59 = vmul.f32 1.442695, %v1070_v54 }
  0xe2   : > { %4923 = vpow2.f32 %v1282_v3  ;;  %v4912_v13 = vpop.eup %4911  ;;  %v1019_v29 = vsub.f32 %v8221_v39, %v6243_v55  ;;  %v1290_v34 = vmul.f32 1.442695, %v1015_v42  ;;  %v1408_v0 = vmul.f32 1.442695, %v1074_v9  ;;  %v6350_v39 = vld [vmem:[%s5850_s9 + $0x100] sm:$0xff] }
  0xe3   : > { %4925 = vpow2.f32 %v1402_v2  ;;  %4273 = vmatpush1.bf16.msra.mxu1 %v4272_v40  ;;  %v4226_v49 = vpack.c.bf16 %v4912_v13, %v4910_v8  ;;  %v1079_v20 = vsub.f32 %v8222_v50, %v6255_v7  ;;  %v1083_v18 = vsub.f32 %v8223_v45, %v6255_v7  ;;  %v6344_v13 = vld [vmem:[%s5850_s9 + $0x1e8] sm:$0xff] }
  0xe4   : > { %4927 = vpow2.f32 %v1410_v37  ;;  %4154 = vmatmul.mubr.msk.f32.vlgmr.msra.gmra.mrb[0].mxu0 %vm1765_vm0, %v6287_v17  ;;  %v1298_v15 = vmul.f32 1.442695, %v1019_v29  ;;  %v1014_v3 = vsub.f32 %v8224_v24, %v6265_v12  ;;  %v8225_v27 = vmov 0.0  }
  0xe5   : > { %4929 = vpow2.f32 %v1384_v43  ;;  %1904 = vmatprep.mubr.f32.mxu0 %v8225_v27  ;;  %v4914_v46 = vpop.eup %4913  ;;  %4227 = vmatprep.subr.bf16.mxu0 %v4226_v49  ;;  %v1418_v2 = vmul.f32 1.442695, %v1079_v20  ;;  %v1018_v25 = vsub.f32 %v6085_v53, %v6265_v12  ;;  %v1078_v33 = vsub.f32 %v6093_v63, %v6275_v4  ;;  %v8226_v63 = vld [vmem:[#allocation23_spill] sm:$0xff]  ;;  %v6360_v49 = vld [vmem:[%s5850_s9 + $0x310] sm:$0xff] }
  0xe6   : > { %4931 = vpow2.f32 %v1392_v56  ;;  %4157 = vmatmul.mubr.msk.f32.vlgmr.msra.gmra.mrb[0].mxu1 %vm1765_vm0, %v6287_v17  ;;  %v4916_v11 = vpop.eup %4915  ;;  %v1426_v21 = vmul.f32 1.442695, %v1083_v18  ;;  %v1288_v35 = vmul.f32 1.442695, %v1014_v3  ;;  %v1082_v37 = vsub.f32 %v6195_v26, %v6275_v4 }
  0xe7   : > { %4933 = vpow2.f32 %v1272_v32  ;;  %2188 = vmatprep.mubr.f32.mxu1 %v8225_v27  ;;  %v4918_v5 = vpop.eup %4917  ;;  %v4290_v16 = vpack.c.bf16 %v4916_v11, %v4914_v46  ;;  %v1296_v61 = vmul.f32 1.442695, %v1018_v25  ;;  %v1416_v41 = vmul.f32 1.442695, %v1078_v33  ;;  %v6379_v46 = vld [vmem:[%s5850_s9 + $0x378] sm:$0xff]  ;;  %v6385_v25 = vld [vmem:[%s5850_s9 + $0x350] sm:$0xff] }
  0xe8   : > { %4935 = vpow2.f32 %v1280_v47  ;;  %v1424_v53 = vmul.f32 1.442695, %v1082_v37  ;;  %v1023_v48 = vsub.f32 %v8226_v63, %v6243_v55  ;;  %v1027_v42 = vsub.f32 %v6073_v19, %v6243_v55  ;;  %v6324_v19 = vld [vmem:[%s5850_s9 + $0x1a8] sm:$0xff] }
  0xe9   : > { %4937 = vpow2.f32 %v1400_v59  ;;  %4291 = vmatprep.subr.bf16.mxu1 %v4290_v16  ;;  %v1087_v26 = vsub.f32 %v6082_v58, %v6255_v7  ;;  %v1091_v1 = vsub.f32 %v6181_v44, %v6255_v7  ;;  %v1022_v31 = vsub.f32 %v6188_v57, %v6265_v12  ;;  %v6327_v55 = vld [vmem:[%s5850_s9 + $0x1c8] sm:$0xff]  ;;  %v6332_v7 = vld [vmem:[%s5850_s9 + $0x318] sm:$0xff] }
  0xea   : > { %v4920_v22 = vpop.eup %4919  ;;  %4939 = vpow2.f32 %v1408_v0  ;;  %v1306_v32 = vmul.f32 1.442695, %v1023_v48  ;;  %v1314_v40 = vmul.f32 1.442695, %v1027_v42  ;;  %v6335_v57 = vld [vmem:[%s5850_s9 + $0x338] sm:$0xff]  ;;  %v1026_v43 = vsub.f32 %v6205_v23, %v6265_v12  ;;  %v6363_v0 = vld [vmem:[%s5850_s9 + $0x330] sm:$0xff] }
  0xeb   : > { %v4922_v52 = vpop.eup %4921  ;;  %4941 = vpow2.f32 %v1290_v34  ;;  %v1434_v54 = vmul.f32 1.442695, %v1087_v26  ;;  %v6329_v44 = vmul.f32 1.442695, %v1091_v1  ;;  %v6339_v56 = vmul.f32 1.442695, %v1022_v31 }
  0xec   : > { %v4924_v6 = vpop.eup %4923  ;;  %v4228_v38 = vpack.c.bf16 %v4922_v52, %v4920_v22  ;;  %4943 = vpow2.f32 %v1298_v15  ;;  %v1086_v9 = vsub.f32 %v6218_v51, %v6275_v4  ;;  %v6347_v59 = vld [vmem:[%s5850_s9 + $0x358] sm:$0xff]  ;;  %v1090_v23 = vsub.f32 %v6227_v60, %v6275_v4  ;;  %v6357_v51 = vld [vmem:[%s5850_s9 + $0x120] sm:$0xff]  ;;  %v6370_v4 = vld [vmem:[%s5850_s9 + $0x208] sm:$0xff] }
  0xed   : > { %v4926_v58 = vpop.eup %4925  ;;  %v4230_v47 = vpack.c.bf16 %v4924_v6, %v4918_v5  ;;  %4945 = vpow2.f32 %v1418_v2  ;;  %v649_v12 = vmax.f32 %v6247_v62, %v6324_v19  ;;  %v1312_v20 = vmul.f32 1.442695, %v1026_v43  ;;  %v6373_v62 = vld [vmem:[%s5850_s9 + $0x228] sm:$0xff]  ;;  %v6382_v2 = vld [vmem:[%s5850_s9 + $0x140] sm:$0xff]  ;;  %v6425_v43 = vld [vmem:[%s5850_s9 + $0x3d8] sm:$0xff] }
  0xee   : > { %v4928_v8 = vpop.eup %4927  ;;  %4229 = vmatpush1.bf16.msra.mxu0 %v4228_v38  ;;  %4947 = vpow2.f32 %v1426_v21  ;;  %v6365_v15 = vmul.f32 1.442695, %v1086_v9  ;;  %v775_v60 = vmax.f32 %v6332_v7, %v6335_v57  ;;  %8227 = vst [vmem:[#allocation14_spill] sm:$0xff] %v6373_v62  ;;  %v6375_v24 = vmul.f32 1.442695, %v1090_v23  ;;  %v6393_v37 = vld [vmem:[%s5850_s9 + $0x248] sm:$0xff] }
  0xef   : > { %v4930_v29 = vpop.eup %4929  ;;  %4231 = vmatprep.subr.bf16.mxu0 %v4230_v47  ;;  %v4294_v34 = vpack.c.bf16 %v4928_v8, %v4926_v58  ;;  %4949 = vpow2.f32 %v1288_v35  ;;  %v650_v3 = vmax.f32 %v649_v12, %v6327_v55  ;;  %v632_v21 = vmax.f32 %v6350_v39, %v6357_v51  ;;  %8228 = vst [vmem:[#allocation15_spill] sm:$0xff] %v6393_v37  ;;  %v6400_v22 = vld [vmem:[%s5850_s9 + $0x160] sm:$0xff]  ;;  %v6411_v1 = vld [vmem:[%s5850_s9 + $0x268] sm:$0xff] }
  0xf0   : > { %v4932_v50 = vpop.eup %4931  ;;  %4951 = vpow2.f32 %v1296_v61  ;;  %v776_v11 = vmax.f32 %v775_v60, %v6347_v59  ;;  %v762_v35 = vmax.f32 %v6360_v49, %v6363_v0  ;;  %v697_v63 = vmax.f32 %v6370_v4, %v6373_v62  ;;  %8229 = vst [vmem:[#allocation13_spill] sm:$0xff] %v6411_v1  ;;  %v6417_v58 = vld [vmem:[%s5850_s9 + $0x180] sm:$0xff] }
  0xf1   : > { %v4934_v45 = vpop.eup %4933  ;;  %v4292_v18 = vpack.c.bf16 %v4932_v50, %v4930_v29  ;;  %4953 = vpow2.f32 %v1416_v41  ;;  %v651_v61 = vmax.f32 %v650_v3, %v6344_v13  ;;  %v6397_v41 = vld [vmem:[%s5850_s9 + $0x398] sm:$0xff]  ;;  %v633_v52 = vmax.f32 %v632_v21, %v6382_v2  ;;  %v6438_v60 = vld [vmem:[%s5850_s9 + $0x1a0] sm:$0xff] }
  0xf2   : > { %v4936_v33 = vpop.eup %4935  ;;  %4955 = vpow2.f32 %v1424_v53  ;;  %v6403_v53 = vld [vmem:[%s5850_s9 + $0x370] sm:$0xff]  ;;  %v777_v42 = vmax.f32 %v776_v11, %v6379_v46  ;;  %v763_v26 = vmax.f32 %v762_v35, %v6385_v25  ;;  %v698_v47 = vmax.f32 %v697_v63, %v6393_v37  ;;  %v6451_v35 = vld [vmem:[%s5850_s9 + $0x2a8] sm:$0xff] }
  0xf3   : > { %v4938_v5 = vpop.eup %4937  ;;  %4293 = vmatpush1.bf16.msra.mxu1 %v4292_v18  ;;  %v4232_v16 = vpack.c.bf16 %v4936_v33, %v4934_v45  ;;  %4957 = vpow2.f32 %v1306_v32  ;;  %v652_v38 = vrot.slane %v651_v61, 4  ;;  %v6414_v32 = vld [vmem:[%s5850_s9 + $0x3b8] sm:$0xff]  ;;  %v634_v9 = vmax.f32 %v633_v52, %v6400_v22  ;;  %v6441_v45 = vld [vmem:[%s5850_s9 + $0x1c0] sm:$0xff]  ;;  %v6444_v18 = vld [vmem:[%s5850_s9 + $0x3b0] sm:$0xff]  ;;  %8231 = vst [vmem:[#allocation19_spill] sm:$0xff] %v6451_v35 }
  0xf4   : > { %v4940_v48 = vpop.eup %4939  ;;  %4295 = vmatprep.subr.bf16.mxu1 %v4294_v34  ;;  %4959 = vpow2.f32 %v1314_v40  ;;  %v6420_v40 = vld [vmem:[%s5850_s9 + $0x390] sm:$0xff]  ;;  %v764_v29 = vmax.f32 %v763_v26, %v6403_v53  ;;  %v6431_v34 = vld [vmem:[%s5850_s9 + $0x288] sm:$0xff]  ;;  %v699_v3 = vmax.f32 %v698_v47, %v6411_v1  ;;  %v6465_v52 = vld [vmem:[%s5850_s9 + $0x200] sm:$0xff] }
  0xf5   : > { %v4942_v31 = vpop.eup %4941  ;;  %4233 = vmatpush1.bf16.msra.mxu0 %v4232_v16  ;;  %v4296_v6 = vpack.c.bf16 %v4940_v48, %v4938_v5  ;;  %4961 = vpow2.f32 %v1434_v54  ;;  %v778_v54 = vmax.f32 %v777_v42, %v6397_v41  ;;  %8230 = vst [vmem:[#allocation16_spill] sm:$0xff] %v6431_v34  ;;  %v653_v50 = vmax.f32 %v651_v61, %v652_v38  ;;  %v6454_v5 = vld [vmem:[%s5850_s9 + $0x418] sm:$0xff]  ;;  %v6461_v48 = vld [vmem:[%s5850_s9 + $0x3d0] sm:$0xff]  ;;  %v6468_v26 = vld [vmem:[%s5850_s9 + $0x220] sm:$0xff] }
  0xf6   : > { %v4944_v8 = vpop.eup %4943  ;;  %4963 = vpow2.f32 %v6329_v44  ;;  %v6435_v44 = vld [vmem:[%s5850_s9 + $0x3f8] sm:$0xff]  ;;  %v765_v21 = vmax.f32 %v764_v29, %v6420_v40  ;;  %8232 = vst [vmem:[#allocation20_spill] sm:$0xff] %v6454_v5  ;;  %v700_v42 = vmax.f32 %v699_v3, %v6431_v34  ;;  %8234 = vst [vmem:[#allocation22_spill] sm:$0xff] %v6465_v52  ;;  %v6475_v47 = vld [vmem:[%s5850_s9 + $0x2c8] sm:$0xff] }
  0xf7   : > { %v4946_v23 = vpop.eup %4945  ;;  %4297 = vmatpush1.bf16.msra.mxu1 %v4296_v6  ;;  %v4234_v12 = vpack.c.bf16 %v4944_v8, %v4942_v31  ;;  %4965 = vpow2.f32 %v6339_v56  ;;  %v779_v11 = vmax.f32 %v778_v54, %v6414_v32  ;;  %v635_v56 = vmax.f32 %v634_v9, %v6417_v58  ;;  %v6457_v16 = vld [vmem:[%s5850_s9 + $0x438] sm:$0xff]  ;;  %8235 = vst [vmem:[#allocation17_spill] sm:$0xff] %v6468_v26 }
  0xf8   : > { %v4948_v33 = vpop.eup %4947  ;;  %4967 = vpow2.f32 %v1312_v20  ;;  %8233 = vst [vmem:[#allocation18_spill] sm:$0xff] %v6457_v16  ;;  %v654_v20 = vrot.slane %v653_v50, 2  ;;  %8236 = vst [vmem:[#allocation25_spill] sm:$0xff] %v6475_v47  ;;  %v6478_v8 = vld [vmem:[%s5850_s9 + $0x458] sm:$0xff]  ;;  %v827_v3 = vmax.f32 %v6454_v5, %v6457_v16 }
  0xf9   : > { %v4950_v61 = vpop.eup %4949  ;;  %4235 = vmatprep.subr.bf16.mxu0 %v4234_v12  ;;  %v4298_v63 = vpack.c.bf16 %v4948_v33, %v4946_v23  ;;  %4969 = vpow2.f32 %v6365_v15  ;;  %v780_v6 = vmax.f32 %v779_v11, %v6425_v43  ;;  %v636_v38 = vmax.f32 %v635_v56, %v6438_v60  ;;  %8237 = vst [vmem:[#allocation26_spill] sm:$0xff] %v6478_v8  ;;  %v6481_v23 = vld [vmem:[%s5850_s9 + $0x1e0] sm:$0xff]  ;;  %v6484_v12 = vld [vmem:[%s5850_s9 + $0x3f0] sm:$0xff] }
  0xfa   : > { %v4952_v31 = vpop.eup %4951  ;;  %4971 = vpow2.f32 %v6375_v24  ;;  %v766_v15 = vmax.f32 %v765_v21, %v6444_v18  ;;  %v655_v29 = vmax.f32 %v653_v50, %v654_v20  ;;  %v701_v24 = vmax.f32 %v700_v42, %v6451_v35  ;;  %v6490_v33 = vld [vmem:[%s5850_s9 + $0x240] sm:$0xff]  ;;  %v6496_v50 = vld [vmem:[%s5850_s9 + $0x2e8] sm:$0xff] }
  0xfb   : > { %v4954_v54 = vpop.eup %4953  ;;  %4299 = vmatprep.subr.bf16.mxu1 %v4298_v63  ;;  %v4236_v9 = vpack.c.bf16 %v4952_v31, %v4950_v61  ;;  %8238 = vst [vmem:[#allocation21_spill] sm:$0xff] %v6490_v33  ;;  %v781_v56 = vmax.f32 %v780_v6, %v6435_v44  ;;  %v637_v21 = vmax.f32 %v636_v38, %v6441_v45  ;;  %8239 = vst [vmem:[#allocation24_spill] sm:$0xff] %v6496_v50  ;;  %v6499_v63 = vld [vmem:[%s5850_s9 + $0x478] sm:$0xff]  ;;  %v6508_v6 = vld [vmem:[%s5850_s9 + $0x260] sm:$0xff] }
  0xfc   : > { %v4956_v11 = vpop.eup %4955  ;;  %v767_v61 = vmax.f32 %v766_v15, %v6461_v48  ;;  %v684_v20 = vmax.f32 %v6465_v52, %v6468_v26  ;;  %v656_v16 = vrot.slane %v655_v29, 1  ;;  %v702_v5 = vmax.f32 %v701_v24, %v6475_v47 }
  0xfd   : > { %v4958_v42 = vpop.eup %4957  ;;  %4237 = vmatpush1.bf16.msra.mxu0 %v4236_v9  ;;  %v4300_v31 = vpack.c.bf16 %v4956_v11, %v4954_v54  ;;  %v6505_v35 = vmax.f32 %v827_v3, %v6478_v8  ;;  %v782_v15 = vrot.slane %v781_v56, 4  ;;  %v638_v34 = vmax.f32 %v637_v21, %v6481_v23 }
  0xfe   : > { %v4960_v38 = vpop.eup %4959  ;;  %v768_v1 = vmax.f32 %v767_v61, %v6484_v12  ;;  %v6513_v37 = vmax.f32 %v684_v20, %v6490_v33  ;;  %v6515_v9 = vmax.f32 %v655_v29, %v656_v16  ;;  %v6518_v24 = vmax.f32 %v702_v5, %v6496_v50 }
  0xff   : > { %v4962_v26 = vpop.eup %4961  ;;  %4301 = vmatpush1.bf16.msra.mxu1 %v4300_v31  ;;  %v4238_v54 = vpack.c.bf16 %v4960_v38, %v4958_v42  ;;  %v783_v8 = vmax.f32 %v781_v56, %v782_v15  ;;  %v639_v52 = vrot.slane %v638_v34, 4 }
 0x100   : > { %v4964_v11 = vpop.eup %4963  ;;  %v769_v21 = vrot.slane %v768_v1, 4  ;;  %v1029_v16 = vsub.f32 %v6208_v28, %v6515_v9  ;;  %v1033_v5 = vsub.f32 %v6211_v30, %v6515_v9  ;;  %v1037_v29 = vsub.f32 %v6223_v10, %v6515_v9 }
 0x101   : > { %v4966_v20 = vpop.eup %4965  ;;  %4239 = vmatprep.subr.bf16.mxu0 %v4238_v54  ;;  %v4302_v33 = vpack.c.bf16 %v4964_v11, %v4962_v26  ;;  %v784_v31 = vrot.slane %v783_v8, 2  ;;  %v640_v56 = vmax.f32 %v638_v34, %v639_v52  ;;  %v1041_v15 = vsub.f32 %v6233_v36, %v6515_v9 }
 0x102   : > { %v4968_v42 = vpop.eup %4967  ;;  %v770_v38 = vmax.f32 %v768_v1, %v769_v21  ;;  %v1318_v26 = vmul.f32 1.442695, %v1029_v16  ;;  %v1326_v11 = vmul.f32 1.442695, %v1033_v5  ;;  %v1334_v3 = vmul.f32 1.442695, %v1037_v29 }
 0x103   : > { %v4970_v61 = vpop.eup %4969  ;;  %4303 = vmatprep.subr.bf16.mxu1 %v4302_v33  ;;  %v4240_v54 = vpack.c.bf16 %v4968_v42, %v4966_v20  ;;  %v785_v50 = vmax.f32 %v783_v8, %v784_v31  ;;  %v641_v47 = vrot.slane %v640_v56, 2  ;;  %v1342_v62 = vmul.f32 1.442695, %v1041_v15 }
 0x104   : > { %v4972_v28 = vpop.eup %4971  ;;  %v771_v30 = vrot.slane %v770_v38, 2  ;;  %4973 = vpow2.f32 %v1318_v26  ;;  %v1045_v1 = vsub.f32 %v6238_v14, %v6515_v9  ;;  %v1049_v36 = vsub.f32 %v6324_v19, %v6515_v9 }
 0x105   : > { %4241 = vmatpush1.bf16.msra.mxu0 %v4240_v54  ;;  %v4304_v10 = vpack.c.bf16 %v4972_v28, %v4970_v61  ;;  %4975 = vpow2.f32 %v1326_v11  ;;  %v786_v34 = vrot.slane %v785_v50, 1  ;;  %v642_v52 = vmax.f32 %v640_v56, %v641_v47 }
 0x106   : > { %v772_v33 = vmax.f32 %v770_v38, %v771_v30  ;;  %4977 = vpow2.f32 %v1334_v3  ;;  %v1350_v21 = vmul.f32 1.442695, %v1045_v1  ;;  %v1358_v8 = vmul.f32 1.442695, %v1049_v36 }
 0x107   : > { %4305 = vmatpush1.bf16.msra.mxu1 %v4304_v10  ;;  %v1053_v20 = vsub.f32 %v6327_v55, %v6515_v9  ;;  %v6540_v61 = vmax.f32 %v785_v50, %v786_v34  ;;  %v643_v14 = vrot.slane %v642_v52, 1  ;;  %4979 = vpow2.f32 %v1342_v62 }
 0x108   : > { %4155 = vmatmul.mubr.msk.f32.vlgmr.msra.gmra.mrb[2].mxu0 %vm1765_vm0, %v6287_v17  ;;  %v773_v16 = vrot.slane %v772_v33, 1  ;;  %4981 = vpow2.f32 %v1350_v21  ;;  %v1057_v19 = vsub.f32 %v6344_v13, %v6515_v9  ;;  %v704_v3 = vrot.slane %v6518_v24, 4 }
 0x109   : > { %v6544_v47 = vmul.f32 1.442695, %v1053_v20  ;;  %1975 = vmatprep.mubr.f32.mxu0 %v8225_v27  ;;  %v1095_v55 = vsub.f32 %v6332_v7, %v6540_v61  ;;  %v1099_v50 = vsub.f32 %v6335_v57, %v6540_v61  ;;  %v6552_v5 = vmax.f32 %v642_v52, %v643_v14 }
 0x10a   : > { %4159 = vmatmul.mubr.msk.f32.vlgmr.msra.gmra.mrb[2].mxu1 %vm1765_vm0, %v6287_v17  ;;  %v6556_v62 = vmax.f32 %v772_v33, %v773_v16  ;;  %v1103_v13 = vsub.f32 %v6347_v59, %v6540_v61  ;;  %v1107_v9 = vsub.f32 %v6379_v46, %v6540_v61  ;;  %4983 = vpow2.f32 %v1358_v8 }
 0x10b   : > { %v1111_v7 = vsub.f32 %v6397_v41, %v6540_v61  ;;  %2330 = vmatprep.mubr.f32.mxu1 %v8225_v27  ;;  %v1450_v57 = vmul.f32 1.442695, %v1095_v55  ;;  %v1458_v29 = vmul.f32 1.442695, %v1099_v50  ;;  %v1028_v42 = vsub.f32 %v6350_v39, %v6552_v5 }
 0x10c   : > { %v1032_v31 = vsub.f32 %v6357_v51, %v6552_v5  ;;  %v1094_v59 = vsub.f32 %v6360_v49, %v6556_v62  ;;  %v1098_v46 = vsub.f32 %v6363_v0, %v6556_v62  ;;  %v1466_v56 = vmul.f32 1.442695, %v1103_v13 }
 0x10d   : > { %v1474_v38 = vmul.f32 1.442695, %v1107_v9  ;;  %4985 = vpow2.f32 %v1450_v57  ;;  %v1316_v41 = vmul.f32 1.442695, %v1028_v42  ;;  %v1036_v54 = vsub.f32 %v6382_v2, %v6552_v5  ;;  %v6618_v42 = vld [vmem:[%s5850_s9 + $0x498] sm:$0xff] }
 0x10e   : > { %v1324_v15 = vmul.f32 1.442695, %v1032_v31  ;;  %v4974_v26 = vpop.eup %4973  ;;  %4987 = vpow2.f32 %v1458_v29  ;;  %v1448_v39 = vmul.f32 1.442695, %v1094_v59  ;;  %v1456_v11 = vmul.f32 1.442695, %v1098_v46 }
 0x10f   : > { %v1040_v51 = vsub.f32 %v6400_v22, %v6552_v5  ;;  %v4976_v28 = vpop.eup %4975  ;;  %4989 = vpow2.f32 %v1316_v41  ;;  %v1332_v49 = vmul.f32 1.442695, %v1036_v54  ;;  %v1102_v0 = vsub.f32 %v6385_v25, %v6556_v62  ;;  %v6628_v59 = vld [vmem:[%s5850_s9 + $0x4b8] sm:$0xff] }
 0x110   : > { %v1106_v30 = vsub.f32 %v6403_v53, %v6556_v62  ;;  %v6581_v10 = vpop.eup %4977  ;;  %v4242_v1 = vpack.c.bf16 %v4976_v28, %v4974_v26  ;;  %4991 = vpow2.f32 %v1324_v15  ;;  %v1115_v36 = vsub.f32 %v6414_v32, %v6540_v61  ;;  %v6654_v26 = vld [vmem:[%s5850_s9 + $0x2a0] sm:$0xff] }
 0x111   : > { %v1340_v2 = vmul.f32 1.442695, %v1040_v51  ;;  %v6585_v34 = vpop.eup %4979  ;;  %4993 = vpow2.f32 %v1448_v39  ;;  %v1464_v22 = vmul.f32 1.442695, %v1102_v0  ;;  %v1482_v33 = vmul.f32 1.442695, %v1111_v7 }
 0x112   : > { %v1472_v52 = vmul.f32 1.442695, %v1106_v30  ;;  %v6587_v21 = vpop.eup %4981  ;;  %4243 = vmatprep.subr.bf16.mxu0 %v4242_v1  ;;  %4995 = vpow2.f32 %v1456_v11  ;;  %v4246_v25 = vpack.c.bf16 %v6585_v34, %v6581_v10  ;;  %v1490_v53 = vmul.f32 1.442695, %v1115_v36  ;;  %v6665_v30 = vld [vmem:[%s5850_s9 + $0x450] sm:$0xff]  ;;  %v6668_v1 = vld [vmem:[%s5850_s9 + $0x348] sm:$0xff] }
 0x113   : > { %v1044_v8 = vsub.f32 %v6417_v58, %v6552_v5  ;;  %4997 = vpow2.f32 %v1466_v56  ;;  %v1048_v32 = vsub.f32 %v6438_v60, %v6552_v5  ;;  %v1110_v20 = vsub.f32 %v6420_v40, %v6556_v62 }
 0x114   : > { %v1114_v14 = vsub.f32 %v6444_v18, %v6556_v62  ;;  %v6599_v16 = vpop.eup %4983  ;;  %4999 = vpow2.f32 %v1474_v38  ;;  %v6601_v50 = vmul.f32 1.442695, %v1057_v19  ;;  %v1119_v58 = vsub.f32 %v6425_v43, %v6540_v61 }
 0x115   : > { %v1348_v55 = vmul.f32 1.442695, %v1044_v8  ;;  %5001 = vpow2.f32 %v1332_v49  ;;  %v4250_v60 = vpack.c.bf16 %v6599_v16, %v6587_v21  ;;  %v1356_v13 = vmul.f32 1.442695, %v1048_v32  ;;  %v8243_v16 = vld [vmem:[#allocation15_spill] sm:$0xff] }
 0x116   : > { %v1480_v9 = vmul.f32 1.442695, %v1110_v20  ;;  %5003 = vpow2.f32 %v1340_v2  ;;  %v1488_v40 = vmul.f32 1.442695, %v1114_v14  ;;  %v1123_v18 = vsub.f32 %v6435_v44, %v6540_v61  ;;  %v6683_v20 = vld [vmem:[%s5850_s9 + $0x470] sm:$0xff]  ;;  %v6686_v14 = vld [vmem:[%s5850_s9 + $0x368] sm:$0xff] }
 0x117   : > { %v6609_v19 = vmul.f32 1.442695, %v1119_v58  ;;  %v4986_v7 = vpop.eup %4985  ;;  %5005 = vpow2.f32 %v1464_v22  ;;  %v1052_v43 = vsub.f32 %v6441_v45, %v6552_v5  ;;  %v1056_v57 = vsub.f32 %v6481_v23, %v6552_v5  ;;  %v6631_v23 = vld [vmem:[%s5850_s9 + $0x280] sm:$0xff]  ;;  %v6637_v5 = vld [vmem:[%s5850_s9 + $0x430] sm:$0xff]  ;;  %v6671_v22 = vld [vmem:[%s5850_s9 + $0x4d8] sm:$0xff] }
 0x118   : > { %v1118_v29 = vsub.f32 %v6461_v48, %v6556_v62  ;;  %v4988_v31 = vpop.eup %4987  ;;  %5007 = vpow2.f32 %v1472_v52  ;;  %v6620_v44 = vmul.f32 1.442695, %v1123_v18  ;;  %v1122_v61 = vsub.f32 %v6484_v12, %v6556_v62  ;;  %v6634_v48 = vld [vmem:[%s5850_s9 + $0x410] sm:$0xff]  ;;  %v6644_v62 = vld [vmem:[%s5850_s9 + $0x308] sm:$0xff]  ;;  %v6674_v52 = vld [vmem:[%s5850_s9 + $0x2c0] sm:$0xff] }
 0x119   : > { %v705_v45 = vmax.f32 %v6518_v24, %v704_v3  ;;  %v4990_v46 = vpop.eup %4989  ;;  %v4322_v56 = vpack.c.bf16 %v4988_v31, %v4986_v7  ;;  %5009 = vpow2.f32 %v1482_v33  ;;  %v6639_v38 = vmul.f32 1.442695, %v1052_v43  ;;  %v6647_v24 = vld [vmem:[%s5850_s9 + $0x328] sm:$0xff]  ;;  %v6695_v18 = vld [vmem:[%s5850_s9 + $0x2e0] sm:$0xff] }
 0x11a   : > { %v6641_v12 = vmul.f32 1.442695, %v1056_v57  ;;  %v4992_v3 = vpop.eup %4991  ;;  %5011 = vpow2.f32 %v1490_v53  ;;  %v6649_v41 = vmul.f32 1.442695, %v1118_v29  ;;  %v6651_v15 = vmul.f32 1.442695, %v1122_v61 }
 0x11b   : > { %v706_v54 = vrot.slane %v705_v45, 2  ;;  %v4994_v39 = vpop.eup %4993  ;;  %4323 = vmatprep.subr.bf16.mxu1 %v4322_v56  ;;  %v4244_v11 = vpack.c.bf16 %v4992_v3, %v4990_v46  ;;  %5013 = vpow2.f32 %v1348_v55  ;;  %v8240_v51 = vmax.f32 %v6505_v35, %v6499_v63  ;;  %v6717_v3 = vld [vmem:[%s5850_s9 + $0x4b0] sm:$0xff] }
 0x11c   : > { %v8241_v49 = vmax.f32 %v6513_v37, %v6508_v6  ;;  %v4996_v2 = vpop.eup %4995  ;;  %5015 = vpow2.f32 %v1356_v13  ;;  %v814_v35 = vmax.f32 %v6634_v48, %v6637_v5  ;;  %v749_v37 = vmax.f32 %v6644_v62, %v6647_v24  ;;  %v6692_v13 = vld [vmem:[%s5850_s9 + $0x4f8] sm:$0xff] }
 0x11d   : > { %v830_v28 = vmax.f32 %v8240_v51, %v6618_v42  ;;  %v707_v36 = vmax.f32 %v705_v45, %v706_v54  ;;  %v4998_v33 = vpop.eup %4997  ;;  %4245 = vmatpush1.bf16.msra.mxu0 %v4244_v11  ;;  %v4324_v53 = vpack.c.bf16 %v4996_v2, %v4994_v39  ;;  %5017 = vpow2.f32 %v1480_v9  ;;  %v8242_v39 = vld [vmem:[#allocation14_spill] sm:$0xff] }
 0x11e   : > { %v687_v0 = vmax.f32 %v8241_v49, %v6631_v23  ;;  %v5000_v55 = vpop.eup %4999  ;;  %4247 = vmatprep.subr.bf16.mxu0 %v4246_v25  ;;  %5019 = vpow2.f32 %v1488_v40  ;;  %v815_v9 = vmax.f32 %v814_v35, %v6665_v30  ;;  %v6699_v7 = vmax.f32 %v749_v37, %v6668_v1  ;;  %v6705_v25 = vld [vmem:[%s5850_s9 + $0x490] sm:$0xff] }
 0x11f   : > { %v831_v8 = vmax.f32 %v830_v28, %v6628_v59  ;;  %v708_v58 = vrot.slane %v707_v36, 1  ;;  %v5002_v43 = vpop.eup %5001  ;;  %4325 = vmatpush1.bf16.msra.mxu1 %v4324_v53  ;;  %v4326_v57 = vpack.c.bf16 %v5000_v55, %v4998_v33  ;;  %5021 = vpow2.f32 %v6544_v47  ;;  %v6727_v2 = vld [vmem:[%s5850_s9 + $0x4d0] sm:$0xff] }
 0x120   : > { %v688_v32 = vmax.f32 %v687_v0, %v6654_v26  ;;  %v5004_v40 = vpop.eup %5003  ;;  %5023 = vpow2.f32 %v6601_v50  ;;  %v816_v31 = vmax.f32 %v815_v9, %v6683_v20  ;;  %v751_v61 = vmax.f32 %v6699_v7, %v6686_v14  ;;  %v8253_v7 = vld [vmem:[#allocation26_spill] sm:$0xff] }
 0x121   : > { %v832_v10 = vmax.f32 %v831_v8, %v6671_v22  ;;  %v6708_v29 = vmax.f32 %v707_v36, %v708_v58  ;;  %v5006_v45 = vpop.eup %5005  ;;  %4327 = vmatprep.subr.bf16.mxu1 %v4326_v57  ;;  %v4248_v46 = vpack.c.bf16 %v5004_v40, %v5002_v43  ;;  %5025 = vpow2.f32 %v6609_v19  ;;  %v6736_v8 = vld [vmem:[%s5850_s9 + $0x4f0] sm:$0xff] }
 0x122   : > { %v689_v34 = vmax.f32 %v688_v32, %v6674_v52  ;;  %v5008_v50 = vpop.eup %5007  ;;  %5027 = vpow2.f32 %v6620_v44  ;;  %v817_v51 = vmax.f32 %v816_v31, %v6705_v25 }
 0x123   : > { %v833_v47 = vmax.f32 %v832_v10, %v6692_v13  ;;  %v1061_v54 = vsub.f32 %v6370_v4, %v6708_v29  ;;  %v1065_v11 = vsub.f32 %v8242_v39, %v6708_v29  ;;  %v5010_v28 = vpop.eup %5009  ;;  %4249 = vmatpush1.bf16.msra.mxu0 %v4248_v46  ;;  %v4328_v19 = vpack.c.bf16 %v5008_v50, %v5006_v45  ;;  %v8246_v39 = vld [vmem:[#allocation19_spill] sm:$0xff] }
 0x124   : > { %v690_v56 = vmax.f32 %v689_v34, %v6695_v18  ;;  %5029 = vpow2.f32 %v6639_v38  ;;  %v5012_v36 = vpop.eup %5011  ;;  %4251 = vmatprep.subr.bf16.mxu0 %v4250_v60  ;;  %v818_v35 = vmax.f32 %v817_v51, %v6717_v3  ;;  %v1069_v60 = vsub.f32 %v8243_v16, %v6708_v29  ;;  %v8247_v51 = vld [vmem:[#allocation25_spill] sm:$0xff] }
 0x125   : > { %v834_v49 = vrot.slane %v833_v47, 4  ;;  %5031 = vpow2.f32 %v6641_v12  ;;  %v1382_v4 = vmul.f32 1.442695, %v1061_v54  ;;  %v1390_v44 = vmul.f32 1.442695, %v1065_v11  ;;  %v5014_v37 = vpop.eup %5013  ;;  %4329 = vmatpush1.bf16.msra.mxu1 %v4328_v19  ;;  %v8244_v12 = vld [vmem:[#allocation13_spill] sm:$0xff] }
 0x126   : > { %v691_v0 = vrot.slane %v690_v56, 4  ;;  %v4330_v33 = vpack.c.bf16 %v5012_v36, %v5010_v28  ;;  %5033 = vpow2.f32 %v6649_v41  ;;  %v5016_v32 = vpop.eup %5015  ;;  %v819_v21 = vmax.f32 %v818_v35, %v6727_v2 }
 0x127   : > { %v835_v38 = vmax.f32 %v833_v47, %v834_v49  ;;  %5035 = vpow2.f32 %v6651_v15  ;;  %v1073_v55 = vsub.f32 %v8244_v12, %v6708_v29  ;;  %v5018_v58 = vpop.eup %5017  ;;  %v4252_v9 = vpack.c.bf16 %v5016_v32, %v5014_v37  ;;  %v8245_v47 = vld [vmem:[#allocation16_spill] sm:$0xff] }
 0x128   : > { %v692_v53 = vmax.f32 %v690_v56, %v691_v0  ;;  %4331 = vmatprep.subr.bf16.mxu1 %v4330_v33  ;;  %5037 = vpow2.f32 %v1382_v4  ;;  %v5020_v57 = vpop.eup %5019  ;;  %v820_v10 = vmax.f32 %v819_v21, %v6736_v8  ;;  %v1398_v34 = vmul.f32 1.442695, %v1069_v60  ;;  %v6752_v4 = vld [vmem:[%s5850_s9 + $0x388] sm:$0xff] }
 0x129   : > { %v836_v41 = vrot.slane %v835_v38, 2  ;;  %5039 = vpow2.f32 %v1390_v44  ;;  %v1406_v15 = vmul.f32 1.442695, %v1073_v55  ;;  %v5022_v40 = vpop.eup %5021  ;;  %4253 = vmatpush1.bf16.msra.mxu0 %v4252_v9  ;;  %v4332_v31 = vpack.c.bf16 %v5020_v57, %v5018_v58  ;;  %v8249_v57 = vld [vmem:[#allocation20_spill] sm:$0xff] }
 0x12a   : > { %v693_v43 = vrot.slane %v692_v53, 2  ;;  %v1077_v56 = vsub.f32 %v8245_v47, %v6708_v29  ;;  %v5024_v50 = vpop.eup %5023  ;;  %v821_v54 = vrot.slane %v820_v10, 4  ;;  %5041 = vpow2.f32 %v1398_v34  ;;  %v8250_v34 = vld [vmem:[#allocation18_spill] sm:$0xff] }
 0x12b   : > { %v837_v45 = vmax.f32 %v835_v38, %v836_v41  ;;  %v1081_v11 = vsub.f32 %v8246_v39, %v6708_v29  ;;  %v1085_v28 = vsub.f32 %v8247_v51, %v6708_v29  ;;  %v5026_v19 = vpop.eup %5025  ;;  %4333 = vmatpush1.bf16.msra.mxu1 %v4332_v31  ;;  %v4254_v49 = vpack.c.bf16 %v5024_v50, %v5022_v40  ;;  %v8248_v38 = vld [vmem:[#allocation24_spill] sm:$0xff]  ;;  %v8251_v40 = vld [vmem:[#allocation22_spill] sm:$0xff] }
 0x12c   : > { %v694_v46 = vmax.f32 %v692_v53, %v693_v43  ;;  %5043 = vpow2.f32 %v1406_v15  ;;  %v5028_v44 = vpop.eup %5027  ;;  %v822_v35 = vmax.f32 %v820_v10, %v821_v54  ;;  %v1414_v37 = vmul.f32 1.442695, %v1077_v56 }
 0x12d   : > { %v838_v0 = vrot.slane %v837_v45, 1  ;;  %v6754_v33 = vmul.f32 1.442695, %v1081_v11  ;;  %v1089_v53 = vsub.f32 %v8248_v38, %v6708_v29  ;;  %4255 = vmatprep.subr.bf16.mxu0 %v4254_v49  ;;  %v4334_v21 = vpack.c.bf16 %v5028_v44, %v5026_v19  ;;  %v8254_v44 = vld [vmem:[#allocation21_spill] sm:$0xff] }
 0x12e   : > { %v695_v36 = vrot.slane %v694_v46, 1  ;;  %v5030_v32 = vpop.eup %5029  ;;  %v6762_v12 = vmul.f32 1.442695, %v1085_v28  ;;  %v823_v58 = vrot.slane %v822_v35, 2  ;;  %5045 = vpow2.f32 %v1414_v37 }
 0x12f   : > { %v6758_v16 = vmax.f32 %v837_v45, %v838_v0  ;;  %v5032_v55 = vpop.eup %5031  ;;  %v6764_v9 = vmul.f32 1.442695, %v1089_v53  ;;  %v6770_v41 = vmax.f32 %v751_v61, %v6752_v4  ;;  %4335 = vmatprep.subr.bf16.mxu1 %v4334_v21 }
 0x130   : > { %v6760_v60 = vmax.f32 %v694_v46, %v695_v36  ;;  %v5034_v29 = vpop.eup %5033  ;;  %v4256_v43 = vpack.c.bf16 %v5032_v55, %v5030_v32  ;;  %v8252_v46 = vld [vmem:[#allocation17_spill] sm:$0xff]  ;;  %v824_v56 = vmax.f32 %v822_v35, %v823_v58 }
 0x131   : > { %v1127_v10 = vsub.f32 %v8249_v57, %v6758_v16  ;;  %v1131_v15 = vsub.f32 %v8250_v34, %v6758_v16  ;;  %v5036_v45 = vpop.eup %5035  ;;  %v1135_v61 = vsub.f32 %v8253_v7, %v6758_v16  ;;  %v1139_v50 = vsub.f32 %v6499_v63, %v6758_v16 }
 0x132   : > { %v1060_v31 = vsub.f32 %v8251_v40, %v6760_v60  ;;  %v1064_v47 = vsub.f32 %v8252_v46, %v6760_v60  ;;  %v5038_v54 = vpop.eup %5037  ;;  %4257 = vmatpush1.bf16.msra.mxu0 %v4256_v43  ;;  %v4336_v39 = vpack.c.bf16 %v5036_v45, %v5034_v29  ;;  %v825_v0 = vrot.slane %v824_v56, 1 }
 0x133   : > { %v1514_v11 = vmul.f32 1.442695, %v1127_v10  ;;  %v1522_v51 = vmul.f32 1.442695, %v1131_v15  ;;  %v5040_v19 = vpop.eup %5039  ;;  %v1530_v36 = vmul.f32 1.442695, %v1135_v61  ;;  %v1068_v37 = vsub.f32 %v8254_v44, %v6760_v60 }
 0x134   : > { %v1380_v28 = vmul.f32 1.442695, %v1060_v31  ;;  %v1388_v49 = vmul.f32 1.442695, %v1064_v47  ;;  %4337 = vmatpush1.bf16.msra.mxu1 %v4336_v39  ;;  %v4274_v35 = vpack.c.bf16 %v5040_v19, %v5038_v54  ;;  %v1538_v38 = vmul.f32 1.442695, %v1139_v50  ;;  %v6788_v53 = vpop.eup %5041 }
 0x135   : > { %5047 = vpow2.f32 %v1514_v11  ;;  %v1072_v63 = vsub.f32 %v6508_v6, %v6760_v60  ;;  %4156 = vmatmul.mubr.msk.f32.vlgmr.msra.gmra.mrb[4].mxu0 %vm1765_vm0, %v6287_v17  ;;  %v6792_v32 = vmax.f32 %v824_v56, %v825_v0  ;;  %v1396_v21 = vmul.f32 1.442695, %v1068_v37  ;;  %v6803_v17 = vld [vmem:[#allocation4] sm:$0xff]  ;;  %v6831_v50 = vld [vmem:[%s5850_s9 + $0x3a8] sm:$0xff]  ;;  %v6841_v39 = vld [vmem:[%s5850_s9 + $0x518] sm:$0xff] }
 0x136   : > { %5049 = vpow2.f32 %v1522_v51  ;;  %v1143_v55 = vsub.f32 %v6618_v42, %v6758_v16  ;;  %v6796_v58 = vpop.eup %5043  ;;  %4275 = vmatprep.subr.bf16.mxu0 %v4274_v35  ;;  %v1147_v6 = vsub.f32 %v6628_v59, %v6758_v16  ;;  %v1076_v43 = vsub.f32 %v6631_v23, %v6760_v60  ;;  %2117 = vmatprep.mubr.f32.mxu0 %v8225_v27  ;;  %v6850_v51 = vld [vmem:[%s5850_s9 + $0x538] sm:$0xff] }
 0x137   : > { %5051 = vpow2.f32 %v1380_v28  ;;  %v1404_v29 = vmul.f32 1.442695, %v1072_v63  ;;  %4161 = vmatmul.mubr.msk.f32.vlgmr.msra.gmra.mrb[4].mxu1 %vm1765_vm0, %v6803_v17  ;;  %v1126_v42 = vsub.f32 %v6634_v48, %v6792_v32  ;;  %v1130_v57 = vsub.f32 %v6637_v5, %v6792_v32  ;;  %v6882_v63 = vld [vmem:[%s5850_s9 + $0x428] sm:$0xff] }
 0x138   : > { %5053 = vpow2.f32 %v1388_v49  ;;  %v4278_v59 = vpack.c.bf16 %v6796_v58, %v6788_v53  ;;  %v1134_v23 = vsub.f32 %v6665_v30, %v6792_v32  ;;  %v1138_v10 = vsub.f32 %v6683_v20, %v6792_v32  ;;  %2472 = vmatprep.mubr.f32.mxu1 %v8225_v27  ;;  %v6818_v15 = vpop.eup %5045  ;;  %8255 = vst [vmem:[#allocation27_spill] sm:$0xff] %v6882_v63  ;;  %v6945_v58 = vld [vmem:[%s5850_s9 + $0x590] sm:$0xff] }
 0x139   : > { %5055 = vpow2.f32 %v1530_v36  ;;  %v1546_v34 = vmul.f32 1.442695, %v1143_v55  ;;  %v1512_v40 = vmul.f32 1.442695, %v1126_v42  ;;  %v1520_v48 = vmul.f32 1.442695, %v1130_v57 }
 0x13a   : > { %5057 = vpow2.f32 %v1538_v38  ;;  %v1554_v5 = vmul.f32 1.442695, %v1147_v6  ;;  %v1528_v31 = vmul.f32 1.442695, %v1134_v23  ;;  %v1536_v45 = vmul.f32 1.442695, %v1138_v10 }
 0x13b   : > { %5059 = vpow2.f32 %v1396_v21  ;;  %v1080_v30 = vsub.f32 %v6654_v26, %v6760_v60  ;;  %v1412_v20 = vmul.f32 1.442695, %v1076_v43  ;;  %v1142_v46 = vsub.f32 %v6705_v25, %v6792_v32  ;;  %v6862_v36 = vld [vmem:[%s5850_s9 + $0x300] sm:$0xff]  ;;  %v6876_v38 = vld [vmem:[%s5850_s9 + $0x530] sm:$0xff]  ;;  %v6898_v57 = vld [vmem:[%s5850_s9 + $0x578] sm:$0xff] }
 0x13c   : > { %5061 = vpow2.f32 %v1512_v40  ;;  %v1146_v47 = vsub.f32 %v6717_v3, %v6792_v32  ;;  %v1151_v7 = vsub.f32 %v6671_v22, %v6758_v16  ;;  %v1155_v61 = vsub.f32 %v6692_v13, %v6758_v16  ;;  %v6838_v3 = vld [vmem:[%s5850_s9 + $0x3c8] sm:$0xff]  ;;  %v6903_v10 = vld [vmem:[%s5850_s9 + $0x550] sm:$0xff] }
 0x13d   : > { %5063 = vpow2.f32 %v1520_v48  ;;  %v1420_v56 = vmul.f32 1.442695, %v1080_v30  ;;  %v1544_v26 = vmul.f32 1.442695, %v1142_v46  ;;  %v1084_v25 = vsub.f32 %v6674_v52, %v6760_v60  ;;  %v6853_v52 = vld [vmem:[%s5850_s9 + $0x558] sm:$0xff] }
 0x13e   : > { %5065 = vpow2.f32 %v1404_v29  ;;  %v6833_v54 = vmul.f32 1.442695, %v1146_v47  ;;  %v6843_v11 = vmul.f32 1.442695, %v1151_v7  ;;  %v6845_v13 = vmul.f32 1.442695, %v1155_v61 }
 0x13f   : > { %v5048_v22 = vpop.eup %5047  ;;  %5067 = vpow2.f32 %v1528_v31  ;;  %v1088_v16 = vsub.f32 %v6695_v18, %v6760_v60  ;;  %v6855_v19 = vmul.f32 1.442695, %v1084_v25  ;;  %v1150_v49 = vsub.f32 %v6727_v2, %v6792_v32  ;;  %v6865_v18 = vld [vmem:[%s5850_s9 + $0x320] sm:$0xff]  ;;  %v6868_v60 = vld [vmem:[%s5850_s9 + $0x510] sm:$0xff]  ;;  %v6917_v30 = vld [vmem:[%s5850_s9 + $0x618] sm:$0xff] }
 0x140   : > { %v5050_v28 = vpop.eup %5049  ;;  %5069 = vpow2.f32 %v1536_v45  ;;  %v1154_v0 = vsub.f32 %v6736_v8, %v6792_v32  ;;  %v753_v2 = vmax.f32 %v6770_v41, %v6831_v50  ;;  %v6879_v8 = vld [vmem:[%s5850_s9 + $0x408] sm:$0xff]  ;;  %v879_v41 = vmax.f32 %v6841_v39, %v6850_v51  ;;  %v6894_v29 = vld [vmem:[%s5850_s9 + $0x340] sm:$0xff]  ;;  %8257 = vst [vmem:[#allocation23_spill] sm:$0xff] %v6917_v30  ;;  %v6920_v46 = vld [vmem:[%s5850_s9 + $0x638] sm:$0xff] }
 0x141   : > { %v5052_v44 = vpop.eup %5051  ;;  %v4354_v37 = vpack.c.bf16 %v5050_v28, %v5048_v22  ;;  %5071 = vpow2.f32 %v6754_v33  ;;  %v6871_v35 = vmul.f32 1.442695, %v1088_v16  ;;  %v6884_v21 = vmul.f32 1.442695, %v1150_v49  ;;  %v6889_v33 = vld [vmem:[%s5850_s9 + $0x3e8] sm:$0xff]  ;;  %v6910_v31 = vld [vmem:[%s5850_s9 + $0x360] sm:$0xff] }
 0x142   : > { %v5054_v32 = vpop.eup %5053  ;;  %5073 = vpow2.f32 %v1546_v34  ;;  %v6886_v55 = vmul.f32 1.442695, %v1154_v0  ;;  %v754_v42 = vmax.f32 %v753_v2, %v6838_v3  ;;  %v736_v23 = vmax.f32 %v6862_v36, %v6865_v18  ;;  %v6906_v34 = vld [vmem:[%s5850_s9 + $0x448] sm:$0xff]  ;;  %8258 = vst [vmem:[#allocation14_spill] sm:$0xff] %v6920_v46  ;;  %v6924_v61 = vld [vmem:[%s5850_s9 + $0x598] sm:$0xff]  ;;  %v6928_v22 = vld [vmem:[%s5850_s9 + $0x570] sm:$0xff] }
 0x143   : > { %v5056_v6 = vpop.eup %5055  ;;  %4355 = vmatprep.subr.bf16.mxu1 %v4354_v37  ;;  %v4276_v43 = vpack.c.bf16 %v5054_v32, %v5052_v44  ;;  %5075 = vpow2.f32 %v1554_v5  ;;  %8256 = vst [vmem:[#allocation28_spill] sm:$0xff] %v6906_v34  ;;  %v880_v48 = vmax.f32 %v879_v41, %v6853_v52  ;;  %v866_v5 = vmax.f32 %v6868_v60, %v6876_v38  ;;  %v6941_v2 = vld [vmem:[%s5850_s9 + $0x5b8] sm:$0xff] }
 0x144   : > { %v5058_v40 = vpop.eup %5057  ;;  %5077 = vpow2.f32 %v1412_v20  ;;  %v801_v45 = vmax.f32 %v6879_v8, %v6882_v63  ;;  %v755_v20 = vmax.f32 %v754_v42, %v6889_v33  ;;  %v737_v25 = vmax.f32 %v736_v23, %v6894_v29 }
 0x145   : > { %v5060_v47 = vpop.eup %5059  ;;  %4277 = vmatpush1.bf16.msra.mxu0 %v4276_v43  ;;  %v4358_v7 = vpack.c.bf16 %v5058_v40, %v5056_v6  ;;  %5079 = vpow2.f32 %v1420_v56  ;;  %v881_v28 = vmax.f32 %v880_v48, %v6898_v57  ;;  %v6935_v56 = vld [vmem:[%s5850_s9 + $0x380] sm:$0xff]  ;;  %v867_v49 = vmax.f32 %v866_v5, %v6903_v10  ;;  %v6960_v48 = vld [vmem:[%s5850_s9 + $0x5d8] sm:$0xff] }
 0x146   : > { %v5062_v16 = vpop.eup %5061  ;;  %4279 = vmatprep.subr.bf16.mxu0 %v4278_v59  ;;  %5081 = vpow2.f32 %v1544_v26  ;;  %v802_v0 = vmax.f32 %v801_v45, %v6906_v34  ;;  %v756_v37 = vrot.slane %v755_v20, 4  ;;  %v738_v53 = vmax.f32 %v737_v25, %v6910_v31  ;;  %v6948_v59 = vld [vmem:[%s5850_s9 + $0x468] sm:$0xff]  ;;  %v6955_v6 = vld [vmem:[%s5850_s9 + $0x3a0] sm:$0xff]  ;;  %v6964_v45 = vld [vmem:[%s5850_s9 + $0x5b0] sm:$0xff] }
 0x147   : > { %v5064_v44 = vpop.eup %5063  ;;  %5083 = vpow2.f32 %v6833_v54  ;;  %8259 = vst [vmem:[#allocation15_spill] sm:$0xff] %v6948_v59  ;;  %v931_v26 = vmax.f32 %v6917_v30, %v6920_v46  ;;  %v882_v54 = vmax.f32 %v881_v28, %v6924_v61  ;;  %v868_v43 = vmax.f32 %v867_v49, %v6928_v22 }
 0x148   : > { %v5066_v32 = vpop.eup %5065  ;;  %v4356_v41 = vpack.c.bf16 %v5064_v44, %v5062_v16  ;;  %5085 = vpow2.f32 %v6762_v12  ;;  %v757_v40 = vmax.f32 %v755_v20, %v756_v37  ;;  %v739_v5 = vmax.f32 %v738_v53, %v6935_v56  ;;  %v6969_v16 = vld [vmem:[%s5850_s9 + $0x3c0] sm:$0xff]  ;;  %v6978_v44 = vld [vmem:[%s5850_s9 + $0x5f8] sm:$0xff]  ;;  %v6982_v53 = vld [vmem:[%s5850_s9 + $0x5d0] sm:$0xff] }
 0x149   : > { %v5068_v42 = vpop.eup %5067  ;;  %v4280_v23 = vpack.c.bf16 %v5066_v32, %v5060_v47  ;;  %5087 = vpow2.f32 %v6764_v9  ;;  %v883_v25 = vmax.f32 %v882_v54, %v6941_v2  ;;  %v869_v47 = vmax.f32 %v868_v43, %v6945_v58  ;;  %v6973_v9 = vld [vmem:[%s5850_s9 + $0x488] sm:$0xff] }
 0x14a   : > { %v5070_v12 = vpop.eup %5069  ;;  %4357 = vmatpush1.bf16.msra.mxu1 %v4356_v41  ;;  %5089 = vpow2.f32 %v6843_v11  ;;  %8260 = vst [vmem:[#allocation13_spill] sm:$0xff] %v6973_v9  ;;  %v803_v20 = vmax.f32 %v802_v0, %v6948_v59  ;;  %v758_v11 = vrot.slane %v757_v40, 2  ;;  %v740_v37 = vmax.f32 %v739_v5, %v6955_v6  ;;  %v6988_v0 = vld [vmem:[%s5850_s9 + $0x3e0] sm:$0xff]  ;;  %v6992_v54 = vld [vmem:[%s5850_s9 + $0x4a8] sm:$0xff]  ;;  %v7001_v5 = vld [vmem:[%s5850_s9 + $0x658] sm:$0xff] }
 0x14b   : > { %v5072_v28 = vpop.eup %5071  ;;  %4359 = vmatprep.subr.bf16.mxu1 %v4358_v7  ;;  %4281 = vmatpush1.bf16.msra.mxu0 %v4280_v23  ;;  %v4360_v49 = vpack.c.bf16 %v5070_v12, %v5068_v42  ;;  %5091 = vpow2.f32 %v6845_v13  ;;  %v884_v7 = vmax.f32 %v883_v25, %v6960_v48  ;;  %v870_v13 = vmax.f32 %v869_v47, %v6964_v45 }
 0x14c   : > { %v5074_v32 = vpop.eup %5073  ;;  %v4282_v41 = vpack.c.bf16 %v5072_v28, %v6818_v15  ;;  %5093 = vpow2.f32 %v6855_v19  ;;  %8261 = vst [vmem:[#allocation16_spill] sm:$0xff] %v6992_v54  ;;  %v759_v42 = vmax.f32 %v757_v40, %v758_v11  ;;  %v741_v23 = vmax.f32 %v740_v37, %v6969_v16  ;;  %v6997_v15 = vld [vmem:[%s5850_s9 + $0x5f0] sm:$0xff]  ;;  %8262 = vst [vmem:[#allocation19_spill] sm:$0xff] %v7001_v5  ;;  %v7007_v40 = vld [vmem:[%s5850_s9 + $0x4c8] sm:$0xff] }
 0x14d   : > { %v5076_v43 = vpop.eup %5075  ;;  %5095 = vpow2.f32 %v6871_v35  ;;  %v804_v19 = vmax.f32 %v803_v20, %v6973_v9  ;;  %v885_v47 = vmax.f32 %v884_v7, %v6978_v44  ;;  %v871_v35 = vmax.f32 %v870_v13, %v6982_v53  ;;  %8263 = vst [vmem:[#allocation25_spill] sm:$0xff] %v7007_v40  ;;  %v7010_v28 = vld [vmem:[%s5850_s9 + $0x400] sm:$0xff] }
 0x14e   : > { %v5078_v12 = vpop.eup %5077  ;;  %4361 = vmatpush1.bf16.msra.mxu1 %v4360_v49  ;;  %4283 = vmatprep.subr.bf16.mxu0 %v4282_v41  ;;  %v4362_v25 = vpack.c.bf16 %v5076_v43, %v5074_v32  ;;  %5097 = vpow2.f32 %v6884_v21  ;;  %v7013_v11 = vld [vmem:[%s5850_s9 + $0x420] sm:$0xff]  ;;  %v760_v37 = vrot.slane %v759_v42, 1  ;;  %v742_v49 = vmax.f32 %v741_v23, %v6988_v0  ;;  %v7019_v41 = vld [vmem:[%s5850_s9 + $0x678] sm:$0xff] }
 0x14f   : > { %v5080_v20 = vpop.eup %5079  ;;  %5099 = vpow2.f32 %v6886_v55  ;;  %v805_v32 = vmax.f32 %v804_v19, %v6992_v54  ;;  %v886_v13 = vrot.slane %v885_v47, 4  ;;  %v872_v43 = vmax.f32 %v871_v35, %v6997_v15 }
 0x150   : > { %v5082_v21 = vpop.eup %5081  ;;  %4363 = vmatprep.subr.bf16.mxu1 %v4362_v25  ;;  %v4284_v7 = vpack.c.bf16 %v5080_v20, %v5078_v12  ;;  %v7026_v9 = vmax.f32 %v931_v26, %v7001_v5  ;;  %v7028_v59 = vmax.f32 %v759_v42, %v760_v37  ;;  %v743_v23 = vrot.slane %v742_v49, 4 }
 0x151   : > { %v5084_v55 = vpop.eup %5083  ;;  %v7031_v19 = vmax.f32 %v805_v32, %v7007_v40  ;;  %v887_v35 = vmax.f32 %v885_v47, %v886_v13  ;;  %v873_v54 = vrot.slane %v872_v43, 4 }
 0x152   : > { %v5086_v12 = vpop.eup %5085  ;;  %4285 = vmatpush1.bf16.msra.mxu0 %v4284_v7  ;;  %v4364_v20 = vpack.c.bf16 %v5084_v55, %v5082_v21  ;;  %v1093_v42 = vsub.f32 %v6644_v62, %v7028_v59  ;;  %v1097_v37 = vsub.f32 %v6647_v24, %v7028_v59  ;;  %v744_v32 = vmax.f32 %v742_v49, %v743_v23 }
 0x153   : > { %v5088_v26 = vpop.eup %5087  ;;  %v1101_v5 = vsub.f32 %v6668_v1, %v7028_v59  ;;  %v888_v21 = vrot.slane %v887_v35, 2  ;;  %v874_v47 = vmax.f32 %v872_v43, %v873_v54  ;;  %v1105_v13 = vsub.f32 %v6686_v14, %v7028_v59 }
 0x154   : > { %v5090_v25 = vpop.eup %5089  ;;  %4365 = vmatpush1.bf16.msra.mxu1 %v4364_v20  ;;  %v4286_v7 = vpack.c.bf16 %v5088_v26, %v5086_v12  ;;  %v1446_v46 = vmul.f32 1.442695, %v1093_v42  ;;  %v1454_v30 = vmul.f32 1.442695, %v1097_v37  ;;  %v745_v40 = vrot.slane %v744_v32, 2 }
 0x155   : > { %v5092_v55 = vpop.eup %5091  ;;  %v1109_v62 = vsub.f32 %v6752_v4, %v7028_v59  ;;  %v889_v23 = vmax.f32 %v887_v35, %v888_v21  ;;  %v875_v1 = vrot.slane %v874_v47, 2  ;;  %v1462_v34 = vmul.f32 1.442695, %v1101_v5 }
 0x156   : > { %v5094_v24 = vpop.eup %5093  ;;  %4287 = vmatprep.subr.bf16.mxu0 %v4286_v7  ;;  %v4366_v49 = vpack.c.bf16 %v5092_v55, %v5090_v25  ;;  %5101 = vpow2.f32 %v1446_v46  ;;  %v746_v12 = vmax.f32 %v744_v32, %v745_v40  ;;  %v1470_v54 = vmul.f32 1.442695, %v1105_v13 }
 0x157   : > { %v5096_v20 = vpop.eup %5095  ;;  %v1113_v14 = vsub.f32 %v6831_v50, %v7028_v59  ;;  %5103 = vpow2.f32 %v1454_v30  ;;  %v890_v42 = vrot.slane %v889_v23, 1  ;;  %v876_v37 = vmax.f32 %v874_v47, %v875_v1 }
 0x158   : > { %v5098_v43 = vpop.eup %5097  ;;  %4367 = vmatprep.subr.bf16.mxu1 %v4366_v49  ;;  %v4288_v26 = vpack.c.bf16 %v5096_v20, %v5094_v24  ;;  %v747_v63 = vrot.slane %v746_v12, 1  ;;  %5105 = vpow2.f32 %v1462_v34  ;;  %v1478_v25 = vmul.f32 1.442695, %v1109_v62 }
 0x159   : > { %v5100_v4 = vpop.eup %5099  ;;  %v7049_v35 = vmul.f32 1.442695, %v1113_v14  ;;  %v7051_v46 = vmax.f32 %v889_v23, %v890_v42  ;;  %v877_v40 = vrot.slane %v876_v37, 1  ;;  %5107 = vpow2.f32 %v1470_v54 }
 0x15a   : > { %4289 = vmatpush1.bf16.msra.mxu0 %v4288_v26  ;;  %v4368_v5 = vpack.c.bf16 %v5100_v4, %v5098_v43  ;;  %v7053_v32 = vmax.f32 %v746_v12, %v747_v63  ;;  %5109 = vpow2.f32 %v1478_v25  ;;  %v1117_v50 = vsub.f32 %v6838_v3, %v7028_v59 }
 0x15b   : > { %v1121_v30 = vsub.f32 %v6889_v33, %v7028_v59  ;;  %v1159_v34 = vsub.f32 %v6841_v39, %v7051_v46  ;;  %v1163_v7 = vsub.f32 %v6850_v51, %v7051_v46  ;;  %v7063_v21 = vmax.f32 %v876_v37, %v877_v40 }
 0x15c   : > { %4369 = vmatpush1.bf16.msra.mxu1 %v4368_v5  ;;  %v1167_v63 = vsub.f32 %v6853_v52, %v7051_v46  ;;  %v1092_v3 = vsub.f32 %v6862_v36, %v7053_v32  ;;  %v1096_v33 = vsub.f32 %v6865_v18, %v7053_v32  ;;  %v1171_v39 = vsub.f32 %v6898_v57, %v7051_v46 }
 0x15d   : > { %4158 = vmatmul.mubr.msk.f32.vlgmr.msra.gmra.mrb[6].mxu0 %vm1765_vm0, %v6803_v17  ;;  %v1100_v51 = vsub.f32 %v6894_v29, %v7053_v32  ;;  %v1578_v59 = vmul.f32 1.442695, %v1159_v34  ;;  %v1586_v47 = vmul.f32 1.442695, %v1163_v7  ;;  %v1158_v52 = vsub.f32 %v6868_v60, %v7063_v21 }
 0x15e   : > { %v1162_v13 = vsub.f32 %v6876_v38, %v7063_v21  ;;  %2259 = vmatprep.mubr.f32.mxu0 %v8225_v27  ;;  %v1444_v36 = vmul.f32 1.442695, %v1092_v3  ;;  %v1452_v18 = vmul.f32 1.442695, %v1096_v33  ;;  %v1594_v55 = vmul.f32 1.442695, %v1167_v63 }
 0x15f   : > { %4163 = vmatmul.mubr.msk.f32.vlgmr.msra.gmra.mrb[6].mxu1 %vm1765_vm0, %v6803_v17  ;;  %v1104_v57 = vsub.f32 %v6910_v31, %v7053_v32  ;;  %5111 = vpow2.f32 %v1578_v59  ;;  %v1576_v29 = vmul.f32 1.442695, %v1158_v52  ;;  %v1602_v24 = vmul.f32 1.442695, %v1171_v39  ;;  %v7131_v33 = vld [vmem:[%s5850_s9 + $0x698] sm:$0xff]  ;;  %v7140_v59 = vld [vmem:[%s5850_s9 + $0x440] sm:$0xff] }
 0x160   : > { %v1584_v62 = vmul.f32 1.442695, %v1162_v13  ;;  %2614 = vmatprep.mubr.f32.mxu1 %v8225_v27  ;;  %v5102_v60 = vpop.eup %5101  ;;  %5113 = vpow2.f32 %v1586_v47  ;;  %v1460_v38 = vmul.f32 1.442695, %v1100_v51  ;;  %v1166_v23 = vsub.f32 %v6903_v10, %v7063_v21 }
 0x161   : > { %v1468_v49 = vmul.f32 1.442695, %v1104_v57  ;;  %v5104_v1 = vpop.eup %5103  ;;  %5115 = vpow2.f32 %v1444_v36  ;;  %v1170_v20 = vsub.f32 %v6928_v22, %v7063_v21  ;;  %v1175_v31 = vsub.f32 %v6924_v61, %v7051_v46  ;;  %v7166_v57 = vld [vmem:[%s5850_s9 + $0x6b8] sm:$0xff] }
 0x162   : > { %v1179_v12 = vsub.f32 %v6941_v2, %v7051_v46  ;;  %v7095_v54 = vpop.eup %5105  ;;  %v4306_v14 = vpack.c.bf16 %v5104_v1, %v5102_v60  ;;  %5117 = vpow2.f32 %v1452_v18  ;;  %v1592_v43 = vmul.f32 1.442695, %v1166_v23  ;;  %v7183_v23 = vld [vmem:[%s5850_s9 + $0x548] sm:$0xff] }
 0x163   : > { %v1108_v26 = vsub.f32 %v6935_v56, %v7053_v32  ;;  %v7099_v10 = vpop.eup %5107  ;;  %5119 = vpow2.f32 %v1576_v29  ;;  %v1600_v42 = vmul.f32 1.442695, %v1170_v20  ;;  %v1610_v37 = vmul.f32 1.442695, %v1175_v31  ;;  %v7169_v29 = vld [vmem:[%s5850_s9 + $0x460] sm:$0xff]  ;;  %v7186_v31 = vld [vmem:[%s5850_s9 + $0x6d8] sm:$0xff] }
 0x164   : > { %v1618_v22 = vmul.f32 1.442695, %v1179_v12  ;;  %v7101_v4 = vpop.eup %5109  ;;  %4307 = vmatprep.subr.bf16.mxu0 %v4306_v14  ;;  %5121 = vpow2.f32 %v1584_v62  ;;  %v4310_v61 = vpack.c.bf16 %v7099_v10, %v7095_v54  ;;  %v1112_v2 = vsub.f32 %v6955_v6, %v7053_v32 }
 0x165   : > { %v1476_v25 = vmul.f32 1.442695, %v1108_v26  ;;  %5123 = vpow2.f32 %v1594_v55  ;;  %v1174_v56 = vsub.f32 %v6945_v58, %v7063_v21  ;;  %v1178_v5 = vsub.f32 %v6964_v45, %v7063_v21  ;;  %v7122_v45 = vld [vmem:[%s5850_s9 + $0x4e8] sm:$0xff] }
 0x166   : > { %v7111_v40 = vmul.f32 1.442695, %v1117_v50  ;;  %5125 = vpow2.f32 %v1602_v24  ;;  %v1484_v34 = vmul.f32 1.442695, %v1112_v2  ;;  %v7113_v7 = vmul.f32 1.442695, %v1121_v30 }
 0x167   : > { %v1183_v63 = vsub.f32 %v6960_v48, %v7051_v46  ;;  %5127 = vpow2.f32 %v1460_v38  ;;  %v1608_v6 = vmul.f32 1.442695, %v1174_v56  ;;  %v7117_v3 = vmul.f32 1.442695, %v1178_v5  ;;  %v7201_v2 = vld [vmem:[%s5850_s9 + $0x568] sm:$0xff] }
 0x168   : > { %v1187_v58 = vsub.f32 %v6978_v44, %v7051_v46  ;;  %5129 = vpow2.f32 %v1468_v49  ;;  %v1116_v30 = vsub.f32 %v6969_v16, %v7053_v32  ;;  %v1120_v48 = vsub.f32 %v6988_v0, %v7053_v32  ;;  %v7143_v16 = vld [vmem:[%s5850_s9 + $0x610] sm:$0xff] }
 0x169   : > { %v7124_v50 = vmul.f32 1.442695, %v1183_v63  ;;  %v5112_v39 = vpop.eup %5111  ;;  %5131 = vpow2.f32 %v1592_v43  ;;  %v1182_v44 = vsub.f32 %v6982_v53, %v7063_v21  ;;  %v1186_v46 = vsub.f32 %v6997_v15, %v7063_v21  ;;  %v7146_v0 = vld [vmem:[%s5850_s9 + $0x630] sm:$0xff]  ;;  %v7155_v15 = vld [vmem:[%s5850_s9 + $0x508] sm:$0xff]  ;;  %v7204_v63 = vld [vmem:[%s5850_s9 + $0x6f8] sm:$0xff] }
 0x16a   : > { %v7133_v51 = vmul.f32 1.442695, %v1187_v58  ;;  %v5114_v32 = vpop.eup %5113  ;;  %5133 = vpow2.f32 %v1600_v42  ;;  %v7148_v47 = vmul.f32 1.442695, %v1116_v30  ;;  %v7150_v52 = vmul.f32 1.442695, %v1120_v48 }
 0x16b   : > { %v807_v53 = vmax.f32 %v7031_v19, %v7122_v45  ;;  %v7158_v21 = vld [vmem:[%s5850_s9 + $0x528] sm:$0xff]  ;;  %v5116_v13 = vpop.eup %5115  ;;  %v4386_v36 = vpack.c.bf16 %v5114_v32, %v5112_v39  ;;  %5135 = vpow2.f32 %v7049_v35  ;;  %v7161_v18 = vmul.f32 1.442695, %v1182_v44  ;;  %v7180_v49 = vld [vmem:[%s5850_s9 + $0x650] sm:$0xff]  ;;  %v7207_v58 = vld [vmem:[%s5850_s9 + $0x4a0] sm:$0xff] }
 0x16c   : > { %v7163_v55 = vmul.f32 1.442695, %v1186_v46  ;;  %v5118_v19 = vpop.eup %5117  ;;  %5137 = vpow2.f32 %v1610_v37  ;;  %v8264_v24 = vmax.f32 %v7026_v9, %v7019_v41  ;;  %v8265_v35 = vmax.f32 %v7010_v28, %v7013_v11  ;;  %v7189_v9 = vld [vmem:[%s5850_s9 + $0x480] sm:$0xff]  ;;  %v7217_v46 = vld [vmem:[%s5850_s9 + $0x690] sm:$0xff]  ;;  %v7220_v32 = vld [vmem:[%s5850_s9 + $0x588] sm:$0xff] }
 0x16d   : > { %v808_v62 = vrot.slane %v807_v53, 4  ;;  %v5120_v1 = vpop.eup %5119  ;;  %4387 = vmatprep.subr.bf16.mxu1 %v4386_v36  ;;  %v4308_v20 = vpack.c.bf16 %v5118_v19, %v5116_v13  ;;  %5139 = vpow2.f32 %v1618_v22  ;;  %v918_v12 = vmax.f32 %v7143_v16, %v7146_v0  ;;  %v7198_v22 = vld [vmem:[%s5850_s9 + $0x670] sm:$0xff]  ;;  %v7224_v36 = vld [vmem:[%s5850_s9 + $0x4c0] sm:$0xff] }
 0x16e   : > { %v934_v60 = vmax.f32 %v8264_v24, %v7131_v33  ;;  %v789_v38 = vmax.f32 %v8265_v35, %v7140_v59  ;;  %v853_v14 = vmax.f32 %v7155_v15, %v7158_v21  ;;  %v5122_v43 = vpop.eup %5121  ;;  %5141 = vpow2.f32 %v1476_v25  ;;  %v7232_v24 = vld [vmem:[%s5850_s9 + $0x6b0] sm:$0xff] }
 0x16f   : > { %v809_v26 = vmax.f32 %v807_v53, %v808_v62  ;;  %v5124_v56 = vpop.eup %5123  ;;  %4309 = vmatpush1.bf16.msra.mxu0 %v4308_v20  ;;  %v4388_v5 = vpack.c.bf16 %v5122_v43, %v5120_v1  ;;  %5143 = vpow2.f32 %v1484_v34  ;;  %v919_v25 = vmax.f32 %v918_v12, %v7180_v49 }
 0x170   : > { %v935_v42 = vmax.f32 %v934_v60, %v7166_v57  ;;  %v790_v37 = vmax.f32 %v789_v38, %v7169_v29  ;;  %v854_v30 = vmax.f32 %v853_v14, %v7183_v23  ;;  %v5126_v48 = vpop.eup %5125  ;;  %4311 = vmatprep.subr.bf16.mxu0 %v4310_v61  ;;  %5145 = vpow2.f32 %v1608_v6  ;;  %v7242_v14 = vld [vmem:[%s5850_s9 + $0x4e0] sm:$0xff] }
 0x171   : > { %v810_v39 = vrot.slane %v809_v26, 2  ;;  %v5128_v53 = vpop.eup %5127  ;;  %4389 = vmatpush1.bf16.msra.mxu1 %v4388_v5  ;;  %v4390_v13 = vpack.c.bf16 %v5126_v48, %v5124_v56  ;;  %5147 = vpow2.f32 %v7117_v3  ;;  %v920_v54 = vmax.f32 %v919_v25, %v7198_v22  ;;  %v7235_v3 = vld [vmem:[%s5850_s9 + $0x5a8] sm:$0xff] }
 0x172   : > { %v936_v44 = vmax.f32 %v935_v42, %v7186_v31  ;;  %v791_v34 = vmax.f32 %v790_v37, %v7189_v9  ;;  %v855_v10 = vmax.f32 %v854_v30, %v7201_v2  ;;  %v5130_v61 = vpop.eup %5129  ;;  %5149 = vpow2.f32 %v7111_v40  ;;  %v7249_v42 = vld [vmem:[%s5850_s9 + $0x5c8] sm:$0xff] }
 0x173   : > { %v811_v6 = vmax.f32 %v809_v26, %v810_v39  ;;  %v5132_v60 = vpop.eup %5131  ;;  %4391 = vmatprep.subr.bf16.mxu1 %v4390_v13  ;;  %v4312_v35 = vpack.c.bf16 %v5130_v61, %v5128_v53  ;;  %5151 = vpow2.f32 %v7113_v7  ;;  %v921_v38 = vmax.f32 %v920_v54, %v7217_v46  ;;  %v7246_v26 = vld [vmem:[%s5850_s9 + $0x6d0] sm:$0xff]  ;;  %v8266_v54 = vld [vmem:[#allocation27_spill] sm:$0xff] }
 0x174   : > { %v937_v19 = vmax.f32 %v936_v44, %v7204_v63  ;;  %v792_v62 = vmax.f32 %v791_v34, %v7207_v58  ;;  %v856_v40 = vmax.f32 %v855_v10, %v7220_v32  ;;  %v5134_v1 = vpop.eup %5133  ;;  %5153 = vpow2.f32 %v7124_v50  ;;  %v7259_v39 = vld [vmem:[%s5850_s9 + $0x6f0] sm:$0xff] }
 0x175   : > { %v812_v20 = vrot.slane %v811_v6, 1  ;;  %v5136_v37 = vpop.eup %5135  ;;  %4313 = vmatpush1.bf16.msra.mxu0 %v4312_v35  ;;  %v4392_v7 = vpack.c.bf16 %v5134_v1, %v5132_v60  ;;  %5155 = vpow2.f32 %v7133_v51  ;;  %v922_v56 = vmax.f32 %v921_v38, %v7232_v24 }
 0x176   : > { %v938_v12 = vrot.slane %v937_v19, 4  ;;  %v793_v43 = vmax.f32 %v792_v62, %v7224_v36  ;;  %v857_v50 = vmax.f32 %v856_v40, %v7235_v3  ;;  %v5138_v5 = vpop.eup %5137  ;;  %v4314_v25 = vpack.c.bf16 %v5136_v37, %v7101_v4 }
 0x177   : > { %5157 = vpow2.f32 %v7148_v47  ;;  %v7256_v30 = vmax.f32 %v811_v6, %v812_v20  ;;  %v5140_v44 = vpop.eup %5139  ;;  %4393 = vmatpush1.bf16.msra.mxu1 %v4392_v7  ;;  %v923_v34 = vmax.f32 %v922_v56, %v7246_v26 }
 0x178   : > { %v939_v48 = vmax.f32 %v937_v19, %v938_v12  ;;  %5159 = vpow2.f32 %v7150_v52  ;;  %v794_v51 = vmax.f32 %v793_v43, %v7242_v14  ;;  %v7265_v53 = vmax.f32 %v857_v50, %v7249_v42  ;;  %v5142_v13 = vpop.eup %5141  ;;  %4315 = vmatprep.subr.bf16.mxu0 %v4314_v25  ;;  %v8268_v43 = vld [vmem:[#allocation15_spill] sm:$0xff]  ;;  %v8269_v50 = vld [vmem:[#allocation13_spill] sm:$0xff] }
 0x179   : > { %v4394_v4 = vpack.c.bf16 %v5140_v44, %v5138_v5  ;;  %5161 = vpow2.f32 %v7161_v18  ;;  %v1125_v47 = vsub.f32 %v6879_v8, %v7256_v30  ;;  %v1129_v10 = vsub.f32 %v8266_v54, %v7256_v30  ;;  %v5144_v61 = vpop.eup %5143  ;;  %v8267_v18 = vld [vmem:[#allocation28_spill] sm:$0xff] }
 0x17a   : > { %5163 = vpow2.f32 %v7163_v55  ;;  %v940_v52 = vrot.slane %v939_v48, 2  ;;  %v795_v6 = vrot.slane %v794_v51, 4  ;;  %v924_v19 = vmax.f32 %v923_v34, %v7259_v39  ;;  %v5146_v62 = vpop.eup %5145 }
 0x17b   : > { %4395 = vmatprep.subr.bf16.mxu1 %v4394_v4  ;;  %v4316_v60 = vpack.c.bf16 %v5144_v61, %v5142_v13  ;;  %v1510_v35 = vmul.f32 1.442695, %v1125_v47  ;;  %v1518_v38 = vmul.f32 1.442695, %v1129_v10  ;;  %v1133_v40 = vsub.f32 %v8267_v18, %v7256_v30  ;;  %v5148_v1 = vpop.eup %5147  ;;  %v8270_v47 = vld [vmem:[#allocation16_spill] sm:$0xff] }
 0x17c   : > { %v941_v8 = vmax.f32 %v939_v48, %v940_v52  ;;  %v796_v20 = vmax.f32 %v794_v51, %v795_v6  ;;  %v925_v12 = vrot.slane %v924_v19, 4  ;;  %v1137_v37 = vsub.f32 %v8268_v43, %v7256_v30  ;;  %v5150_v55 = vpop.eup %5149  ;;  %v8273_v43 = vld [vmem:[#allocation14_spill] sm:$0xff] }
 0x17d   : > { %4317 = vmatpush1.bf16.msra.mxu0 %v4316_v60  ;;  %v4396_v7 = vpack.c.bf16 %v5148_v1, %v5146_v62  ;;  %5165 = vpow2.f32 %v1510_v35  ;;  %v1526_v56 = vmul.f32 1.442695, %v1133_v40  ;;  %v1141_v5 = vsub.f32 %v8269_v50, %v7256_v30  ;;  %v5152_v25 = vpop.eup %5151  ;;  %v8272_v1 = vld [vmem:[#allocation23_spill] sm:$0xff] }
 0x17e   : > { %5167 = vpow2.f32 %v1518_v38  ;;  %v942_v44 = vrot.slane %v941_v8, 1  ;;  %v797_v34 = vrot.slane %v796_v20, 2  ;;  %v926_v13 = vmax.f32 %v924_v19, %v925_v12  ;;  %v5154_v4 = vpop.eup %5153  ;;  %v8271_v19 = vld [vmem:[#allocation25_spill] sm:$0xff] }
 0x17f   : > { %4397 = vmatpush1.bf16.msra.mxu1 %v4396_v7  ;;  %v4318_v48 = vpack.c.bf16 %v5152_v25, %v5150_v55  ;;  %5169 = vpow2.f32 %v1526_v56  ;;  %v1534_v51 = vmul.f32 1.442695, %v1137_v37  ;;  %v1145_v54 = vsub.f32 %v8270_v47, %v7256_v30  ;;  %v5156_v10 = vpop.eup %5155  ;;  %v8274_v56 = vld [vmem:[#allocation19_spill] sm:$0xff] }
 0x180   : > { %v7282_v61 = vmax.f32 %v941_v8, %v942_v44  ;;  %v798_v52 = vmax.f32 %v796_v20, %v797_v34  ;;  %v927_v6 = vrot.slane %v926_v13, 2  ;;  %v1542_v62 = vmul.f32 1.442695, %v1141_v5 }
 0x181   : > { %v5158_v60 = vpop.eup %5157  ;;  %4319 = vmatprep.subr.bf16.mxu0 %v4318_v48  ;;  %v4398_v35 = vpack.c.bf16 %v5156_v10, %v5154_v4  ;;  %5171 = vpow2.f32 %v1534_v51  ;;  %v1550_v38 = vmul.f32 1.442695, %v1145_v54  ;;  %v1149_v18 = vsub.f32 %v8271_v19, %v7256_v30  ;;  %v7358_v19 = vld [vmem:[%s5850_s9 + $0x718] sm:$0xff] }
 0x182   : > { %v5160_v40 = vpop.eup %5159  ;;  %v1191_v12 = vsub.f32 %v8272_v1, %v7282_v61  ;;  %v1195_v37 = vsub.f32 %v8273_v43, %v7282_v61  ;;  %v799_v8 = vrot.slane %v798_v52, 1  ;;  %v928_v55 = vmax.f32 %v926_v13, %v927_v6 }
 0x183   : > { %v5162_v20 = vpop.eup %5161  ;;  %4399 = vmatprep.subr.bf16.mxu1 %v4398_v35  ;;  %v4320_v7 = vpack.c.bf16 %v5160_v40, %v5158_v60  ;;  %v1199_v50 = vsub.f32 %v8274_v56, %v7282_v61  ;;  %v1203_v5 = vsub.f32 %v7019_v41, %v7282_v61  ;;  %5173 = vpow2.f32 %v1542_v62 }
 0x184   : > { %v5164_v25 = vpop.eup %5163  ;;  %v1642_v44 = vmul.f32 1.442695, %v1191_v12  ;;  %v1650_v34 = vmul.f32 1.442695, %v1195_v37  ;;  %v7294_v4 = vmax.f32 %v798_v52, %v799_v8  ;;  %v929_v48 = vrot.slane %v928_v55, 1 }
 0x185   : > { %4321 = vmatpush1.bf16.msra.mxu0 %v4320_v7  ;;  %v4400_v51 = vpack.c.bf16 %v5164_v25, %v5162_v20  ;;  %v1658_v47 = vmul.f32 1.442695, %v1199_v50  ;;  %v1666_v13 = vmul.f32 1.442695, %v1203_v5  ;;  %5175 = vpow2.f32 %v1550_v38 }
 0x186   : > { %5177 = vpow2.f32 %v1642_v44  ;;  %v1124_v54 = vsub.f32 %v7010_v28, %v7294_v4  ;;  %v1128_v10 = vsub.f32 %v7013_v11, %v7294_v4  ;;  %v7300_v41 = vmax.f32 %v928_v55, %v929_v48 }
 0x187   : > { %v5166_v6 = vpop.eup %5165  ;;  %4401 = vmatpush1.bf16.msra.mxu1 %v4400_v51  ;;  %5179 = vpow2.f32 %v1650_v34  ;;  %v1132_v52 = vsub.f32 %v7140_v59, %v7294_v4  ;;  %v1136_v62 = vsub.f32 %v7169_v29, %v7294_v4  ;;  %v1207_v60 = vsub.f32 %v7131_v33, %v7282_v61 }
 0x188   : > { %v5168_v35 = vpop.eup %5167  ;;  %4160 = vmatmul.mubr.msk.f32.vlgmr.msra.gmra.mrb[8].mxu0 %vm1765_vm0, %v6803_v17  ;;  %v1508_v28 = vmul.f32 1.442695, %v1124_v54  ;;  %v1516_v11 = vmul.f32 1.442695, %v1128_v10  ;;  %v1190_v38 = vsub.f32 %v7143_v16, %v7300_v41  ;;  %v1194_v40 = vsub.f32 %v7146_v0, %v7300_v41 }
 0x189   : > { %v7314_v1 = vpop.eup %5169  ;;  %v4338_v59 = vpack.c.bf16 %v5168_v35, %v5166_v6  ;;  %5181 = vpow2.f32 %v1658_v47  ;;  %v1524_v29 = vmul.f32 1.442695, %v1132_v52  ;;  %v1532_v12 = vmul.f32 1.442695, %v1136_v62  ;;  %2401 = vmatprep.mubr.f32.mxu0 %v8225_v27  ;;  %v7365_v6 = vld [vmem:[%s5850_s9 + $0x5e8] sm:$0xff]  ;;  %v7368_v52 = vld [vmem:[%s5850_s9 + $0x738] sm:$0xff] }
 0x18a   : > { %4165 = vmatmul.mubr.msk.f32.vlgmr.msra.gmra.mrb[8].mxu1 %vm1765_vm0, %v6803_v17  ;;  %5183 = vpow2.f32 %v1508_v28  ;;  %v1640_v33 = vmul.f32 1.442695, %v1190_v38  ;;  %v1648_v43 = vmul.f32 1.442695, %v1194_v40  ;;  %v1198_v16 = vsub.f32 %v7180_v49, %v7300_v41  ;;  %v7390_v38 = vld [vmem:[%s5850_s9 + $0x710] sm:$0xff] }
 0x18b   : > { %v7321_v37 = vpop.eup %5171  ;;  %4339 = vmatprep.subr.bf16.mxu0 %v4338_v59  ;;  %5185 = vpow2.f32 %v1516_v11  ;;  %v1202_v0 = vsub.f32 %v7198_v22, %v7300_v41  ;;  %v1211_v8 = vsub.f32 %v7166_v57, %v7282_v61  ;;  %v1674_v55 = vmul.f32 1.442695, %v1207_v60  ;;  %2756 = vmatprep.mubr.f32.mxu1 %v8225_v27 }
 0x18c   : > { %5187 = vpow2.f32 %v1640_v33  ;;  %v4342_v17 = vpack.c.bf16 %v7321_v37, %v7314_v1  ;;  %v1656_v20 = vmul.f32 1.442695, %v1198_v16  ;;  %v1140_v49 = vsub.f32 %v7189_v9, %v7294_v4  ;;  %v7402_v33 = vld [vmem:[%s5850_s9 + $0x540] sm:$0xff]  ;;  %v7451_v1 = vld [vmem:[%s5850_s9 + $0x7b8] sm:$0xff] }
 0x18d   : > { %v7332_v7 = vpop.eup %5173  ;;  %5189 = vpow2.f32 %v1648_v43  ;;  %v1664_v56 = vmul.f32 1.442695, %v1202_v0  ;;  %v1682_v50 = vmul.f32 1.442695, %v1211_v8  ;;  %v1144_v22 = vsub.f32 %v7207_v58, %v7294_v4  ;;  %v7413_v8 = vld [vmem:[%s5850_s9 + $0x778] sm:$0xff] }
 0x18e   : > { %5191 = vpow2.f32 %v1666_v13  ;;  %v1540_v57 = vmul.f32 1.442695, %v1140_v49  ;;  %v1206_v5 = vsub.f32 %v7217_v46, %v7300_v41  ;;  %v1210_v25 = vsub.f32 %v7232_v24, %v7300_v41 }
 0x18f   : > { %v7340_v44 = vpop.eup %5175  ;;  %5193 = vpow2.f32 %v1524_v29  ;;  %v1548_v9 = vmul.f32 1.442695, %v1144_v22  ;;  %v1153_v34 = vsub.f32 %v7122_v45, %v7256_v30  ;;  %v7347_v58 = vmul.f32 1.442695, %v1149_v18 }
 0x190   : > { %v5178_v48 = vpop.eup %5177  ;;  %5195 = vpow2.f32 %v1532_v12  ;;  %v4346_v46 = vpack.c.bf16 %v7340_v44, %v7332_v7  ;;  %v1672_v24 = vmul.f32 1.442695, %v1206_v5  ;;  %v1680_v51 = vmul.f32 1.442695, %v1210_v25  ;;  %v7496_v44 = vld [vmem:[%s5850_s9 + $0x5e0] sm:$0xff] }
 0x191   : > { %v5180_v47 = vpop.eup %5179  ;;  %5197 = vpow2.f32 %v1656_v20  ;;  %v7351_v13 = vmul.f32 1.442695, %v1153_v34  ;;  %v1215_v45 = vsub.f32 %v7186_v31, %v7282_v61  ;;  %v1219_v30 = vsub.f32 %v7204_v63, %v7282_v61  ;;  %v7371_v31 = vld [vmem:[%s5850_s9 + $0x758] sm:$0xff] }
 0x192   : > { %v4418_v18 = vpack.c.bf16 %v5180_v47, %v5178_v48  ;;  %5199 = vpow2.f32 %v1664_v56  ;;  %v1148_v54 = vsub.f32 %v7224_v36, %v7294_v4  ;;  %v1152_v10 = vsub.f32 %v7242_v14, %v7294_v4  ;;  %v7378_v36 = vld [vmem:[%s5850_s9 + $0x500] sm:$0xff] }
 0x193   : > { %v5182_v62 = vpop.eup %5181  ;;  %5201 = vpow2.f32 %v1674_v55  ;;  %v1690_v63 = vmul.f32 1.442695, %v1215_v45  ;;  %v7373_v61 = vmul.f32 1.442695, %v1219_v30  ;;  %v1214_v60 = vsub.f32 %v7246_v26, %v7300_v41  ;;  %v7381_v14 = vld [vmem:[%s5850_s9 + $0x520] sm:$0xff]  ;;  %v7393_v26 = vld [vmem:[%s5850_s9 + $0x730] sm:$0xff] }
 0x194   : > { %v5184_v4 = vpop.eup %5183  ;;  %4419 = vmatprep.subr.bf16.mxu1 %v4418_v18  ;;  %5203 = vpow2.f32 %v1682_v50  ;;  %v7383_v35 = vmul.f32 1.442695, %v1148_v54  ;;  %v7385_v28 = vmul.f32 1.442695, %v1152_v10  ;;  %v1218_v11 = vsub.f32 %v7259_v39, %v7300_v41  ;;  %v7405_v39 = vld [vmem:[%s5850_s9 + $0x608] sm:$0xff]  ;;  %v7419_v56 = vld [vmem:[%s5850_s9 + $0x560] sm:$0xff] }
 0x195   : > { %v5186_v40 = vpop.eup %5185  ;;  %5205 = vpow2.f32 %v1540_v57  ;;  %v7395_v59 = vmul.f32 1.442695, %v1214_v60  ;;  %v859_v29 = vmax.f32 %v7265_v53, %v7365_v6  ;;  %v983_v12 = vmax.f32 %v7358_v19, %v7368_v52  ;;  %v7408_v41 = vld [vmem:[%s5850_s9 + $0x628] sm:$0xff]  ;;  %v7422_v50 = vld [vmem:[%s5850_s9 + $0x750] sm:$0xff] }
 0x196   : > { %v5188_v43 = vpop.eup %5187  ;;  %v4340_v16 = vpack.c.bf16 %v5186_v40, %v5184_v4  ;;  %5207 = vpow2.f32 %v1548_v9  ;;  %v7410_v0 = vmul.f32 1.442695, %v1218_v11  ;;  %v840_v53 = vmax.f32 %v7378_v36, %v7381_v14  ;;  %v7427_v57 = vld [vmem:[%s5850_s9 + $0x648] sm:$0xff]  ;;  %v7430_v9 = vld [vmem:[%s5850_s9 + $0x798] sm:$0xff]  ;;  %v7444_v18 = vld [vmem:[%s5850_s9 + $0x770] sm:$0xff] }
 0x197   : > { %v5190_v55 = vpop.eup %5189  ;;  %5209 = vpow2.f32 %v1672_v24  ;;  %v860_v20 = vrot.slane %v859_v29, 4  ;;  %v984_v49 = vmax.f32 %v983_v12, %v7371_v31  ;;  %v970_v22 = vmax.f32 %v7390_v38, %v7393_v26  ;;  %v7447_v54 = vld [vmem:[%s5850_s9 + $0x668] sm:$0xff]  ;;  %v7458_v40 = vld [vmem:[%s5850_s9 + $0x5a0] sm:$0xff] }
 0x198   : > { %v5192_v5 = vpop.eup %5191  ;;  %4341 = vmatpush1.bf16.msra.mxu0 %v4340_v16  ;;  %v4420_v25 = vpack.c.bf16 %v5190_v55, %v5188_v43  ;;  %5211 = vpow2.f32 %v1680_v51  ;;  %v841_v34 = vmax.f32 %v840_v53, %v7402_v33  ;;  %v905_v48 = vmax.f32 %v7405_v39, %v7408_v41  ;;  %v7441_v51 = vld [vmem:[%s5850_s9 + $0x580] sm:$0xff]  ;;  %v7468_v43 = vld [vmem:[%s5850_s9 + $0x7d8] sm:$0xff] }
 0x199   : > { %v5194_v24 = vpop.eup %5193  ;;  %4343 = vmatprep.subr.bf16.mxu0 %v4342_v17  ;;  %v4422_v47 = vpack.c.bf16 %v5192_v5, %v5182_v62  ;;  %5213 = vpow2.f32 %v7347_v58  ;;  %v861_v45 = vmax.f32 %v859_v29, %v860_v20  ;;  %v985_v30 = vmax.f32 %v984_v49, %v7413_v8  ;;  %v7464_v29 = vld [vmem:[%s5850_s9 + $0x688] sm:$0xff]  ;;  %v7476_v5 = vld [vmem:[%s5850_s9 + $0x5c0] sm:$0xff] }
 0x19a   : > { %v5196_v10 = vpop.eup %5195  ;;  %4421 = vmatpush1.bf16.msra.mxu1 %v4420_v25  ;;  %5215 = vpow2.f32 %v7351_v13  ;;  %v842_v37 = vmax.f32 %v841_v34, %v7419_v56  ;;  %v971_v17 = vmax.f32 %v970_v22, %v7422_v50  ;;  %v906_v58 = vmax.f32 %v905_v48, %v7427_v57  ;;  %v7461_v13 = vld [vmem:[%s5850_s9 + $0x790] sm:$0xff]  ;;  %v7486_v34 = vld [vmem:[%s5850_s9 + $0x7f8] sm:$0xff] }
 0x19b   : > { %v5198_v62 = vpop.eup %5197  ;;  %4423 = vmatprep.subr.bf16.mxu1 %v4422_v47  ;;  %v4344_v60 = vpack.c.bf16 %v5196_v10, %v5194_v24  ;;  %5217 = vpow2.f32 %v1690_v63  ;;  %v862_v4 = vrot.slane %v861_v45, 2  ;;  %v986_v11 = vmax.f32 %v985_v30, %v7430_v9 }
 0x19c   : > { %v5200_v12 = vpop.eup %5199  ;;  %5219 = vpow2.f32 %v7373_v61  ;;  %v843_v16 = vmax.f32 %v842_v37, %v7441_v51  ;;  %v972_v63 = vmax.f32 %v971_v17, %v7444_v18  ;;  %v907_v53 = vmax.f32 %v906_v58, %v7447_v54  ;;  %v7479_v61 = vld [vmem:[%s5850_s9 + $0x7b0] sm:$0xff] }
 0x19d   : > { %v5202_v55 = vpop.eup %5201  ;;  %4345 = vmatpush1.bf16.msra.mxu0 %v4344_v60  ;;  %v4424_v20 = vpack.c.bf16 %v5200_v12, %v5198_v62  ;;  %5221 = vpow2.f32 %v7383_v35  ;;  %v863_v49 = vmax.f32 %v861_v45, %v862_v4  ;;  %v987_v22 = vmax.f32 %v986_v11, %v7451_v1  ;;  %v7511_v4 = vld [vmem:[%s5850_s9 + $0x7f0] sm:$0xff] }
 0x19e   : > { %v5204_v25 = vpop.eup %5203  ;;  %4347 = vmatprep.subr.bf16.mxu0 %v4346_v46  ;;  %5223 = vpow2.f32 %v7385_v28  ;;  %v844_v35 = vmax.f32 %v843_v16, %v7458_v40  ;;  %v973_v48 = vmax.f32 %v972_v63, %v7461_v13  ;;  %v7491_v24 = vmax.f32 %v907_v53, %v7464_v29  ;;  %v7499_v46 = vld [vmem:[%s5850_s9 + $0x7d0] sm:$0xff]  ;;  %v7502_v28 = vld [vmem:[%s5850_s9 + $0x6a8] sm:$0xff] }
 0x19f   : > { %v5206_v47 = vpop.eup %5205  ;;  %4425 = vmatpush1.bf16.msra.mxu1 %v4424_v20  ;;  %v4426_v45 = vpack.c.bf16 %v5204_v25, %v5202_v55  ;;  %5225 = vpow2.f32 %v7395_v59  ;;  %v864_v30 = vrot.slane %v863_v49, 1  ;;  %v988_v7 = vmax.f32 %v987_v22, %v7468_v43 }
 0x1a0   : > { %v5208_v10 = vpop.eup %5207  ;;  %5227 = vpow2.f32 %v7410_v0  ;;  %v845_v37 = vmax.f32 %v844_v35, %v7476_v5  ;;  %v974_v17 = vmax.f32 %v973_v48, %v7479_v61  ;;  %v909_v0 = vmax.f32 %v7491_v24, %v7502_v28 }
 0x1a1   : > { %v5210_v58 = vpop.eup %5209  ;;  %4427 = vmatprep.subr.bf16.mxu1 %v4426_v45  ;;  %v4348_v62 = vpack.c.bf16 %v5208_v10, %v5206_v47  ;;  %v7507_v59 = vmax.f32 %v863_v49, %v864_v30  ;;  %v989_v60 = vmax.f32 %v988_v7, %v7486_v34 }
 0x1a2   : > { %v5212_v11 = vpop.eup %5211  ;;  %v846_v12 = vmax.f32 %v845_v37, %v7496_v44  ;;  %v975_v16 = vmax.f32 %v974_v17, %v7499_v46 }
 0x1a3   : > { %v5214_v63 = vpop.eup %5213  ;;  %4349 = vmatpush1.bf16.msra.mxu0 %v4348_v62  ;;  %v4428_v53 = vpack.c.bf16 %v5212_v11, %v5210_v58  ;;  %v1157_v55 = vsub.f32 %v7155_v15, %v7507_v59  ;;  %v1161_v20 = vsub.f32 %v7158_v21, %v7507_v59  ;;  %v990_v49 = vrot.slane %v989_v60, 4 }
 0x1a4   : > { %v5216_v22 = vpop.eup %5215  ;;  %v847_v25 = vrot.slane %v846_v12, 4  ;;  %v976_v35 = vmax.f32 %v975_v16, %v7511_v4  ;;  %v1165_v48 = vsub.f32 %v7183_v23, %v7507_v59  ;;  %v1169_v24 = vsub.f32 %v7201_v2, %v7507_v59 }
 0x1a5   : > { %v5218_v47 = vpop.eup %5217  ;;  %4429 = vmatpush1.bf16.msra.mxu1 %v4428_v53  ;;  %v4350_v45 = vpack.c.bf16 %v5216_v22, %v5214_v63  ;;  %v1574_v30 = vmul.f32 1.442695, %v1157_v55  ;;  %v1582_v7 = vmul.f32 1.442695, %v1161_v20  ;;  %v991_v15 = vmax.f32 %v989_v60, %v990_v49  ;;  %v7531_v22 = vld [vmem:[%s5850_s9 + $0x6c8] sm:$0xff] }
 0x1a6   : > { %v5220_v10 = vpop.eup %5219  ;;  %v848_v37 = vmax.f32 %v846_v12, %v847_v25  ;;  %v977_v21 = vrot.slane %v976_v35, 4  ;;  %v1590_v17 = vmul.f32 1.442695, %v1165_v48  ;;  %v1598_v58 = vmul.f32 1.442695, %v1169_v24 }
 0x1a7   : > { %v5222_v62 = vpop.eup %5221  ;;  %4351 = vmatprep.subr.bf16.mxu0 %v4350_v45  ;;  %v4430_v11 = vpack.c.bf16 %v5220_v10, %v5218_v47  ;;  %5229 = vpow2.f32 %v1574_v30  ;;  %v992_v23 = vrot.slane %v991_v15, 2  ;;  %v1173_v2 = vsub.f32 %v7220_v32, %v7507_v59  ;;  %v7534_v47 = vld [vmem:[%s5850_s9 + $0x600] sm:$0xff] }
 0x1a8   : > { %v5224_v16 = vpop.eup %5223  ;;  %5231 = vpow2.f32 %v1582_v7  ;;  %v849_v63 = vrot.slane %v848_v37, 2  ;;  %v978_v60 = vmax.f32 %v976_v35, %v977_v21  ;;  %v1177_v12 = vsub.f32 %v7235_v3, %v7507_v59  ;;  %v7537_v35 = vld [vmem:[%s5850_s9 + $0x620] sm:$0xff]  ;;  %v7542_v7 = vld [vmem:[%s5850_s9 + $0x708] sm:$0xff] }
 0x1a9   : > { %v5226_v53 = vpop.eup %5225  ;;  %4431 = vmatprep.subr.bf16.mxu1 %v4430_v11  ;;  %v4352_v55 = vpack.c.bf16 %v5224_v16, %v5222_v62  ;;  %v993_v20 = vmax.f32 %v991_v15, %v992_v23  ;;  %v1606_v49 = vmul.f32 1.442695, %v1173_v2  ;;  %5233 = vpow2.f32 %v1590_v17  ;;  %v7545_v15 = vld [vmem:[%s5850_s9 + $0x728] sm:$0xff]  ;;  %v7555_v23 = vld [vmem:[#allocation4] sm:$0xff] }
 0x1aa   : > { %v5228_v25 = vpop.eup %5227  ;;  %v850_v32 = vmax.f32 %v848_v37, %v849_v63  ;;  %v979_v48 = vrot.slane %v978_v60, 2  ;;  %v1614_v24 = vmul.f32 1.442695, %v1177_v12  ;;  %v1181_v30 = vsub.f32 %v7249_v42, %v7507_v59  ;;  %v7551_v11 = vld [vmem:[%s5850_s9 + $0x6e8] sm:$0xff] }
 0x1ab   : > { %4353 = vmatpush1.bf16.msra.mxu0 %v4352_v55  ;;  %v4432_v3 = vpack.c.bf16 %v5228_v25, %v5226_v53  ;;  %v994_v45 = vrot.slane %v993_v20, 1  ;;  %5235 = vpow2.f32 %v1598_v58  ;;  %v910_v21 = vmax.f32 %v909_v0, %v7531_v22  ;;  %v7584_v55 = vld [vmem:[%s5850_s9 + $0x640] sm:$0xff] }
 0x1ac   : > { %v851_v10 = vrot.slane %v850_v32, 1  ;;  %v980_v37 = vmax.f32 %v978_v60, %v979_v48  ;;  %5237 = vpow2.f32 %v1606_v49  ;;  %v892_v17 = vmax.f32 %v7534_v47, %v7537_v35 }
 0x1ad   : > { %4433 = vmatpush1.bf16.msra.mxu1 %v4432_v3  ;;  %v7548_v62 = vmax.f32 %v993_v20, %v994_v45  ;;  %5239 = vpow2.f32 %v1614_v24  ;;  %v957_v0 = vmax.f32 %v7542_v7, %v7545_v15  ;;  %v1185_v63 = vsub.f32 %v7365_v6, %v7507_v59 }
 0x1ae   : > { %4162 = vmatmul.mubr.msk.f32.vlgmr.msra.gmra.mrb[10].mxu0 %vm1765_vm0, %v7555_v23  ;;  %v7559_v42 = vmax.f32 %v850_v32, %v851_v10  ;;  %v981_v58 = vrot.slane %v980_v37, 1  ;;  %v7569_v60 = vmul.f32 1.442695, %v1181_v30 }
 0x1af   : > { %v1223_v2 = vsub.f32 %v7358_v19, %v7548_v62  ;;  %v1227_v16 = vsub.f32 %v7368_v52, %v7548_v62  ;;  %2543 = vmatprep.mubr.f32.mxu0 %v8225_v27  ;;  %v7581_v52 = vmax.f32 %v910_v21, %v7551_v11  ;;  %v1231_v49 = vsub.f32 %v7371_v31, %v7548_v62 }
 0x1b0   : > { %4167 = vmatmul.mubr.msk.f32.vlgmr.msra.gmra.mrb[10].mxu1 %vm1765_vm0, %v7555_v23  ;;  %v1156_v12 = vsub.f32 %v7378_v36, %v7559_v42  ;;  %v1160_v53 = vsub.f32 %v7381_v14, %v7559_v42  ;;  %v7578_v19 = vmax.f32 %v980_v37, %v981_v58  ;;  %v1235_v36 = vsub.f32 %v7413_v8, %v7548_v62  ;;  %v7601_v8 = vld [vmem:[%s5850_s9 + $0x748] sm:$0xff] }
 0x1b1   : > { %v5230_v6 = vpop.eup %5229  ;;  %v1706_v59 = vmul.f32 1.442695, %v1223_v2  ;;  %v1714_v20 = vmul.f32 1.442695, %v1227_v16  ;;  %2898 = vmatprep.mubr.f32.mxu1 %v8225_v27  ;;  %v1164_v45 = vsub.f32 %v7402_v33, %v7559_v42  ;;  %v7598_v31 = vmax.f32 %v892_v17, %v7584_v55 }
 0x1b2   : > { %v5232_v14 = vpop.eup %5231  ;;  %v1572_v25 = vmul.f32 1.442695, %v1156_v12  ;;  %v1580_v32 = vmul.f32 1.442695, %v1160_v53  ;;  %v1222_v48 = vsub.f32 %v7390_v38, %v7578_v19  ;;  %v1226_v24 = vsub.f32 %v7393_v26, %v7578_v19 }
 0x1b3   : > { %v4370_v3 = vpack.c.bf16 %v5232_v14, %v5230_v6  ;;  %5241 = vpow2.f32 %v1706_v59  ;;  %v1168_v37 = vsub.f32 %v7419_v56, %v7559_v42  ;;  %v7605_v38 = vpop.eup %5233  ;;  %v1722_v26 = vmul.f32 1.442695, %v1231_v49 }
 0x1b4   : > { %5243 = vpow2.f32 %v1714_v20  ;;  %v1704_v30 = vmul.f32 1.442695, %v1222_v48  ;;  %v1712_v10 = vmul.f32 1.442695, %v1226_v24  ;;  %v1230_v21 = vsub.f32 %v7422_v50, %v7578_v19 }
 0x1b5   : > { %4371 = vmatprep.subr.bf16.mxu0 %v4370_v3  ;;  %5245 = vpow2.f32 %v1572_v25  ;;  %v7609_v33 = vmul.f32 1.442695, %v1185_v63  ;;  %v7611_v17 = vpop.eup %5235  ;;  %v1730_v58 = vmul.f32 1.442695, %v1235_v36  ;;  %v1234_v2 = vsub.f32 %v7444_v18, %v7578_v19  ;;  %v7645_v25 = vld [vmem:[%s5850_s9 + $0x660] sm:$0xff] }
 0x1b6   : > { %5247 = vpow2.f32 %v1580_v32  ;;  %v7616_v16 = vmax.f32 %v957_v0, %v7601_v8  ;;  %v7618_v56 = vpop.eup %5237  ;;  %v1588_v12 = vmul.f32 1.442695, %v1164_v45  ;;  %v1239_v53 = vsub.f32 %v7430_v9, %v7548_v62 }
 0x1b7   : > { %5249 = vpow2.f32 %v1704_v30  ;;  %v1243_v50 = vsub.f32 %v7451_v1, %v7548_v62  ;;  %v7624_v63 = vpop.eup %5239  ;;  %v1596_v6 = vmul.f32 1.442695, %v1168_v37  ;;  %v1172_v18 = vsub.f32 %v7441_v51, %v7559_v42  ;;  %v7634_v1 = vpop.f32.mrb[0].mxu0  ;;  %v7659_v37 = vld [vmem:[%s5850_s9 + $0x768] sm:$0xff] }
 0x1b8   : > { %5251 = vpow2.f32 %v1712_v10  ;;  %v1176_v0 = vsub.f32 %v7458_v40, %v7559_v42  ;;  %v1720_v59 = vmul.f32 1.442695, %v1230_v21  ;;  %v1238_v20 = vsub.f32 %v7461_v13, %v7578_v19  ;;  %v7640_v14 = vpop.f32.mrb[1].mxu0 }
 0x1b9   : > { %5253 = vpow2.f32 %v1722_v26  ;;  %v1242_v9 = vsub.f32 %v7479_v61, %v7578_v19  ;;  %v4374_v49 = vpack.c.bf16 %v7611_v17, %v7605_v38  ;;  %v1728_v36 = vmul.f32 1.442695, %v1234_v2  ;;  %v7647_v32 = vpop.f32.mrb[0].mxu1 }
 0x1ba   : > { %5255 = vpow2.f32 %v1730_v58  ;;  %v1247_v51 = vsub.f32 %v7468_v43, %v7548_v62  ;;  %v1738_v40 = vmul.f32 1.442695, %v1239_v53  ;;  %v1746_v13 = vmul.f32 1.442695, %v1243_v50  ;;  %v7651_v3 = vpop.f32.mrb[1].mxu1  ;;  %v7668_v53 = vld [vmem:[%s5850_s9 + $0x720] sm:$0xff] }
 0x1bb   : > { %5257 = vpow2.f32 %v1588_v12  ;;  %v1251_v61 = vsub.f32 %v7486_v34, %v7548_v62  ;;  %v4378_v48 = vpack.c.bf16 %v7624_v63, %v7618_v56  ;;  %v1604_v43 = vmul.f32 1.442695, %v1172_v18  ;;  %v7656_v62 = vld [vmem:[%s5850_s9 + $0x680] sm:$0xff] }
 0x1bc   : > { %5259 = vpow2.f32 %v1596_v6  ;;  %v1612_v24 = vmul.f32 1.442695, %v1176_v0  ;;  %v1736_v30 = vmul.f32 1.442695, %v1238_v20  ;;  %v1744_v10 = vmul.f32 1.442695, %v1242_v9 }
 0x1bd   : > { %v5242_v45 = vpop.eup %5241  ;;  %5261 = vpow2.f32 %v1720_v59  ;;  %v1180_v34 = vsub.f32 %v7476_v5, %v7559_v42  ;;  %v1754_v21 = vmul.f32 1.442695, %v1247_v51  ;;  %v912_v58 = vrot.slane %v7581_v52, 4  ;;  %v7665_v12 = vld [vmem:[%s5850_s9 + $0x700] sm:$0xff]  ;;  %v7676_v59 = vld [vmem:[%s5850_s9 + $0x788] sm:$0xff] }
 0x1be   : > { %v5244_v26 = vpop.eup %5243  ;;  %5263 = vpow2.f32 %v1728_v36  ;;  %v894_v2 = vmax.f32 %v7598_v31, %v7645_v25  ;;  %v1762_v6 = vmul.f32 1.442695, %v1251_v61  ;;  %v1184_v18 = vsub.f32 %v7496_v44, %v7559_v42  ;;  %v7673_v0 = vld [vmem:[%s5850_s9 + $0x6a0] sm:$0xff] }
 0x1bf   : > { %v5246_v50 = vpop.eup %5245  ;;  %v4450_v5 = vpack.c.bf16 %v5244_v26, %v5242_v45  ;;  %5265 = vpow2.f32 %v1738_v40  ;;  %v913_v31 = vmax.f32 %v7581_v52, %v912_v58  ;;  %v959_v36 = vmax.f32 %v7616_v16, %v7659_v37  ;;  %v7683_v51 = vld [vmem:[%s5850_s9 + $0x740] sm:$0xff]  ;;  %v7692_v58 = vld [vmem:[%s5850_s9 + $0x7a8] sm:$0xff] }
 0x1c0   : > { %v5248_v20 = vpop.eup %5247  ;;  %5267 = vpow2.f32 %v1746_v13  ;;  %v895_v9 = vmax.f32 %v894_v2, %v7656_v62  ;;  %v1620_v42 = vmul.f32 1.442695, %v1180_v34  ;;  %v7686_v61 = vld [vmem:[%s5850_s9 + $0x6c0] sm:$0xff]  ;;  %v944_v13 = vmax.f32 %v7665_v12, %v7668_v53 }
 0x1c1   : > { %v5250_v40 = vpop.eup %5249  ;;  %4451 = vmatprep.subr.bf16.mxu1 %v4450_v5  ;;  %v4372_v44 = vpack.c.bf16 %v5248_v20, %v5246_v50  ;;  %5269 = vpow2.f32 %v1604_v43  ;;  %v914_v45 = vrot.slane %v913_v31, 2  ;;  %v960_v16 = vmax.f32 %v959_v36, %v7676_v59  ;;  %v7696_v2 = vld [vmem:[%s5850_s9 + $0x760] sm:$0xff] }
 0x1c2   : > { %v5252_v52 = vpop.eup %5251  ;;  %5271 = vpow2.f32 %v1612_v24  ;;  %v896_v26 = vmax.f32 %v895_v9, %v7673_v0  ;;  %v1246_v34 = vsub.f32 %v7499_v46, %v7578_v19  ;;  %v7701_v5 = vld [vmem:[%s5850_s9 + $0x6e0] sm:$0xff]  ;;  %v945_v24 = vmax.f32 %v944_v13, %v7683_v51 }
 0x1c3   : > { %v5254_v50 = vpop.eup %5253  ;;  %4373 = vmatpush1.bf16.msra.mxu0 %v4372_v44  ;;  %v4452_v43 = vpack.c.bf16 %v5252_v52, %v5250_v40  ;;  %5273 = vpow2.f32 %v1736_v30  ;;  %v1250_v9 = vsub.f32 %v7511_v4, %v7578_v19  ;;  %v915_v36 = vmax.f32 %v913_v31, %v914_v45  ;;  %v7716_v4 = vld [vmem:[%s5850_s9 + $0x7c8] sm:$0xff]  ;;  %v7719_v19 = vld [vmem:[%s5850_s9 + $0x780] sm:$0xff] }
 0x1c4   : > { %v5256_v20 = vpop.eup %5255  ;;  %4375 = vmatprep.subr.bf16.mxu0 %v4374_v49  ;;  %5275 = vpow2.f32 %v1744_v10  ;;  %v897_v30 = vmax.f32 %v896_v26, %v7686_v61  ;;  %v961_v44 = vmax.f32 %v960_v16, %v7692_v58  ;;  %v946_v13 = vmax.f32 %v945_v24, %v7696_v2 }
 0x1c5   : > { %v5258_v40 = vpop.eup %5257  ;;  %4453 = vmatpush1.bf16.msra.mxu1 %v4452_v43  ;;  %v4454_v46 = vpack.c.bf16 %v5256_v20, %v5254_v50  ;;  %5277 = vpow2.f32 %v7569_v60  ;;  %v1628_v17 = vmul.f32 1.442695, %v1184_v18  ;;  %v916_v49 = vrot.slane %v915_v36, 1 }
 0x1c6   : > { %v5260_v38 = vpop.eup %5259  ;;  %5279 = vpow2.f32 %v7609_v33  ;;  %v898_v10 = vmax.f32 %v897_v30, %v7701_v5  ;;  %v1752_v60 = vmul.f32 1.442695, %v1246_v34  ;;  %v1760_v26 = vmul.f32 1.442695, %v1250_v9  ;;  %v7735_v9 = vld [vmem:[%s5850_s9 + $0x7e8] sm:$0xff] }
 0x1c7   : > { %v5262_v31 = vpop.eup %5261  ;;  %4455 = vmatprep.subr.bf16.mxu1 %v4454_v46  ;;  %v4376_v52 = vpack.c.bf16 %v5260_v38, %v5258_v40  ;;  %5281 = vpow2.f32 %v1754_v21  ;;  %v7721_v16 = vmax.f32 %v915_v36, %v916_v49  ;;  %v962_v43 = vmax.f32 %v961_v44, %v7716_v4 }
 0x1c8   : > { %v5264_v45 = vpop.eup %5263  ;;  %5283 = vpow2.f32 %v1762_v6  ;;  %v899_v33 = vrot.slane %v898_v10, 4  ;;  %v7725_v24 = vmax.f32 %v946_v13, %v7719_v19 }
 0x1c9   : > { %v5266_v18 = vpop.eup %5265  ;;  %4377 = vmatpush1.bf16.msra.mxu0 %v4376_v52  ;;  %v4456_v50 = vpack.c.bf16 %v5264_v45, %v5262_v31  ;;  %5285 = vpow2.f32 %v1620_v42  ;;  %v1189_v21 = vsub.f32 %v7405_v39, %v7721_v16  ;;  %v1193_v6 = vsub.f32 %v7408_v41, %v7721_v16 }
 0x1ca   : > { %v5268_v20 = vpop.eup %5267  ;;  %4379 = vmatprep.subr.bf16.mxu0 %v4378_v48  ;;  %5287 = vpow2.f32 %v1628_v17  ;;  %v900_v34 = vmax.f32 %v898_v10, %v899_v33  ;;  %v1197_v30 = vsub.f32 %v7427_v57, %v7721_v16  ;;  %v1201_v56 = vsub.f32 %v7447_v54, %v7721_v16  ;;  %v7747_v10 = vld [vmem:[%s5850_s9 + $0x7a0] sm:$0xff] }
 0x1cb   : > { %v5270_v42 = vpop.eup %5269  ;;  %4457 = vmatpush1.bf16.msra.mxu1 %v4456_v50  ;;  %v4458_v36 = vpack.c.bf16 %v5268_v20, %v5266_v18  ;;  %5289 = vpow2.f32 %v1752_v60  ;;  %v1638_v39 = vmul.f32 1.442695, %v1189_v21  ;;  %v1646_v48 = vmul.f32 1.442695, %v1193_v6 }
 0x1cc   : > { %v5272_v63 = vpop.eup %5271  ;;  %5291 = vpow2.f32 %v1760_v26  ;;  %v901_v40 = vrot.slane %v900_v34, 2  ;;  %v1654_v44 = vmul.f32 1.442695, %v1197_v30  ;;  %v1205_v13 = vsub.f32 %v7464_v29, %v7721_v16 }
 0x1cd   : > { %v5274_v41 = vpop.eup %5273  ;;  %4459 = vmatprep.subr.bf16.mxu1 %v4458_v36  ;;  %v4380_v46 = vpack.c.bf16 %v5272_v63, %v5270_v42  ;;  %v963_v38 = vmax.f32 %v962_v43, %v7735_v9  ;;  %5293 = vpow2.f32 %v1638_v39  ;;  %v1662_v49 = vmul.f32 1.442695, %v1201_v56 }
 0x1ce   : > { %v5276_v17 = vpop.eup %5275  ;;  %v902_v57 = vmax.f32 %v900_v34, %v901_v40  ;;  %v1209_v54 = vsub.f32 %v7502_v28, %v7721_v16  ;;  %5295 = vpow2.f32 %v1646_v48  ;;  %v1670_v60 = vmul.f32 1.442695, %v1205_v13  ;;  %v7756_v34 = vld [vmem:[%s5850_s9 + $0x7c0] sm:$0xff] }
 0x1cf   : > { %v5278_v31 = vpop.eup %5277  ;;  %4381 = vmatpush1.bf16.msra.mxu0 %v4380_v46  ;;  %v4460_v52 = vpack.c.bf16 %v5276_v17, %v5274_v41  ;;  %v1213_v29 = vsub.f32 %v7531_v22, %v7721_v16  ;;  %5297 = vpow2.f32 %v1654_v44  ;;  %v964_v50 = vrot.slane %v963_v38, 4  ;;  %v7765_v46 = vld [vmem:[%s5850_s9 + $0x7e0] sm:$0xff] }
 0x1d0   : > { %v5280_v45 = vpop.eup %5279  ;;  %v903_v26 = vrot.slane %v902_v57, 1  ;;  %v948_v28 = vmax.f32 %v7725_v24, %v7747_v10  ;;  %5299 = vpow2.f32 %v1662_v49  ;;  %v1678_v21 = vmul.f32 1.442695, %v1209_v54 }
 0x1d1   : > { %v5282_v33 = vpop.eup %5281  ;;  %4461 = vmatpush1.bf16.msra.mxu1 %v4460_v52  ;;  %v4382_v18 = vpack.c.bf16 %v5280_v45, %v5278_v31  ;;  %v1217_v6 = vsub.f32 %v7551_v11, %v7721_v16  ;;  %5301 = vpow2.f32 %v1670_v60  ;;  %v1686_v36 = vmul.f32 1.442695, %v1213_v29 }
 0x1d2   : > { %v5284_v43 = vpop.eup %5283  ;;  %v904_v20 = vmax.f32 %v902_v57, %v903_v26  ;;  %v965_v30 = vmax.f32 %v963_v38, %v964_v50  ;;  %v949_v44 = vmax.f32 %v948_v28, %v7756_v34  ;;  %5303 = vpow2.f32 %v1678_v21 }
 0x1d3   : > { %v5286_v22 = vpop.eup %5285  ;;  %4383 = vmatprep.subr.bf16.mxu0 %v4382_v18  ;;  %v4462_v42 = vpack.c.bf16 %v5284_v43, %v5282_v33  ;;  %5305 = vpow2.f32 %v1686_v36  ;;  %v1694_v29 = vmul.f32 1.442695, %v1217_v6 }
 0x1d4   : > { %v5288_v56 = vpop.eup %5287  ;;  %v1188_v63 = vsub.f32 %v7534_v47, %v904_v20  ;;  %v1192_v24 = vsub.f32 %v7537_v35, %v904_v20  ;;  %v1196_v39 = vsub.f32 %v7584_v55, %v904_v20  ;;  %v1200_v48 = vsub.f32 %v7645_v25, %v904_v20 }
 0x1d5   : > { %v5290_v40 = vpop.eup %5289  ;;  %4463 = vmatprep.subr.bf16.mxu1 %v4462_v42  ;;  %v4384_v11 = vpack.c.bf16 %v5288_v56, %v5286_v22  ;;  %v1204_v16 = vsub.f32 %v7656_v62, %v904_v20  ;;  %v1208_v41 = vsub.f32 %v7673_v0, %v904_v20  ;;  %v1212_v62 = vsub.f32 %v7686_v61, %v904_v20 }
 0x1d6   : > { %v5292_v13 = vpop.eup %5291  ;;  %v1636_v38 = vmul.f32 1.442695, %v1188_v63  ;;  %v1644_v47 = vmul.f32 1.442695, %v1192_v24  ;;  %v1652_v17 = vmul.f32 1.442695, %v1196_v39  ;;  %v1216_v31 = vsub.f32 %v7701_v5, %v904_v20 }
 0x1d7   : > { %4385 = vmatpush1.bf16.msra.mxu0 %v4384_v11  ;;  %v4464_v35 = vpack.c.bf16 %v5292_v13, %v5290_v40  ;;  %v1660_v55 = vmul.f32 1.442695, %v1200_v48  ;;  %v5294_v25 = vpop.eup %5293  ;;  %v1668_v57 = vmul.f32 1.442695, %v1204_v16  ;;  %v966_v49 = vrot.slane %v965_v30, 2 }
 0x1d8   : > { %5307 = vpow2.f32 %v1636_v38  ;;  %v5296_v0 = vpop.eup %5295  ;;  %v1676_v54 = vmul.f32 1.442695, %v1208_v41  ;;  %v950_v52 = vmax.f32 %v949_v44, %v7765_v46  ;;  %v1684_v5 = vmul.f32 1.442695, %v1212_v62 }
 0x1d9   : > { %4465 = vmatpush1.bf16.msra.mxu1 %v4464_v35  ;;  %5309 = vpow2.f32 %v1644_v47  ;;  %v4402_v60 = vpack.c.bf16 %v5296_v0, %v5294_v25  ;;  %v5298_v45 = vpop.eup %5297  ;;  %v967_v61 = vmax.f32 %v965_v30, %v966_v49  ;;  %v1692_v28 = vmul.f32 1.442695, %v1216_v31 }
 0x1da   : > { %4164 = vmatmul.mubr.msk.f32.vlgmr.msra.gmra.mrb[12].mxu0 %vm1765_vm0, %v7555_v23  ;;  %5311 = vpow2.f32 %v1652_v17  ;;  %v951_v26 = vrot.slane %v950_v52, 4  ;;  %v5300_v33 = vpop.eup %5299 }
 0x1db   : > { %5313 = vpow2.f32 %v1660_v55  ;;  %2685 = vmatprep.mubr.f32.mxu0 %v8225_v27  ;;  %4403 = vmatprep.subr.bf16.mxu0 %v4402_v60  ;;  %v7776_v18 = vpop.f32.mrb[2].mxu0  ;;  %v7778_v50 = vpop.eup %5301  ;;  %v968_v43 = vrot.slane %v967_v61, 1  ;;  %v4406_v13 = vpack.c.bf16 %v5300_v33, %v5298_v45 }
 0x1dc   : > { %4169 = vmatmul.mubr.msk.f32.vlgmr.msra.gmra.mrb[12].mxu1 %vm1765_vm0, %v7555_v23  ;;  %5315 = vpow2.f32 %v1668_v57  ;;  %v952_v20 = vmax.f32 %v950_v52, %v951_v26  ;;  %v7780_v21 = vpop.f32.mrb[3].mxu0  ;;  %v5304_v30 = vpop.eup %5303 }
 0x1dd   : > { %5317 = vpow2.f32 %v1676_v54  ;;  %v7782_v6 = vpop.f32.mrb[2].mxu1  ;;  %v7784_v22 = vmax.f32 %v967_v61, %v968_v43  ;;  %v7788_v56 = vpop.eup %5305 }
 0x1de   : > { %5319 = vpow2.f32 %v1694_v29  ;;  %v953_v42 = vrot.slane %v952_v20, 2  ;;  %v7786_v36 = vpop.f32.mrb[3].mxu1 }
 0x1df   : > { %5321 = vpow2.f32 %v1684_v5  ;;  %v1221_v63 = vsub.f32 %v7542_v7, %v7784_v22  ;;  %v1225_v24 = vsub.f32 %v7545_v15, %v7784_v22  ;;  %v1229_v40 = vsub.f32 %v7601_v8, %v7784_v22 }
 0x1e0   : > { %5323 = vpow2.f32 %v1692_v28  ;;  %v954_v39 = vmax.f32 %v952_v20, %v953_v42  ;;  %v1233_v11 = vsub.f32 %v7659_v37, %v7784_v22  ;;  %v1237_v16 = vsub.f32 %v7676_v59, %v7784_v22 }
 0x1e1   : > { %v1241_v41 = vsub.f32 %v7692_v58, %v7784_v22  ;;  %v1702_v7 = vmul.f32 1.442695, %v1221_v63  ;;  %v1710_v38 = vmul.f32 1.442695, %v1225_v24  ;;  %v1718_v35 = vmul.f32 1.442695, %v1229_v40 }
 0x1e2   : > { %v5308_v48 = vpop.eup %5307  ;;  %v955_v47 = vrot.slane %v954_v39, 1  ;;  %v1726_v55 = vmul.f32 1.442695, %v1233_v11  ;;  %v4410_v8 = vpack.c.bf16 %v5304_v30, %v7778_v50  ;;  %v1734_v57 = vmul.f32 1.442695, %v1237_v16 }
 0x1e3   : > { %v5310_v44 = vpop.eup %5309  ;;  %5325 = vpow2.f32 %v1702_v7  ;;  %v1742_v58 = vmul.f32 1.442695, %v1241_v41  ;;  %v1245_v49 = vsub.f32 %v7716_v4, %v7784_v22  ;;  %v1249_v61 = vsub.f32 %v7735_v9, %v7784_v22 }
 0x1e4   : > { %v5312_v15 = vpop.eup %5311  ;;  %v4404_v17 = vpack.c.bf16 %v5310_v44, %v5308_v48  ;;  %v956_v37 = vmax.f32 %v954_v39, %v955_v47  ;;  %5327 = vpow2.f32 %v1710_v38 }
 0x1e5   : > { %v5314_v25 = vpop.eup %5313  ;;  %5329 = vpow2.f32 %v1718_v35  ;;  %v1750_v20 = vmul.f32 1.442695, %v1245_v49  ;;  %v1758_v42 = vmul.f32 1.442695, %v1249_v61 }
 0x1e6   : > { %v5316_v62 = vpop.eup %5315  ;;  %4405 = vmatpush1.bf16.msra.mxu0 %v4404_v17  ;;  %v4408_v59 = vpack.c.bf16 %v5314_v25, %v5312_v15  ;;  %v1220_v54 = vsub.f32 %v7665_v12, %v956_v37  ;;  %v1224_v31 = vsub.f32 %v7668_v53, %v956_v37  ;;  %v1228_v52 = vsub.f32 %v7683_v51, %v956_v37 }
 0x1e7   : > { %v5318_v0 = vpop.eup %5317  ;;  %4407 = vmatprep.subr.bf16.mxu0 %v4406_v13  ;;  %5331 = vpow2.f32 %v1726_v55  ;;  %v1232_v29 = vsub.f32 %v7696_v2, %v956_v37  ;;  %v1236_v45 = vsub.f32 %v7719_v19, %v956_v37  ;;  %v1240_v51 = vsub.f32 %v7747_v10, %v956_v37 }
 0x1e8   : > { %v5320_v60 = vpop.eup %5319  ;;  %v1700_v26 = vmul.f32 1.442695, %v1220_v54  ;;  %v1708_v4 = vmul.f32 1.442695, %v1224_v31  ;;  %v1716_v33 = vmul.f32 1.442695, %v1228_v52  ;;  %5333 = vpow2.f32 %v1734_v57 }
 0x1e9   : > { %v5322_v5 = vpop.eup %5321  ;;  %v4412_v12 = vpack.c.bf16 %v5318_v0, %v5316_v62  ;;  %v1724_v53 = vmul.f32 1.442695, %v1232_v29  ;;  %5335 = vpow2.f32 %v1742_v58  ;;  %v4414_v2 = vpack.c.bf16 %v5320_v60, %v7788_v56 }
 0x1ea   : > { %4409 = vmatpush1.bf16.msra.mxu0 %v4408_v59  ;;  %v5324_v50 = vpop.eup %5323  ;;  %5337 = vpow2.f32 %v1700_v26  ;;  %v1732_v19 = vmul.f32 1.442695, %v1236_v45  ;;  %v1244_v28 = vsub.f32 %v7756_v34, %v956_v37  ;;  %v1740_v9 = vmul.f32 1.442695, %v1240_v51 }
 0x1eb   : > { %4411 = vmatprep.subr.bf16.mxu0 %v4410_v8  ;;  %5339 = vpow2.f32 %v1708_v4  ;;  %v1248_v43 = vsub.f32 %v7765_v46, %v956_v37  ;;  %v4416_v22 = vpack.c.bf16 %v5324_v50, %v5322_v5 }
 0x1ec   : > { %5341 = vpow2.f32 %v1716_v33  ;;  %v1748_v10 = vmul.f32 1.442695, %v1244_v28 }
 0x1ed   : > { %5343 = vpow2.f32 %v1724_v53  ;;  %v5326_v30 = vpop.eup %5325  ;;  %v1756_v56 = vmul.f32 1.442695, %v1248_v43 }
 0x1ee   : > { %4413 = vmatpush1.bf16.msra.mxu0 %v4412_v12  ;;  %5345 = vpow2.f32 %v1732_v19  ;;  %v5328_v63 = vpop.eup %5327 }
 0x1ef   : > { %4415 = vmatprep.subr.bf16.mxu0 %v4414_v2  ;;  %5347 = vpow2.f32 %v1740_v9  ;;  %v5330_v24 = vpop.eup %5329  ;;  %v4434_v39 = vpack.c.bf16 %v5328_v63, %v5326_v30 }
 0x1f0   : > { %5349 = vpow2.f32 %v1750_v20 }
 0x1f1   : > { %v5332_v34 = vpop.eup %5331  ;;  %5351 = vpow2.f32 %v1758_v42 }
 0x1f2   : > { %4417 = vmatpush1.bf16.msra.mxu0 %v4416_v22  ;;  %v5334_v46 = vpop.eup %5333  ;;  %5353 = vpow2.f32 %v1748_v10  ;;  %v4438_v16 = vpack.c.bf16 %v5332_v34, %v5330_v24 }
 0x1f3   : > { %4435 = vmatprep.subr.bf16.mxu0 %v4434_v39  ;;  %v5336_v48 = vpop.eup %5335  ;;  %5355 = vpow2.f32 %v1756_v56 }
 0x1f4   : > { %v5338_v40 = vpop.eup %5337  ;;  %5357 = vrcp.f32 %v7647_v32  ;;  %v4442_v15 = vpack.c.bf16 %v5336_v48, %v5334_v46 }
 0x1f5   : > { %4166 = vmatmul.mubr.msk.f32.vlgmr.msra.gmra.mrb[14].mxu0 %vm1765_vm0, %v7555_v23  ;;  %v5340_v11 = vpop.eup %5339  ;;  %5359 = vrcp.f32 %v7776_v18 }
 0x1f6   : > { %2827 = vmatprep.mubr.f32.mxu0 %v8225_v27  ;;  %v5342_v41 = vpop.eup %5341  ;;  %v4436_v44 = vpack.c.bf16 %v5340_v11, %v5338_v40  ;;  %5361 = vrcp.f32 %v7651_v3 }
 0x1f7   : > { %v5344_v13 = vpop.eup %5343  ;;  %5363 = vrcp.f32 %v7780_v21 }
 0x1f8   : > { %v5346_v7 = vpop.eup %5345  ;;  %4437 = vmatpush1.bf16.msra.mxu0 %v4436_v44  ;;  %v4440_v38 = vpack.c.bf16 %v5344_v13, %v5342_v41  ;;  %5365 = vrcp.f32 %v7782_v6 }
 0x1f9   : > { %v5348_v47 = vpop.eup %5347  ;;  %4439 = vmatprep.subr.bf16.mxu0 %v4438_v16  ;;  %5367 = vrcp.f32 %v7786_v36 }
 0x1fa   : > { %v5350_v27 = vpop.eup %5349  ;;  %v4444_v55 = vpack.c.bf16 %v5348_v47, %v5346_v7  ;;  %5369 = vrcp.f32 %v7634_v1 }
 0x1fb   : > { %v5352_v17 = vpop.eup %5351  ;;  %5371 = vrcp.f32 %v7640_v14 }
 0x1fc   : > { %v5354_v35 = vpop.eup %5353  ;;  %4441 = vmatpush1.bf16.msra.mxu0 %v4440_v38  ;;  %v4446_v8 = vpack.c.bf16 %v5352_v17, %v5350_v27 }
 0x1fd   : > { %v5356_v25 = vpop.eup %5355  ;;  %4443 = vmatprep.subr.bf16.mxu0 %v4442_v15 }
 0x1fe   : > { %v5358_v37 = vpop.eup %5357  ;;  %v4448_v62 = vpack.c.bf16 %v5356_v25, %v5354_v35 }
 0x1ff   : > { %v5360_v57 = vpop.eup %5359  ;;  %v2975_v59 = vrot.slane %v5358_v37, 7  ;;  %v3071_v58 = vrot.slane %v5358_v37, 6 }
 0x200   : > { %4445 = vmatpush1.bf16.msra.mxu0 %v4444_v55  ;;  %v5362_v49 = vpop.eup %5361  ;;  %v2971_v0 = vrot.slane %v5360_v57, 7  ;;  %v3067_v54 = vrot.slane %v5360_v57, 6  ;;  %v3290_v57 = vld [vmem:[#allocation6 + $0x408] sm:$0xff] }
 0x201   : > { %4447 = vmatprep.subr.bf16.mxu0 %v4446_v8  ;;  %v5364_v31 = vpop.eup %5363  ;;  %v3135_v52 = vmul.f32 %v3071_v58, %v7647_v32  ;;  %v2976_v60 = vrot.slane %v5362_v49, 7  ;;  %v3072_v29 = vrot.slane %v5362_v49, 6  ;;  %v3039_v61 = vmul.f32 %v2975_v59, %v7647_v32  ;;  %v3162_v59 = vld [vmem:[#allocation6 + $0x8] sm:$0xff] }
 0x202   : > { %v5366_v45 = vpop.eup %5365  ;;  %v3035_v26 = vmul.f32 %v2971_v0, %v7776_v18  ;;  %v3131_v4 = vmul.f32 %v3067_v54, %v7776_v18  ;;  %v2972_v51 = vrot.slane %v5364_v31, 7  ;;  %v3068_v19 = vrot.slane %v5364_v31, 6  ;;  %v3164_v31 = vld [vmem:[#allocation6 + $0x18] sm:$0xff] }
 0x203   : > { %v5368_v33 = vpop.eup %5367  ;;  %v3485_v5 = vrot.slane %v3135_v52, 1  ;;  %v3040_v12 = vmul.f32 %v2976_v60, %v7651_v3  ;;  %v3136_v53 = vmul.f32 %v3072_v29, %v7651_v3  ;;  %v2979_v28 = vrot.slane %v5366_v45, 7  ;;  %v3289_v52 = vld [vmem:[#allocation6 + $0x400] sm:$0xff]  ;;  %v3291_v60 = vld [vmem:[#allocation6 + $0x410] sm:$0xff] }
 0x204   : > { %4449 = vmatpush1.bf16.msra.mxu0 %v4448_v62  ;;  %v3484_v50 = vrot.slane %v3131_v4, 2  ;;  %v3718_v2 = vrot.slane %v3035_v26, 1  ;;  %v3036_v32 = vmul.f32 %v2972_v51, %v7780_v21  ;;  %v3075_v43 = vrot.slane %v5366_v45, 6  ;;  %v5370_v30 = vpop.eup %5369  ;;  %v3292_v62 = vld [vmem:[#allocation6 + $0x418] sm:$0xff]  ;;  %v3161_v26 = vld [vmem:[#allocation6] sm:$0xff]  ;;  %v3163_v4 = vld [vmem:[#allocation6 + $0x10] sm:$0xff] }
 0x205   : > { %v3499_v9 = vrot.slane %v3136_v53, 1  ;;  %v2980_v20 = vrot.slane %v5368_v33, 7  ;;  %v3132_v42 = vmul.f32 %v3068_v19, %v7780_v21  ;;  %v3043_v3 = vmul.f32 %v2979_v28, %v7782_v6  ;;  %v5372_v48 = vpop.eup %5371 }
 0x206   : > { %v3486_v18 = vsel %vm3451_vm1, %v3485_v5, %v3484_v50  ;;  %v3719_v22 = vsel %vm3451_vm1, %v3039_v61, %v3718_v2  ;;  %v3732_v10 = vrot.slane %v3036_v32, 1  ;;  %v3139_v63 = vmul.f32 %v3075_v43, %v7782_v6  ;;  %v3296_v2 = vld [vmem:[#allocation6 + $0x438] sm:$0xff] }
 0x207   : > { %4168 = vmatmul.mubr.msk.f32.vlgmr.msra.gmra.mrb[16].mxu0 %vm1765_vm0, %v7555_v23  ;;  %v3044_v56 = vmul.f32 %v2980_v20, %v7786_v36  ;;  %v3076_v24 = vrot.slane %v5368_v33, 6  ;;  %v3498_v34 = vrot.slane %v3132_v42, 2  ;;  %v3720_v46 = vrot.slane %v3043_v3, 7  ;;  %v3294_v33 = vld [vmem:[#allocation6 + $0x428] sm:$0xff] }
 0x208   : > { %v1977_v39 = vpop.f32.mrb[4].mxu0  ;;  %v3733_v40 = vsel %vm3451_vm1, %v3040_v12, %v3732_v10  ;;  %v7846_v21 = vsel %vm3453_vm2, %v3139_v63, %v3486_v18  ;;  %v2969_v6 = vrot.slane %v5370_v30, 7  ;;  %v3065_v38 = vrot.slane %v5370_v30, 6  ;;  %v3166_v20 = vld [vmem:[#allocation6 + $0x28] sm:$0xff]  ;;  %v3168_v18 = vld [vmem:[#allocation6 + $0x38] sm:$0xff]  ;;  %v3293_v10 = vld [vmem:[#allocation6 + $0x420] sm:$0xff] }
 0x209   : > { %5373 = vrcp.f32 %v1977_v39  ;;  %v7842_v23 = vpop.f32.mrb[5].mxu0  ;;  %v3140_v11 = vmul.f32 %v3076_v24, %v7786_v36  ;;  %v3734_v16 = vrot.slane %v3044_v56, 7  ;;  %v3500_v44 = vsel %vm3451_vm1, %v3499_v9, %v3498_v34  ;;  %v3295_v63 = vld [vmem:[#allocation6 + $0x430] sm:$0xff]  ;;  %v3165_v56 = vld [vmem:[#allocation6 + $0x20] sm:$0xff] }
 0x20a   : > { %v2332_v41 = vpop.f32.mrb[4].mxu1  ;;  %v7851_v13 = vsel %vm3453_vm2, %v3720_v46, %v3719_v22  ;;  %v2970_v36 = vrot.slane %v5372_v48, 7  ;;  %v3066_v27 = vrot.slane %v5372_v48, 6  ;;  %v3033_v17 = vmul.f32 %v2969_v6, %v7634_v1  ;;  %v3167_v48 = vld [vmem:[#allocation6 + $0x30] sm:$0xff] }
 0x20b   : > { %5375 = vrcp.f32 %v2332_v41  ;;  %v7853_v7 = vpop.f32.mrb[5].mxu1  ;;  %v7856_v47 = vsel %vm3453_vm2, %v3140_v11, %v3500_v44  ;;  %v7859_v15 = vsel %vm3453_vm2, %v3734_v16, %v3733_v40  ;;  %v3129_v35 = vmul.f32 %v3065_v38, %v7634_v1  ;;  %v3298_v40 = vld [vmem:[#allocation6 + $0x448] sm:$0xff]  ;;  %v3300_v11 = vld [vmem:[#allocation6 + $0x458] sm:$0xff] }
 0x20c   : > { %5377 = vrcp.f32 %v7842_v23  ;;  %v7866_v55 = vmul.f32 %v2970_v36, %v7640_v14  ;;  %v7869_v25 = vmul.f32 %v3066_v27, %v7640_v14  ;;  %v3690_v37 = vrot.slane %v3033_v17, 1  ;;  %v3170_v38 = vld [vmem:[#allocation6 + $0x48] sm:$0xff]  ;;  %v3172_v36 = vld [vmem:[#allocation6 + $0x58] sm:$0xff]  ;;  %v3297_v27 = vld [vmem:[#allocation6 + $0x440] sm:$0xff] }
 0x20d   : > { %5379 = vrcp.f32 %v7853_v7  ;;  %v3449_v58 = vrot.slane %v3129_v35, 2  ;;  %v4466_v54 = vpack.c.bf16 %v3292_v62, %v3290_v57  ;;  %v4594_v14 = vpack.c.bf16 %v3164_v31, %v3162_v59 }
 0x20e   : > { %v3470_v29 = vrot.slane %v7869_v25, 2  ;;  %v3704_v45 = vrot.slane %v7866_v55, 1  ;;  %v4468_v61 = vpack.c.bf16 %v3291_v60, %v3289_v52  ;;  %v4596_v32 = vpack.c.bf16 %v3163_v4, %v3161_v26  ;;  %v3299_v25 = vld [vmem:[#allocation6 + $0x450] sm:$0xff]  ;;  %v3304_v26 = vld [vmem:[#allocation6 + $0x478] sm:$0xff] }
 0x20f   : > { %4467 = vmatprep.subr.bf16.mxu1 %v4466_v54  ;;  %4595 = vmatprep.subr.bf16.mxu0 %v4594_v14  ;;  %v4470_v43 = vpack.c.bf16 %v3296_v2, %v3294_v33  ;;  %v4472_v59 = vpack.c.bf16 %v3295_v63, %v3293_v10  ;;  %v4602_v31 = vpack.c.bf16 %v3172_v36, %v3170_v38  ;;  %v3176_v33 = vld [vmem:[#allocation6 + $0x78] sm:$0xff] }
 0x210   : > { %4469 = vmatpush1.bf16.msra.mxu1 %v4468_v61  ;;  %4597 = vmatpush1.bf16.msra.mxu0 %v4596_v32  ;;  %v4476_v52 = vpack.c.bf16 %v3299_v25, %v3297_v27  ;;  %v3302_v61 = vld [vmem:[#allocation6 + $0x468] sm:$0xff] }
 0x211   : > { %4471 = vmatprep.subr.bf16.mxu1 %v4470_v43  ;;  %v4478_v4 = vpack.c.bf16 %v3304_v26, %v3302_v61  ;;  %v3306_v43 = vld [vmem:[#allocation6 + $0x488] sm:$0xff] }
 0x212   : > { %v3310_v25 = vld [vmem:[#allocation6 + $0x4a8] sm:$0xff] }
 0x213   : > { %v5374_v8 = vpop.eup %5373 }
 0x214   : > { %v2973_v49 = vrot.slane %v5374_v8, 7  ;;  %v3069_v0 = vrot.slane %v5374_v8, 6  ;;  %v3169_v8 = vld [vmem:[#allocation6 + $0x40] sm:$0xff]  ;;  %4473 = vmatpush1.bf16.msra.mxu1 %v4472_v59 }
 0x215   : > { %v5376_v1 = vpop.eup %5375 }
 0x216   : > { %v5378_v5 = vpop.eup %5377  ;;  %v3037_v12 = vmul.f32 %v2973_v49, %v1977_v39  ;;  %v3133_v53 = vmul.f32 %v3069_v0, %v1977_v39  ;;  %v2983_v51 = vrot.slane %v5376_v1, 7  ;;  %v3079_v50 = vrot.slane %v5376_v1, 6 }
 0x217   : > { %v5380_v19 = vpop.eup %5379  ;;  %v2974_v28 = vrot.slane %v5378_v5, 7  ;;  %v3070_v9 = vrot.slane %v5378_v5, 6  ;;  %v3301_v5 = vld [vmem:[#allocation6 + $0x460] sm:$0xff] }
 0x218   : > { %v3450_v22 = vrot.slane %v3133_v53, 1  ;;  %v7874_v42 = vsel %vm3451_vm1, %v3037_v12, %v3690_v37  ;;  %v3047_v3 = vmul.f32 %v2983_v51, %v2332_v41  ;;  %v3143_v30 = vmul.f32 %v3079_v50, %v2332_v41  ;;  %v3171_v37 = vld [vmem:[#allocation6 + $0x50] sm:$0xff]  ;;  %v3173_v51 = vld [vmem:[#allocation6 + $0x60] sm:$0xff] }
 0x219   : > { %v3038_v24 = vmul.f32 %v2974_v28, %v7842_v23  ;;  %v3134_v39 = vmul.f32 %v3070_v9, %v7842_v23  ;;  %v2984_v34 = vrot.slane %v5380_v19, 7  ;;  %v3080_v46 = vrot.slane %v5380_v19, 6  ;;  %v3175_v50 = vld [vmem:[#allocation6 + $0x70] sm:$0xff] }
 0x21a   : > { %v7879_v16 = vsel %vm3451_vm1, %v3450_v22, %v3449_v58  ;;  %v3488_v6 = vrot.slane %v3143_v30, 7  ;;  %v3722_v44 = vrot.slane %v3047_v3, 6  ;;  %v4598_v41 = vpack.c.bf16 %v3168_v18, %v3166_v20  ;;  %v3308_v20 = vld [vmem:[#allocation6 + $0x498] sm:$0xff] }
 0x21b   : > { %v3471_v17 = vrot.slane %v3134_v39, 1  ;;  %v7882_v35 = vsel %vm3451_vm1, %v3038_v24, %v3704_v45  ;;  %v3048_v23 = vmul.f32 %v2984_v34, %v7853_v7  ;;  %v3144_v55 = vmul.f32 %v3080_v46, %v7853_v7  ;;  %v3178_v34 = vld [vmem:[#allocation6 + $0x88] sm:$0xff] }
 0x21c   : > { %v7888_v57 = vsel %vm3456_vm3, %v3488_v6, %v7846_v21  ;;  %v7892_v62 = vsel %vm3456_vm3, %v3722_v44, %v7851_v13  ;;  %4599 = vmatprep.subr.bf16.mxu0 %v4598_v41  ;;  %v4600_v58 = vpack.c.bf16 %v3167_v48, %v3165_v56  ;;  %v4474_v7 = vpack.c.bf16 %v3300_v11, %v3298_v40  ;;  %v3180_v6 = vld [vmem:[#allocation6 + $0x98] sm:$0xff]  ;;  %v3305_v44 = vld [vmem:[#allocation6 + $0x480] sm:$0xff]  ;;  %v3307_v41 = vld [vmem:[#allocation6 + $0x490] sm:$0xff] }
 0x21d   : > { %v7895_v49 = vsel %vm3451_vm1, %v3471_v17, %v3470_v29  ;;  %v3502_v0 = vrot.slane %v3144_v55, 7  ;;  %v3736_v54 = vrot.slane %v3048_v23, 6  ;;  %v4604_v60 = vpack.c.bf16 %v3171_v37, %v3169_v8  ;;  %v3177_v23 = vld [vmem:[#allocation6 + $0x80] sm:$0xff]  ;;  %v3179_v55 = vld [vmem:[#allocation6 + $0x90] sm:$0xff] }
 0x21e   : > { %4601 = vmatpush1.bf16.msra.mxu0 %v4600_v58  ;;  %4475 = vmatprep.subr.bf16.mxu1 %v4474_v7  ;;  %v4608_v19 = vpack.c.bf16 %v3175_v50, %v3173_v51  ;;  %v4482_v30 = vpack.c.bf16 %v3308_v20, %v3306_v43  ;;  %v3184_v7 = vld [vmem:[#allocation6 + $0xb8] sm:$0xff]  ;;  %v3187_v43 = vld [vmem:[#allocation6 + $0xd0] sm:$0xff] }
 0x21f   : > { %v7899_v21 = vsel %vm3456_vm3, %v3502_v0, %v7856_v47  ;;  %v7903_v13 = vsel %vm3456_vm3, %v3736_v54, %v7859_v15  ;;  %4603 = vmatprep.subr.bf16.mxu0 %v4602_v31  ;;  %4477 = vmatpush1.bf16.msra.mxu1 %v4476_v52  ;;  %v3174_v47 = vld [vmem:[#allocation6 + $0x68] sm:$0xff]  ;;  %v3303_v15 = vld [vmem:[#allocation6 + $0x470] sm:$0xff]  ;;  %v3312_v0 = vld [vmem:[#allocation6 + $0x4b8] sm:$0xff] }
 0x220   : > { %v4606_v12 = vpack.c.bf16 %v3176_v33, %v3174_v47  ;;  %v4480_v53 = vpack.c.bf16 %v3303_v15, %v3301_v5  ;;  %4479 = vmatprep.subr.bf16.mxu1 %v4478_v4  ;;  %v3182_v54 = vld [vmem:[#allocation6 + $0xa8] sm:$0xff]  ;;  %v3183_v47 = vld [vmem:[#allocation6 + $0xb0] sm:$0xff]  ;;  %v3316_v33 = vld [vmem:[#allocation6 + $0x4d8] sm:$0xff]  ;;  %v4612_v15 = vpack.c.bf16 %v3179_v55, %v3177_v23 }
 0x221   : > { %v3314_v4 = vld [vmem:[#allocation6 + $0x4c8] sm:$0xff]  ;;  %v4614_v51 = vpack.c.bf16 %v3184_v7, %v3182_v54  ;;  %v3193_v23 = vld [vmem:[#allocation6 + $0x100] sm:$0xff]  ;;  %v3195_v55 = vld [vmem:[#allocation6 + $0x110] sm:$0xff] }
 0x222   : > { %4605 = vmatpush1.bf16.msra.mxu0 %v4604_v60  ;;  %v4610_v60 = vpack.c.bf16 %v3180_v6, %v3178_v34  ;;  %v3196_v6 = vld [vmem:[#allocation6 + $0x118] sm:$0xff]  ;;  %v4628_v54 = vpack.c.bf16 %v3195_v55, %v3193_v23  ;;  %v3214_v23 = vld [vmem:[#allocation6 + $0x1a8] sm:$0xff] }
 0x223   : > { %4607 = vmatprep.subr.bf16.mxu0 %v4606_v12  ;;  %4481 = vmatpush1.bf16.msra.mxu1 %v4480_v53  ;;  %v4486_v12 = vpack.c.bf16 %v3312_v0, %v3310_v25  ;;  %v3186_v53 = vld [vmem:[#allocation6 + $0xc8] sm:$0xff]  ;;  %v3200_v0 = vld [vmem:[#allocation6 + $0x138] sm:$0xff] }
 0x224   : > { %4483 = vmatprep.subr.bf16.mxu1 %v4482_v30  ;;  %v3326_v25 = vld [vmem:[#allocation6 + $0x528] sm:$0xff] }
 0x226   : > { %4609 = vmatpush1.bf16.msra.mxu0 %v4608_v19  ;;  %v4490_v19 = vpack.c.bf16 %v3316_v33, %v3314_v4 }
 0x227   : > { %4611 = vmatprep.subr.bf16.mxu0 %v4610_v60 }
 0x22a   : > { %4613 = vmatpush1.bf16.msra.mxu0 %v4612_v15  ;;  %v3329_v15 = vld [vmem:[#allocation6 + $0x540] sm:$0xff] }
 0x22b   : > { %4615 = vmatprep.subr.bf16.mxu0 %v4614_v51  ;;  %v3203_v51 = vld [vmem:[#allocation6 + $0x150] sm:$0xff] }
 0x230   : > { %v2119_v1 = vpop.f32.mrb[6].mxu0 }
 0x231   : > { %5381 = vrcp.f32 %v2119_v1  ;;  %v2121_v29 = vpop.f32.mrb[7].mxu0 }
 0x232   : > { %v2474_v45 = vpop.f32.mrb[6].mxu1  ;;  %5383 = vrcp.f32 %v2121_v29 }
 0x233   : > { %5385 = vrcp.f32 %v2474_v45  ;;  %v2476_v14 = vpop.f32.mrb[7].mxu1 }
 0x234   : > { %5387 = vrcp.f32 %v2476_v14 }
 0x23b   : > { %v5382_v2 = vpop.eup %5381 }
 0x23c   : > { %v5384_v28 = vpop.eup %5383  ;;  %v2977_v9 = vrot.slane %v5382_v2, 7  ;;  %v3073_v32 = vrot.slane %v5382_v2, 6 }
 0x23d   : > { %v5386_v18 = vpop.eup %5385  ;;  %v2978_v22 = vrot.slane %v5384_v28, 7  ;;  %v3074_v3 = vrot.slane %v5384_v28, 6  ;;  %v3313_v28 = vld [vmem:[#allocation6 + $0x4c0] sm:$0xff] }
 0x23e   : > { %v5388_v10 = vpop.eup %5387  ;;  %v3041_v63 = vmul.f32 %v2977_v9, %v2119_v1  ;;  %v3137_v56 = vmul.f32 %v3073_v32, %v2119_v1  ;;  %v2987_v24 = vrot.slane %v5386_v18, 7  ;;  %v3083_v39 = vrot.slane %v5386_v18, 6  ;;  %v3309_v1 = vld [vmem:[#allocation6 + $0x4a0] sm:$0xff]  ;;  %v3315_v9 = vld [vmem:[#allocation6 + $0x4d0] sm:$0xff]  ;;  %v3318_v18 = vld [vmem:[#allocation6 + $0x4e8] sm:$0xff] }
 0x23f   : > { %v3042_v46 = vmul.f32 %v2978_v22, %v2121_v29  ;;  %v3138_v48 = vmul.f32 %v3074_v3, %v2121_v29  ;;  %v2988_v40 = vrot.slane %v5388_v10, 7  ;;  %v3084_v11 = vrot.slane %v5388_v10, 6  ;;  %v3311_v29 = vld [vmem:[#allocation6 + $0x4b0] sm:$0xff]  ;;  %v3185_v32 = vld [vmem:[#allocation6 + $0xc0] sm:$0xff]  ;;  %v3320_v22 = vld [vmem:[#allocation6 + $0x4f8] sm:$0xff] }
 0x240   : > { %v7907_v38 = vsel %vm3453_vm2, %v3137_v56, %v7879_v16  ;;  %v3692_v36 = vrot.slane %v3041_v63, 7  ;;  %v3051_v27 = vmul.f32 %v2987_v24, %v2474_v45  ;;  %v3147_v17 = vmul.f32 %v3083_v39, %v2474_v45  ;;  %v3181_v45 = vld [vmem:[#allocation6 + $0xa0] sm:$0xff]  ;;  %v3190_v3 = vld [vmem:[#allocation6 + $0xe8] sm:$0xff]  ;;  %v3192_v10 = vld [vmem:[#allocation6 + $0xf8] sm:$0xff] }
 0x241   : > { %v7911_v8 = vsel %vm3453_vm2, %v3138_v48, %v7895_v49  ;;  %v3706_v37 = vrot.slane %v3042_v46, 7  ;;  %v3052_v59 = vmul.f32 %v2988_v40, %v2476_v14  ;;  %v3148_v58 = vmul.f32 %v3084_v11, %v2476_v14  ;;  %v3317_v24 = vld [vmem:[#allocation6 + $0x4e0] sm:$0xff]  ;;  %v3319_v39 = vld [vmem:[#allocation6 + $0x4f0] sm:$0xff]  ;;  %v3322_v48 = vld [vmem:[#allocation6 + $0x508] sm:$0xff] }
 0x242   : > { %v7915_v16 = vsel %vm3453_vm2, %v3692_v36, %v7874_v42  ;;  %v3490_v31 = vrot.slane %v3147_v17, 6  ;;  %v3724_v52 = vrot.slane %v3051_v27, 5  ;;  %v4484_v14 = vpack.c.bf16 %v3307_v41, %v3305_v44  ;;  %v3191_v46 = vld [vmem:[#allocation6 + $0xf0] sm:$0xff]  ;;  %v3324_v40 = vld [vmem:[#allocation6 + $0x518] sm:$0xff]  ;;  %v3321_v36 = vld [vmem:[#allocation6 + $0x500] sm:$0xff] }
 0x243   : > { %v7919_v49 = vsel %vm3453_vm2, %v3706_v37, %v7882_v35  ;;  %v3504_v61 = vrot.slane %v3148_v58, 6  ;;  %v3738_v26 = vrot.slane %v3052_v59, 5  ;;  %v3188_v35 = vld [vmem:[#allocation6 + $0xd8] sm:$0xff]  ;;  %v4488_v50 = vpack.c.bf16 %v3311_v29, %v3309_v1  ;;  %v3323_v27 = vld [vmem:[#allocation6 + $0x510] sm:$0xff]  ;;  %v3198_v59 = vld [vmem:[#allocation6 + $0x128] sm:$0xff] }
 0x244   : > { %v7923_v42 = vsel %vm3459_vm4, %v3490_v31, %v7888_v57  ;;  %v7927_v5 = vsel %vm3459_vm4, %v3724_v52, %v7892_v62  ;;  %4485 = vmatpush1.bf16.msra.mxu1 %v4484_v14  ;;  %v4616_v2 = vpack.c.bf16 %v3183_v47, %v3181_v45  ;;  %v4618_v57 = vpack.c.bf16 %v3188_v35, %v3186_v53  ;;  %v3328_v37 = vld [vmem:[#allocation6 + $0x538] sm:$0xff]  ;;  %v3325_v31 = vld [vmem:[#allocation6 + $0x520] sm:$0xff]  ;;  %v3327_v52 = vld [vmem:[#allocation6 + $0x530] sm:$0xff] }
 0x245   : > { %4487 = vmatprep.subr.bf16.mxu1 %v4486_v12  ;;  %v7931_v62 = vsel %vm3459_vm4, %v3504_v61, %v7899_v21  ;;  %v7935_v20 = vsel %vm3459_vm4, %v3738_v26, %v7903_v13  ;;  %v4492_v30 = vpack.c.bf16 %v3315_v9, %v3313_v28  ;;  %v4620_v63 = vpack.c.bf16 %v3187_v43, %v3185_v32  ;;  %v3189_v21 = vld [vmem:[#allocation6 + $0xe0] sm:$0xff]  ;;  %v3194_v13 = vld [vmem:[#allocation6 + $0x108] sm:$0xff]  ;;  %v3199_v29 = vld [vmem:[#allocation6 + $0x130] sm:$0xff] }
 0x246   : > { %4617 = vmatpush1.bf16.msra.mxu0 %v4616_v2  ;;  %v4494_v56 = vpack.c.bf16 %v3320_v22, %v3318_v18  ;;  %v4622_v34 = vpack.c.bf16 %v3192_v10, %v3190_v3  ;;  %v4496_v11 = vpack.c.bf16 %v3319_v39, %v3317_v24  ;;  %v4624_v44 = vpack.c.bf16 %v3191_v46, %v3189_v21  ;;  %v3197_v1 = vld [vmem:[#allocation6 + $0x120] sm:$0xff]  ;;  %v3330_v45 = vld [vmem:[#allocation6 + $0x548] sm:$0xff]  ;;  %v3332_v61 = vld [vmem:[#allocation6 + $0x558] sm:$0xff] }
 0x247   : > { %4619 = vmatprep.subr.bf16.mxu0 %v4618_v57  ;;  %v4498_v41 = vpack.c.bf16 %v3324_v40, %v3322_v48  ;;  %v4626_v17 = vpack.c.bf16 %v3196_v6, %v3194_v13  ;;  %v4500_v58 = vpack.c.bf16 %v3323_v27, %v3321_v36  ;;  %v4502_v7 = vpack.c.bf16 %v3328_v37, %v3326_v25  ;;  %v3202_v26 = vld [vmem:[#allocation6 + $0x148] sm:$0xff]  ;;  %v3204_v47 = vld [vmem:[#allocation6 + $0x158] sm:$0xff]  ;;  %v3331_v12 = vld [vmem:[#allocation6 + $0x550] sm:$0xff] }
 0x248   : > { %4489 = vmatpush1.bf16.msra.mxu1 %v4488_v50  ;;  %v4630_v60 = vpack.c.bf16 %v3200_v0, %v3198_v59  ;;  %v4504_v14 = vpack.c.bf16 %v3327_v52, %v3325_v31  ;;  %v4632_v4 = vpack.c.bf16 %v3199_v29, %v3197_v1  ;;  %v4506_v33 = vpack.c.bf16 %v3332_v61, %v3330_v45  ;;  %v3201_v35 = vld [vmem:[#allocation6 + $0x140] sm:$0xff]  ;;  %v3334_v50 = vld [vmem:[#allocation6 + $0x568] sm:$0xff]  ;;  %v3336_v2 = vld [vmem:[#allocation6 + $0x578] sm:$0xff] }
 0x249   : > { %4491 = vmatprep.subr.bf16.mxu1 %v4490_v19  ;;  %v4634_v53 = vpack.c.bf16 %v3204_v47, %v3202_v26  ;;  %v3206_v19 = vld [vmem:[#allocation6 + $0x168] sm:$0xff]  ;;  %v4508_v28 = vpack.c.bf16 %v3331_v12, %v3329_v15  ;;  %v3208_v9 = vld [vmem:[#allocation6 + $0x178] sm:$0xff]  ;;  %v4636_v57 = vpack.c.bf16 %v3203_v51, %v3201_v35  ;;  %v4510_v32 = vpack.c.bf16 %v3336_v2, %v3334_v50  ;;  %v3333_v43 = vld [vmem:[#allocation6 + $0x560] sm:$0xff] }
 0x24a   : > { %4621 = vmatpush1.bf16.msra.mxu0 %v4620_v63  ;;  %v3335_v18 = vld [vmem:[#allocation6 + $0x570] sm:$0xff]  ;;  %v4638_v3 = vpack.c.bf16 %v3208_v9, %v3206_v19  ;;  %v3340_v24 = vld [vmem:[#allocation6 + $0x598] sm:$0xff]  ;;  %v3210_v39 = vld [vmem:[#allocation6 + $0x188] sm:$0xff] }
 0x24b   : > { %4623 = vmatprep.subr.bf16.mxu0 %v4622_v34  ;;  %v3207_v10 = vld [vmem:[#allocation6 + $0x170] sm:$0xff]  ;;  %v4512_v21 = vpack.c.bf16 %v3335_v18, %v3333_v43  ;;  %v3212_v46 = vld [vmem:[#allocation6 + $0x198] sm:$0xff]  ;;  %v3342_v27 = vld [vmem:[#allocation6 + $0x5a8] sm:$0xff] }
 0x24c   : > { %4493 = vmatpush1.bf16.msra.mxu1 %v4492_v30  ;;  %v3205_v30 = vld [vmem:[#allocation6 + $0x160] sm:$0xff]  ;;  %v3339_v6 = vld [vmem:[#allocation6 + $0x590] sm:$0xff]  ;;  %v3216_v25 = vld [vmem:[#allocation6 + $0x1b8] sm:$0xff] }
 0x24d   : > { %4495 = vmatprep.subr.bf16.mxu1 %v4494_v56  ;;  %v3338_v56 = vld [vmem:[#allocation6 + $0x588] sm:$0xff]  ;;  %v4640_v40 = vpack.c.bf16 %v3207_v10, %v3205_v30  ;;  %v3211_v36 = vld [vmem:[#allocation6 + $0x190] sm:$0xff]  ;;  %v3220_v45 = vld [vmem:[#allocation6 + $0x1d8] sm:$0xff] }
 0x24e   : > { %4625 = vmatpush1.bf16.msra.mxu0 %v4624_v44  ;;  %v4514_v13 = vpack.c.bf16 %v3340_v24, %v3338_v56  ;;  %v4642_v44 = vpack.c.bf16 %v3212_v46, %v3210_v39  ;;  %v3343_v0 = vld [vmem:[#allocation6 + $0x5b0] sm:$0xff]  ;;  %v3346_v52 = vld [vmem:[#allocation6 + $0x5c8] sm:$0xff]  ;;  %v3345_v61 = vld [vmem:[#allocation6 + $0x5c0] sm:$0xff] }
 0x24f   : > { %4627 = vmatprep.subr.bf16.mxu0 %v4626_v17  ;;  %v3344_v17 = vld [vmem:[#allocation6 + $0x5b8] sm:$0xff]  ;;  %v3215_v31 = vld [vmem:[#allocation6 + $0x1b0] sm:$0xff]  ;;  %v3218_v1 = vld [vmem:[#allocation6 + $0x1c8] sm:$0xff] }
 0x250   : > { %4497 = vmatpush1.bf16.msra.mxu1 %v4496_v11  ;;  %v3337_v11 = vld [vmem:[#allocation6 + $0x580] sm:$0xff]  ;;  %v4518_v59 = vpack.c.bf16 %v3344_v17, %v3342_v27  ;;  %v3347_v26 = vld [vmem:[#allocation6 + $0x5d0] sm:$0xff]  ;;  %v4650_v51 = vpack.c.bf16 %v3220_v45, %v3218_v1  ;;  %v3350_v39 = vld [vmem:[#allocation6 + $0x5e8] sm:$0xff] }
 0x251   : > { %4499 = vmatprep.subr.bf16.mxu1 %v4498_v41  ;;  %v3209_v41 = vld [vmem:[#allocation6 + $0x180] sm:$0xff]  ;;  %v4516_v55 = vpack.c.bf16 %v3339_v6, %v3337_v11  ;;  %v3219_v15 = vld [vmem:[#allocation6 + $0x1d0] sm:$0xff]  ;;  %v3222_v46 = vld [vmem:[#allocation6 + $0x1e8] sm:$0xff] }
 0x252   : > { %4629 = vmatpush1.bf16.msra.mxu0 %v4628_v54  ;;  %v4644_v37 = vpack.c.bf16 %v3211_v36, %v3209_v41  ;;  %v4646_v54 = vpack.c.bf16 %v3216_v25, %v3214_v23  ;;  %v3224_v6 = vld [vmem:[#allocation6 + $0x1f8] sm:$0xff]  ;;  %v3351_v41 = vld [vmem:[#allocation6 + $0x5f0] sm:$0xff]  ;;  %v3221_v23 = vld [vmem:[#allocation6 + $0x1e0] sm:$0xff] }
 0x253   : > { %4631 = vmatprep.subr.bf16.mxu0 %v4630_v60  ;;  %v3348_v60 = vld [vmem:[#allocation6 + $0x5d8] sm:$0xff]  ;;  %v3354_v25 = vld [vmem:[#allocation6 + $0x608] sm:$0xff]  ;;  %v4654_v1 = vpack.c.bf16 %v3224_v6, %v3222_v46 }
 0x254   : > { %4501 = vmatpush1.bf16.msra.mxu1 %v4500_v58  ;;  %v3341_v58 = vld [vmem:[#allocation6 + $0x5a0] sm:$0xff] }
 0x255   : > { %4503 = vmatprep.subr.bf16.mxu1 %v4502_v7  ;;  %v3213_v7 = vld [vmem:[#allocation6 + $0x1a0] sm:$0xff]  ;;  %v4520_v29 = vpack.c.bf16 %v3343_v0, %v3341_v58  ;;  %v3356_v0 = vld [vmem:[#allocation6 + $0x618] sm:$0xff] }
 0x256   : > { %4633 = vmatpush1.bf16.msra.mxu0 %v4632_v4  ;;  %v4648_v47 = vpack.c.bf16 %v3215_v31, %v3213_v7  ;;  %v4522_v4 = vpack.c.bf16 %v3348_v60, %v3346_v52  ;;  %v3228_v7 = vld [vmem:[#allocation6 + $0x218] sm:$0xff]  ;;  %v4530_v45 = vpack.c.bf16 %v3356_v0, %v3354_v25 }
 0x257   : > { %4635 = vmatprep.subr.bf16.mxu0 %v4634_v53 }
 0x258   : > { %4505 = vmatpush1.bf16.msra.mxu1 %v4504_v14 }
 0x259   : > { %4507 = vmatprep.subr.bf16.mxu1 %v4506_v33  ;;  %v3217_v33 = vld [vmem:[#allocation6 + $0x1c0] sm:$0xff] }
 0x25a   : > { %4637 = vmatpush1.bf16.msra.mxu0 %v4636_v57  ;;  %v4652_v9 = vpack.c.bf16 %v3219_v15, %v3217_v33 }
 0x25b   : > { %v7937_v22 = vpop.f32.mrb[8].mxu0  ;;  %4639 = vmatprep.subr.bf16.mxu0 %v4638_v3 }
 0x25c   : > { %5389 = vrcp.f32 %v7937_v22  ;;  %v7940_v63 = vpop.f32.mrb[9].mxu0  ;;  %4509 = vmatpush1.bf16.msra.mxu1 %v4508_v28  ;;  %v4524_v28 = vpack.c.bf16 %v3347_v26, %v3345_v61 }
 0x25d   : > { %v7942_v34 = vpop.f32.mrb[8].mxu1  ;;  %5391 = vrcp.f32 %v7940_v63  ;;  %4511 = vmatprep.subr.bf16.mxu1 %v4510_v32 }
 0x25e   : > { %5393 = vrcp.f32 %v7942_v34  ;;  %v7946_v48 = vpop.f32.mrb[9].mxu1  ;;  %4641 = vmatpush1.bf16.msra.mxu0 %v4640_v40 }
 0x25f   : > { %5395 = vrcp.f32 %v7946_v48  ;;  %4643 = vmatprep.subr.bf16.mxu0 %v4642_v44  ;;  %v3349_v44 = vld [vmem:[#allocation6 + $0x5e0] sm:$0xff] }
 0x260   : > { %4513 = vmatpush1.bf16.msra.mxu1 %v4512_v21  ;;  %v3352_v21 = vld [vmem:[#allocation6 + $0x5f8] sm:$0xff] }
 0x261   : > { %4515 = vmatprep.subr.bf16.mxu1 %v4514_v13 }
 0x262   : > { %4645 = vmatpush1.bf16.msra.mxu0 %v4644_v37 }
 0x263   : > { %4647 = vmatprep.subr.bf16.mxu0 %v4646_v54  ;;  %v3226_v54 = vld [vmem:[#allocation6 + $0x208] sm:$0xff] }
 0x264   : > { %4517 = vmatpush1.bf16.msra.mxu1 %v4516_v55  ;;  %v3223_v55 = vld [vmem:[#allocation6 + $0x1f0] sm:$0xff]  ;;  %v4658_v61 = vpack.c.bf16 %v3228_v7, %v3226_v54 }
 0x265   : > { %4519 = vmatprep.subr.bf16.mxu1 %v4518_v59 }
 0x266   : > { %v5390_v14 = vpop.eup %5389  ;;  %4649 = vmatpush1.bf16.msra.mxu0 %v4648_v47 }
 0x267   : > { %v5392_v12 = vpop.eup %5391  ;;  %v2981_v53 = vrot.slane %v5390_v14, 7  ;;  %v3077_v35 = vrot.slane %v5390_v14, 6  ;;  %4651 = vmatprep.subr.bf16.mxu0 %v4650_v51 }
 0x268   : > { %v5394_v50 = vpop.eup %5393  ;;  %v2982_v2 = vrot.slane %v5392_v12, 7  ;;  %v3078_v19 = vrot.slane %v5392_v12, 6  ;;  %4521 = vmatpush1.bf16.msra.mxu1 %v4520_v29  ;;  %v4528_v29 = vpack.c.bf16 %v3351_v41, %v3349_v44 }
 0x269   : > { %v5396_v57 = vpop.eup %5395  ;;  %v3045_v32 = vmul.f32 %v2981_v53, %v7937_v22  ;;  %v3141_v43 = vmul.f32 %v3077_v35, %v7937_v22  ;;  %v2991_v18 = vrot.slane %v5394_v50, 7  ;;  %v3087_v3 = vrot.slane %v5394_v50, 6  ;;  %4523 = vmatprep.subr.bf16.mxu1 %v4522_v4 }
 0x26a   : > { %v3046_v30 = vmul.f32 %v2982_v2, %v7940_v63  ;;  %v3142_v10 = vmul.f32 %v3078_v19, %v7940_v63  ;;  %v2992_v56 = vrot.slane %v5396_v57, 7  ;;  %v3088_v24 = vrot.slane %v5396_v57, 6  ;;  %4653 = vmatpush1.bf16.msra.mxu0 %v4652_v9 }
 0x26b   : > { %v3455_v40 = vrot.slane %v3141_v43, 7  ;;  %v3694_v13 = vrot.slane %v3045_v32, 6  ;;  %v3055_v11 = vmul.f32 %v2991_v18, %v7942_v34  ;;  %v3151_v22 = vmul.f32 %v3087_v3, %v7942_v34  ;;  %4655 = vmatprep.subr.bf16.mxu0 %v4654_v1 }
 0x26c   : > { %v3474_v36 = vrot.slane %v3142_v10, 7  ;;  %v3708_v27 = vrot.slane %v3046_v30, 6  ;;  %v3056_v63 = vmul.f32 %v2992_v56, %v7946_v48  ;;  %v3152_v17 = vmul.f32 %v3088_v24, %v7946_v48  ;;  %4525 = vmatpush1.bf16.msra.mxu1 %v4524_v28 }
 0x26d   : > { %v7959_v37 = vsel %vm3456_vm3, %v3455_v40, %v7907_v38  ;;  %v7963_v34 = vsel %vm3456_vm3, %v3694_v13, %v7915_v16  ;;  %v3492_v59 = vrot.slane %v3151_v22, 5  ;;  %v3726_v58 = vrot.slane %v3055_v11, 4 }
 0x26e   : > { %v3475_v48 = vsel %vm3456_vm3, %v3474_v36, %v7911_v8  ;;  %v3709_v31 = vsel %vm3456_vm3, %v3708_v27, %v7919_v49  ;;  %v3506_v52 = vrot.slane %v3152_v17, 5  ;;  %v3740_v60 = vrot.slane %v3056_v63, 4 }
 0x26f   : > { %v4526_v38 = vpack.c.bf16 %v3352_v21, %v3350_v39  ;;  %v4656_v16 = vpack.c.bf16 %v3223_v55, %v3221_v23  ;;  %v3493_v49 = vsel %vm3462_vm5, %v3492_v59, %v7923_v42  ;;  %v3727_v14 = vsel %vm3462_vm5, %v3726_v58, %v7927_v5 }
 0x270   : > { %v3507_v26 = vsel %vm3462_vm5, %v3506_v52, %v7931_v62  ;;  %v3741_v8 = vsel %vm3462_vm5, %v3740_v60, %v7935_v20 }
 0x271   : > { %4527 = vmatprep.subr.bf16.mxu1 %v4526_v38  ;;  %4657 = vmatpush1.bf16.msra.mxu0 %v4656_v16 }
 0x272   : > { %4529 = vmatpush1.bf16.msra.mxu1 %v4528_v29  ;;  %4659 = vmatprep.subr.bf16.mxu0 %v4658_v61 }
 0x273   : > { %4531 = vmatprep.subr.bf16.mxu1 %v4530_v45 }
 0x281   : > { %v2403_v47 = vpop.f32.mrb[10].mxu0 }
 0x282   : > { %5397 = vrcp.f32 %v2403_v47  ;;  %v2405_v4 = vpop.f32.mrb[11].mxu0 }
 0x283   : > { %v2758_v33 = vpop.f32.mrb[10].mxu1  ;;  %5399 = vrcp.f32 %v2405_v4 }
 0x284   : > { %5401 = vrcp.f32 %v2758_v33  ;;  %v2760_v62 = vpop.f32.mrb[11].mxu1 }
 0x285   : > { %5403 = vrcp.f32 %v2760_v62 }
 0x28c   : > { %v5398_v15 = vpop.eup %5397 }
 0x28d   : > { %v5400_v20 = vpop.eup %5399  ;;  %v2985_v12 = vrot.slane %v5398_v15, 7  ;;  %v3081_v53 = vrot.slane %v5398_v15, 6 }
 0x28e   : > { %v5402_v42 = vpop.eup %5401  ;;  %v2986_v35 = vrot.slane %v5400_v20, 7  ;;  %v3082_v51 = vrot.slane %v5400_v20, 6 }
 0x28f   : > { %v5404_v50 = vpop.eup %5403  ;;  %v3049_v5 = vmul.f32 %v2985_v12, %v2403_v47  ;;  %v3145_v2 = vmul.f32 %v3081_v53, %v2403_v47  ;;  %v2995_v19 = vrot.slane %v5402_v42, 7  ;;  %v3091_v28 = vrot.slane %v5402_v42, 6 }
 0x290   : > { %v3050_v9 = vmul.f32 %v2986_v35, %v2405_v4  ;;  %v3146_v57 = vmul.f32 %v3082_v51, %v2405_v4  ;;  %v2996_v32 = vrot.slane %v5404_v50, 7  ;;  %v3092_v43 = vrot.slane %v5404_v50, 6 }
 0x291   : > { %v3458_v18 = vrot.slane %v3145_v2, 6  ;;  %v3696_v3 = vrot.slane %v3049_v5, 5  ;;  %v3059_v30 = vmul.f32 %v2995_v19, %v2758_v33  ;;  %v3155_v10 = vmul.f32 %v3091_v28, %v2758_v33 }
 0x292   : > { %v3476_v56 = vrot.slane %v3146_v57, 6  ;;  %v3710_v24 = vrot.slane %v3050_v9, 5  ;;  %v3060_v39 = vmul.f32 %v2996_v32, %v2760_v62  ;;  %v3156_v21 = vmul.f32 %v3092_v43, %v2760_v62 }
 0x293   : > { %v3460_v46 = vsel %vm3459_vm4, %v3458_v18, %v7959_v37  ;;  %v3697_v40 = vsel %vm3459_vm4, %v3696_v3, %v7963_v34  ;;  %v3494_v13 = vrot.slane %v3155_v10, 4  ;;  %v3728_v11 = vrot.slane %v3059_v30, 3 }
 0x294   : > { %v3508_v22 = vrot.slane %v3156_v21, 4  ;;  %v3742_v6 = vrot.slane %v3060_v39, 3  ;;  %v3477_v44 = vsel %vm3459_vm4, %v3476_v56, %v3475_v48  ;;  %v3711_v41 = vsel %vm3459_vm4, %v3710_v24, %v3709_v31 }
 0x295   : > { %v3495_v63 = vsel %vm3465_vm6, %v3494_v13, %v3493_v49  ;;  %v3729_v17 = vsel %vm3465_vm6, %v3728_v11, %v3727_v14 }
 0x296   : > { %v3509_v36 = vsel %vm3465_vm6, %v3508_v22, %v3507_v26  ;;  %v3743_v27 = vsel %vm3465_vm6, %v3742_v6, %v3741_v8 }
 0x2ad   : > { %v2545_v23 = vpop.f32.mrb[12].mxu0 }
 0x2ae   : > { %5405 = vrcp.f32 %v2545_v23  ;;  %v2547_v55 = vpop.f32.mrb[13].mxu0 }
 0x2af   : > { %v2900_v25 = vpop.f32.mrb[12].mxu1  ;;  %5407 = vrcp.f32 %v2547_v55 }
 0x2b0   : > { %5409 = vrcp.f32 %v2900_v25  ;;  %v2902_v37 = vpop.f32.mrb[13].mxu1 }
 0x2b1   : > { %5411 = vrcp.f32 %v2902_v37 }
 0x2b8   : > { %v5406_v34 = vpop.eup %5405 }
 0x2b9   : > { %v5408_v59 = vpop.eup %5407  ;;  %v2989_v58 = vrot.slane %v5406_v34, 7  ;;  %v3085_v0 = vrot.slane %v5406_v34, 6 }
 0x2ba   : > { %v5410_v54 = vpop.eup %5409  ;;  %v2990_v7 = vrot.slane %v5408_v59, 7  ;;  %v3086_v48 = vrot.slane %v5408_v59, 6 }
 0x2bb   : > { %v5412_v31 = vpop.eup %5411  ;;  %v3053_v52 = vmul.f32 %v2989_v58, %v2545_v23  ;;  %v3149_v60 = vmul.f32 %v3085_v0, %v2545_v23  ;;  %v2999_v38 = vrot.slane %v5410_v54, 7  ;;  %v3095_v1 = vrot.slane %v5410_v54, 6  ;;  %v3353_v58 = vld [vmem:[#allocation6 + $0x600] sm:$0xff] }
 0x2bc   : > { %v3054_v29 = vmul.f32 %v2990_v7, %v2547_v55  ;;  %v3150_v16 = vmul.f32 %v3086_v48, %v2547_v55  ;;  %v3000_v45 = vrot.slane %v5412_v31, 7  ;;  %v3096_v61 = vrot.slane %v5412_v31, 6  ;;  %v3355_v7 = vld [vmem:[#allocation6 + $0x610] sm:$0xff]  ;;  %v3225_v48 = vld [vmem:[#allocation6 + $0x200] sm:$0xff] }
 0x2bd   : > { %v3461_v26 = vrot.slane %v3149_v60, 5  ;;  %v3698_v8 = vrot.slane %v3053_v52, 4  ;;  %v3063_v49 = vmul.f32 %v2999_v38, %v2900_v25  ;;  %v3159_v14 = vmul.f32 %v3095_v1, %v2900_v25  ;;  %v3227_v31 = vld [vmem:[#allocation6 + $0x210] sm:$0xff]  ;;  %v3358_v38 = vld [vmem:[#allocation6 + $0x628] sm:$0xff] }
 0x2be   : > { %v3478_v47 = vrot.slane %v3150_v16, 5  ;;  %v3712_v4 = vrot.slane %v3054_v29, 4  ;;  %v3064_v33 = vmul.f32 %v3000_v45, %v2902_v37  ;;  %v3160_v62 = vmul.f32 %v3096_v61, %v2902_v37  ;;  %v3360_v16 = vld [vmem:[#allocation6 + $0x638] sm:$0xff]  ;;  %v3230_v45 = vld [vmem:[#allocation6 + $0x228] sm:$0xff] }
 0x2bf   : > { %v3496_v15 = vrot.slane %v3159_v14, 3  ;;  %v3730_v20 = vrot.slane %v3063_v49, 2  ;;  %v3463_v12 = vsel %vm3462_vm5, %v3461_v26, %v3460_v46  ;;  %v3699_v53 = vsel %vm3462_vm5, %v3698_v8, %v3697_v40  ;;  %v3232_v61 = vld [vmem:[#allocation6 + $0x238] sm:$0xff] }
 0x2c0   : > { %v3510_v42 = vrot.slane %v3160_v62, 3  ;;  %v3744_v35 = vrot.slane %v3064_v33, 2  ;;  %v3479_v51 = vsel %vm3462_vm5, %v3478_v47, %v3477_v44  ;;  %v3713_v50 = vsel %vm3462_vm5, %v3712_v4, %v3711_v41  ;;  %v3357_v47 = vld [vmem:[#allocation6 + $0x620] sm:$0xff]  ;;  %v3359_v4 = vld [vmem:[#allocation6 + $0x630] sm:$0xff] }
 0x2c1   : > { %v7992_v5 = vsel %vm3468_vm7, %v3496_v15, %v3495_v63  ;;  %v7995_v2 = vsel %vm3468_vm7, %v3730_v20, %v3729_v17  ;;  %v4532_v8 = vpack.c.bf16 %v3355_v7, %v3353_v58  ;;  %v4660_v14 = vpack.c.bf16 %v3227_v31, %v3225_v48  ;;  %v3229_v15 = vld [vmem:[#allocation6 + $0x220] sm:$0xff]  ;;  %v3231_v20 = vld [vmem:[#allocation6 + $0x230] sm:$0xff]  ;;  %v3374_v58 = vld [vmem:[#allocation6 + $0x6a8] sm:$0xff] }
 0x2c2   : > { %v7998_v19 = vsel %vm3468_vm7, %v3510_v42, %v3509_v36  ;;  %v8001_v28 = vsel %vm3468_vm7, %v3744_v35, %v3743_v27  ;;  %v4662_v42 = vpack.c.bf16 %v3232_v61, %v3230_v45  ;;  %v3364_v35 = vld [vmem:[#allocation6 + $0x658] sm:$0xff]  ;;  %v3378_v45 = vld [vmem:[#allocation6 + $0x6c8] sm:$0xff] }
 0x2c3   : > { %v3248_v7 = vld [vmem:[#allocation6 + $0x2b8] sm:$0xff] }
 0x2c4   : > { %v3380_v61 = vld [vmem:[#allocation6 + $0x6d8] sm:$0xff] }
 0x2c8   : > { %v2687_v9 = vpop.f32.mrb[14].mxu0 }
 0x2c9   : > { %5413 = vrcp.f32 %v2687_v9  ;;  %v2689_v57 = vpop.f32.mrb[15].mxu0 }
 0x2ca   : > { %5415 = vrcp.f32 %v2689_v57 }
 0x2d3   : > { %v5414_v32 = vpop.eup %5413 }
 0x2d4   : > { %v5416_v43 = vpop.eup %5415  ;;  %v2993_v18 = vrot.slane %v5414_v32, 7  ;;  %v3089_v3 = vrot.slane %v5414_v32, 6  ;;  %v3361_v32 = vld [vmem:[#allocation6 + $0x640] sm:$0xff] }
 0x2d5   : > { %v2994_v30 = vrot.slane %v5416_v43, 7  ;;  %v3090_v10 = vrot.slane %v5416_v43, 6  ;;  %v3363_v43 = vld [vmem:[#allocation6 + $0x650] sm:$0xff] }
 0x2d6   : > { %v3057_v56 = vmul.f32 %v2993_v18, %v2687_v9  ;;  %v3153_v24 = vmul.f32 %v3089_v3, %v2687_v9  ;;  %v4536_v9 = vpack.c.bf16 %v3359_v4, %v3357_v47  ;;  %v3377_v47 = vld [vmem:[#allocation6 + $0x6c0] sm:$0xff]  ;;  %v3379_v4 = vld [vmem:[#allocation6 + $0x6d0] sm:$0xff] }
 0x2d7   : > { %v3058_v39 = vmul.f32 %v2994_v30, %v2689_v57  ;;  %v3154_v21 = vmul.f32 %v3090_v10, %v2689_v57  ;;  %v4664_v57 = vpack.c.bf16 %v3231_v20, %v3229_v15  ;;  %v3233_v30 = vld [vmem:[#allocation6 + $0x240] sm:$0xff]  ;;  %v3235_v10 = vld [vmem:[#allocation6 + $0x250] sm:$0xff] }
 0x2d8   : > { %v3464_v46 = vrot.slane %v3153_v24, 4  ;;  %v3700_v40 = vrot.slane %v3057_v56, 3  ;;  %v3366_v56 = vld [vmem:[#allocation6 + $0x668] sm:$0xff]  ;;  %v3368_v24 = vld [vmem:[#allocation6 + $0x678] sm:$0xff]  ;;  %v3249_v15 = vld [vmem:[#allocation6 + $0x2c0] sm:$0xff] }
 0x2d9   : > { %v3480_v13 = vrot.slane %v3154_v21, 4  ;;  %v3714_v11 = vrot.slane %v3058_v39, 3  ;;  %v3238_v39 = vld [vmem:[#allocation6 + $0x268] sm:$0xff]  ;;  %v3240_v21 = vld [vmem:[#allocation6 + $0x278] sm:$0xff]  ;;  %v3251_v20 = vld [vmem:[#allocation6 + $0x2d0] sm:$0xff] }
 0x2da   : > { %v3466_v22 = vsel %vm3465_vm6, %v3464_v46, %v3463_v12  ;;  %v3701_v6 = vsel %vm3465_vm6, %v3700_v40, %v3699_v53  ;;  %v2829_v44 = vpop.f32.mrb[16].mxu0  ;;  %v3362_v12 = vld [vmem:[#allocation6 + $0x648] sm:$0xff]  ;;  %v4534_v53 = vpack.c.bf16 %v3360_v16, %v3358_v38  ;;  %v4540_v46 = vpack.c.bf16 %v3363_v43, %v3361_v32  ;;  %v3247_v16 = vld [vmem:[#allocation6 + $0x2b0] sm:$0xff] }
 0x2db   : > { %v3481_v41 = vsel %vm3465_vm6, %v3480_v13, %v3479_v51  ;;  %v3715_v36 = vsel %vm3465_vm6, %v3714_v11, %v3713_v50  ;;  %5417 = vrcp.f32 %v2829_v44  ;;  %v2831_v27 = vpop.f32.mrb[17].mxu0  ;;  %v3234_v51 = vld [vmem:[#allocation6 + $0x248] sm:$0xff]  ;;  %v3236_v50 = vld [vmem:[#allocation6 + $0x258] sm:$0xff]  ;;  %v4538_v18 = vpack.c.bf16 %v3364_v35, %v3362_v12  ;;  %v3365_v13 = vld [vmem:[#allocation6 + $0x660] sm:$0xff] }
 0x2dc   : > { %5419 = vrcp.f32 %v2831_v27  ;;  %v4666_v3 = vpack.c.bf16 %v3236_v50, %v3234_v51  ;;  %v4668_v40 = vpack.c.bf16 %v3235_v10, %v3233_v30  ;;  %v3367_v11 = vld [vmem:[#allocation6 + $0x670] sm:$0xff]  ;;  %v3382_v12 = vld [vmem:[#allocation6 + $0x6e8] sm:$0xff]  ;;  %v3256_v35 = vld [vmem:[#allocation6 + $0x2f8] sm:$0xff]  ;;  %v4556_v51 = vpack.c.bf16 %v3379_v4, %v3377_v47 }
 0x2dd   : > { %v4684_v50 = vpack.c.bf16 %v3251_v20, %v3249_v15  ;;  %v3386_v30 = vld [vmem:[#allocation6 + $0x708] sm:$0xff]  ;;  %v3388_v10 = vld [vmem:[#allocation6 + $0x718] sm:$0xff] }
 0x2de   : > { %v3402_v15 = vld [vmem:[#allocation6 + $0x788] sm:$0xff]  ;;  %v3404_v20 = vld [vmem:[#allocation6 + $0x798] sm:$0xff] }
 0x2e5   : > { %v5418_v63 = vpop.eup %5417 }
 0x2e6   : > { %v5420_v17 = vpop.eup %5419  ;;  %v2997_v23 = vrot.slane %v5418_v63, 7  ;;  %v3093_v55 = vrot.slane %v5418_v63, 6  ;;  %v4544_v63 = vpack.c.bf16 %v3367_v11, %v3365_v13  ;;  %v4562_v13 = vpack.c.bf16 %v3388_v10, %v3386_v30  ;;  %v3278_v30 = vld [vmem:[#allocation6 + $0x3a8] sm:$0xff]  ;;  %v3280_v10 = vld [vmem:[#allocation6 + $0x3b8] sm:$0xff] }
 0x2e7   : > { %v2998_v25 = vrot.slane %v5420_v17, 7  ;;  %v3094_v37 = vrot.slane %v5420_v17, 6 }
 0x2e8   : > { %v3061_v34 = vmul.f32 %v2997_v23, %v2829_v44  ;;  %v3157_v59 = vmul.f32 %v3093_v55, %v2829_v44  ;;  %v3370_v44 = vld [vmem:[#allocation6 + $0x688] sm:$0xff]  ;;  %v3369_v23 = vld [vmem:[#allocation6 + $0x680] sm:$0xff]  ;;  %v3371_v55 = vld [vmem:[#allocation6 + $0x690] sm:$0xff] }
 0x2e9   : > { %v3062_v0 = vmul.f32 %v2998_v25, %v2831_v27  ;;  %v3158_v54 = vmul.f32 %v3094_v37, %v2831_v27  ;;  %v3244_v27 = vld [vmem:[#allocation6 + $0x298] sm:$0xff]  ;;  %v4548_v48 = vpack.c.bf16 %v3371_v55, %v3369_v23 }
 0x2ea   : > { %v3467_v52 = vrot.slane %v3157_v59, 3  ;;  %v3702_v60 = vrot.slane %v3061_v34, 2  ;;  %v3241_v34 = vld [vmem:[#allocation6 + $0x280] sm:$0xff]  ;;  %v3243_v59 = vld [vmem:[#allocation6 + $0x290] sm:$0xff] }
 0x2eb   : > { %v3482_v1 = vrot.slane %v3158_v54, 3  ;;  %v3716_v29 = vrot.slane %v3062_v0, 2  ;;  %v3376_v0 = vld [vmem:[#allocation6 + $0x6b8] sm:$0xff]  ;;  %v3246_v54 = vld [vmem:[#allocation6 + $0x2a8] sm:$0xff]  ;;  %v4676_v31 = vpack.c.bf16 %v3243_v59, %v3241_v34 }
 0x2ec   : > { %v3469_v26 = vsel %vm3468_vm7, %v3467_v52, %v3466_v22  ;;  %v3703_v49 = vsel %vm3468_vm7, %v3702_v60, %v3701_v6  ;;  %v3237_v22 = vld [vmem:[#allocation6 + $0x260] sm:$0xff]  ;;  %v3239_v6 = vld [vmem:[#allocation6 + $0x270] sm:$0xff]  ;;  %v4550_v38 = vpack.c.bf16 %v3376_v0, %v3374_v58  ;;  %v3394_v34 = vld [vmem:[#allocation6 + $0x748] sm:$0xff] }
 0x2ed   : > { %v3483_v33 = vsel %vm3468_vm7, %v3482_v1, %v3481_v41  ;;  %v3717_v62 = vsel %vm3468_vm7, %v3716_v29, %v3715_v36  ;;  %v3372_v41 = vld [vmem:[#allocation6 + $0x698] sm:$0xff]  ;;  %v3242_v36 = vld [vmem:[#allocation6 + $0x288] sm:$0xff]  ;;  %v4672_v17 = vpack.c.bf16 %v3239_v6, %v3237_v22  ;;  %v3373_v52 = vld [vmem:[#allocation6 + $0x6a0] sm:$0xff]  ;;  %v4678_v1 = vpack.c.bf16 %v3248_v7, %v3246_v54 }
 0x2ee   : > { %3580 = vmatprep.mubr.f32.mxu1 %v3483_v33  ;;  %3814 = vmatprep.mubr.f32.mxu0 %v3717_v62  ;;  %v4546_v25 = vpack.c.bf16 %v3372_v41, %v3370_v44  ;;  %v4674_v37 = vpack.c.bf16 %v3244_v27, %v3242_v36  ;;  %v3375_v60 = vld [vmem:[#allocation6 + $0x6b0] sm:$0xff]  ;;  %v3245_v29 = vld [vmem:[#allocation6 + $0x2a0] sm:$0xff]  ;;  %v4554_v33 = vpack.c.bf16 %v3380_v61, %v3378_v45  ;;  %v3390_v22 = vld [vmem:[#allocation6 + $0x728] sm:$0xff] }
 0x2ef   : > { %3581 = vmatmul.mubr.f32.vlgmr.msra.gmra.mrb[14].mxu1 %v3469_v26  ;;  %3815 = vmatmul.mubr.f32.vlgmr.msra.gmra.mrb[18].mxu0 %v3703_v49  ;;  %v3250_v26 = vld [vmem:[#allocation6 + $0x2c8] sm:$0xff]  ;;  %v4552_v49 = vpack.c.bf16 %v3375_v60, %v3373_v52  ;;  %v3392_v6 = vld [vmem:[#allocation6 + $0x738] sm:$0xff] }
 0x2f0   : > { %4533 = vmatpush1.bf16.msra.mxu1 %v4532_v8  ;;  %4661 = vmatpush1.bf16.msra.mxu0 %v4660_v14  ;;  %v3252_v8 = vld [vmem:[#allocation6 + $0x2d8] sm:$0xff]  ;;  %v4680_v14 = vpack.c.bf16 %v3247_v16, %v3245_v29  ;;  %v3262_v44 = vld [vmem:[#allocation6 + $0x328] sm:$0xff]  ;;  %v4566_v23 = vpack.c.bf16 %v3392_v6, %v3390_v22 }
 0x2f1   : > { %3651 = vmatprep.mubr.f32.mxu1 %v7998_v19  ;;  %3885 = vmatprep.mubr.f32.mxu0 %v8001_v28  ;;  %v4542_v19 = vpack.c.bf16 %v3368_v24, %v3366_v56  ;;  %v4670_v28 = vpack.c.bf16 %v3240_v21, %v3238_v39  ;;  %v4682_v62 = vpack.c.bf16 %v3252_v8, %v3250_v26  ;;  %v3258_v56 = vld [vmem:[#allocation6 + $0x308] sm:$0xff]  ;;  %v3260_v24 = vld [vmem:[#allocation6 + $0x318] sm:$0xff] }
 0x2f2   : > { %4535 = vmatprep.subr.bf16.mxu1 %v4534_v53  ;;  %4663 = vmatprep.subr.bf16.mxu0 %v4662_v42  ;;  %v3384_v53 = vld [vmem:[#allocation6 + $0x6f8] sm:$0xff]  ;;  %v3254_v42 = vld [vmem:[#allocation6 + $0x2e8] sm:$0xff]  ;;  %v4690_v11 = vpack.c.bf16 %v3260_v24, %v3258_v56 }
 0x2f3   : > { %v4558_v32 = vpack.c.bf16 %v3384_v53, %v3382_v12  ;;  %v4686_v43 = vpack.c.bf16 %v3256_v35, %v3254_v42  ;;  %v3264_v41 = vld [vmem:[#allocation6 + $0x338] sm:$0xff]  ;;  %v3266_v58 = vld [vmem:[#allocation6 + $0x348] sm:$0xff] }
 0x2f4   : > { %4537 = vmatpush1.bf16.msra.mxu1 %v4536_v9  ;;  %4665 = vmatpush1.bf16.msra.mxu0 %v4664_v57  ;;  %v3381_v9 = vld [vmem:[#allocation6 + $0x6e0] sm:$0xff]  ;;  %v3383_v57 = vld [vmem:[#allocation6 + $0x6f0] sm:$0xff]  ;;  %v4694_v55 = vpack.c.bf16 %v3264_v41, %v3262_v44  ;;  %v3396_v59 = vld [vmem:[#allocation6 + $0x758] sm:$0xff] }
 0x2f5   : > { %4539 = vmatprep.subr.bf16.mxu1 %v4538_v18  ;;  %4667 = vmatprep.subr.bf16.mxu0 %v4666_v3  ;;  %v3253_v18 = vld [vmem:[#allocation6 + $0x2e0] sm:$0xff]  ;;  %v3255_v3 = vld [vmem:[#allocation6 + $0x2f0] sm:$0xff]  ;;  %v4560_v39 = vpack.c.bf16 %v3383_v57, %v3381_v9  ;;  %v3268_v0 = vld [vmem:[#allocation6 + $0x358] sm:$0xff]  ;;  %v4570_v52 = vpack.c.bf16 %v3396_v59, %v3394_v34  ;;  %v4578_v9 = vpack.c.bf16 %v3404_v20, %v3402_v15 }
 0x2f6   : > { %v4688_v21 = vpack.c.bf16 %v3255_v3, %v3253_v18  ;;  %v4698_v60 = vpack.c.bf16 %v3268_v0, %v3266_v58  ;;  %v3398_v29 = vld [vmem:[#allocation6 + $0x768] sm:$0xff]  ;;  %v3400_v16 = vld [vmem:[#allocation6 + $0x778] sm:$0xff]  ;;  %v3929_v15 = vld [vmem:[%s8135_s4 + $0xa8] sm:$0xff] }
 0x2f7   : > { %v3270_v45 = vld [vmem:[#allocation6 + $0x368] sm:$0xff]  ;;  %v3272_v61 = vld [vmem:[#allocation6 + $0x378] sm:$0xff]  ;;  %v4574_v47 = vpack.c.bf16 %v3400_v16, %v3398_v29 }
 0x2f8   : > { %4541 = vmatpush1.bf16.msra.mxu1 %v4540_v46  ;;  %4669 = vmatpush1.bf16.msra.mxu0 %v4668_v40  ;;  %v3385_v46 = vld [vmem:[#allocation6 + $0x700] sm:$0xff]  ;;  %v3387_v40 = vld [vmem:[#allocation6 + $0x710] sm:$0xff]  ;;  %v4702_v4 = vpack.c.bf16 %v3272_v61, %v3270_v45  ;;  %v3274_v12 = vld [vmem:[#allocation6 + $0x388] sm:$0xff] }
 0x2f9   : > { %4543 = vmatprep.subr.bf16.mxu1 %v4542_v19  ;;  %4671 = vmatprep.subr.bf16.mxu0 %v4670_v28  ;;  %v3257_v19 = vld [vmem:[#allocation6 + $0x300] sm:$0xff]  ;;  %v3259_v28 = vld [vmem:[#allocation6 + $0x310] sm:$0xff]  ;;  %v4564_v36 = vpack.c.bf16 %v3387_v40, %v3385_v46  ;;  %v3276_v53 = vld [vmem:[#allocation6 + $0x398] sm:$0xff]  ;;  %v4710_v40 = vpack.c.bf16 %v3280_v10, %v3278_v30 }
 0x2fa   : > { %v4692_v27 = vpack.c.bf16 %v3259_v28, %v3257_v19  ;;  %v4706_v57 = vpack.c.bf16 %v3276_v53, %v3274_v12  ;;  %v3406_v18 = vld [vmem:[#allocation6 + $0x7a8] sm:$0xff]  ;;  %v3408_v3 = vld [vmem:[#allocation6 + $0x7b8] sm:$0xff]  ;;  %v3917_v30 = vld [vmem:[%s8135_s4 + $0x48] sm:$0xff] }
 0x2fb   : > { %v4582_v46 = vpack.c.bf16 %v3408_v3, %v3406_v18  ;;  %v3410_v19 = vld [vmem:[#allocation6 + $0x7c8] sm:$0xff]  ;;  %v3412_v28 = vld [vmem:[#allocation6 + $0x7d8] sm:$0xff] }
 0x2fc   : > { %4545 = vmatpush1.bf16.msra.mxu1 %v4544_v63  ;;  %4673 = vmatpush1.bf16.msra.mxu0 %v4672_v17  ;;  %v3389_v63 = vld [vmem:[#allocation6 + $0x720] sm:$0xff]  ;;  %v3391_v17 = vld [vmem:[#allocation6 + $0x730] sm:$0xff]  ;;  %v3282_v22 = vld [vmem:[#allocation6 + $0x3c8] sm:$0xff] }
 0x2fd   : > { %4547 = vmatprep.subr.bf16.mxu1 %v4546_v25  ;;  %4675 = vmatprep.subr.bf16.mxu0 %v4674_v37  ;;  %v3261_v25 = vld [vmem:[#allocation6 + $0x320] sm:$0xff]  ;;  %v3263_v37 = vld [vmem:[#allocation6 + $0x330] sm:$0xff]  ;;  %v4568_v54 = vpack.c.bf16 %v3391_v17, %v3389_v63  ;;  %v3284_v6 = vld [vmem:[#allocation6 + $0x3d8] sm:$0xff]  ;;  %v4586_v63 = vpack.c.bf16 %v3412_v28, %v3410_v19 }
 0x2fe   : > { %v4696_v7 = vpack.c.bf16 %v3263_v37, %v3261_v25  ;;  %v4714_v17 = vpack.c.bf16 %v3284_v6, %v3282_v22  ;;  %v3414_v25 = vld [vmem:[#allocation6 + $0x7e8] sm:$0xff]  ;;  %v3416_v37 = vld [vmem:[#allocation6 + $0x7f8] sm:$0xff]  ;;  %v3921_v22 = vld [vmem:[%s8135_s4 + $0x68] sm:$0xff] }
 0x2ff   : > { %v3286_v34 = vld [vmem:[#allocation6 + $0x3e8] sm:$0xff]  ;;  %v3288_v59 = vld [vmem:[#allocation6 + $0x3f8] sm:$0xff] }
 0x300   : > { %4549 = vmatpush1.bf16.msra.mxu1 %v4548_v48  ;;  %4677 = vmatpush1.bf16.msra.mxu0 %v4676_v31  ;;  %v3393_v48 = vld [vmem:[#allocation6 + $0x740] sm:$0xff]  ;;  %v3395_v31 = vld [vmem:[#allocation6 + $0x750] sm:$0xff]  ;;  %v3908_v61 = vld [vmem:[%s8135_s4] sm:$0xff] }
 0x301   : > { %4551 = vmatprep.subr.bf16.mxu1 %v4550_v38  ;;  %4679 = vmatprep.subr.bf16.mxu0 %v4678_v1  ;;  %v3265_v38 = vld [vmem:[#allocation6 + $0x340] sm:$0xff]  ;;  %v3267_v1 = vld [vmem:[#allocation6 + $0x350] sm:$0xff]  ;;  %v4572_v26 = vpack.c.bf16 %v3395_v31, %v3393_v48  ;;  %v4718_v48 = vpack.c.bf16 %v3288_v59, %v3286_v34  ;;  %v3912_v53 = vld [vmem:[%s8135_s4 + $0x20] sm:$0xff] }
 0x302   : > { %v4700_v8 = vpack.c.bf16 %v3267_v1, %v3265_v38  ;;  %v3415_v31 = vld [vmem:[#allocation6 + $0x7f0] sm:$0xff]  ;;  %v3924_v38 = vld [vmem:[%s8135_s4 + $0x80] sm:$0xff]  ;;  %v3925_v1 = vld [vmem:[%s8135_s4 + $0x88] sm:$0xff] }
 0x303   : > { %v4722_v45 = vpack.c.bf16 %v3925_v1, %v3924_v38  ;;  %v3916_v3 = vld [vmem:[%s8135_s4 + $0x40] sm:$0xff]  ;;  %v3934_v10 = vld [vmem:[%s8135_s4 + $0xd0] sm:$0xff] }
 0x304   : > { %4553 = vmatpush1.bf16.msra.mxu1 %v4552_v49  ;;  %4681 = vmatpush1.bf16.msra.mxu0 %v4680_v14  ;;  %v3397_v49 = vld [vmem:[#allocation6 + $0x760] sm:$0xff]  ;;  %v3399_v14 = vld [vmem:[#allocation6 + $0x770] sm:$0xff]  ;;  %v3920_v28 = vld [vmem:[%s8135_s4 + $0x60] sm:$0xff] }
 0x305   : > { %4555 = vmatprep.subr.bf16.mxu1 %v4554_v33  ;;  %4683 = vmatprep.subr.bf16.mxu0 %v4682_v62  ;;  %v3269_v33 = vld [vmem:[#allocation6 + $0x360] sm:$0xff]  ;;  %v3271_v62 = vld [vmem:[#allocation6 + $0x370] sm:$0xff]  ;;  %v4576_v42 = vpack.c.bf16 %v3399_v14, %v3397_v49  ;;  %v4748_v6 = vpack.c.bf16 %v3921_v22, %v3920_v28 }
 0x306   : > { %v4704_v35 = vpack.c.bf16 %v3271_v62, %v3269_v33  ;;  %v3927_v49 = vld [vmem:[%s8135_s4 + $0x98] sm:$0xff]  ;;  %v3928_v62 = vld [vmem:[%s8135_s4 + $0xa0] sm:$0xff] }
 0x307   : > { %v3911_v33 = vld [vmem:[%s8135_s4 + $0x18] sm:$0xff]  ;;  %v4730_v12 = vpack.c.bf16 %v3929_v15, %v3928_v62 }
 0x308   : > { %4557 = vmatpush1.bf16.msra.mxu1 %v4556_v51  ;;  %4685 = vmatpush1.bf16.msra.mxu0 %v4684_v50  ;;  %v3401_v51 = vld [vmem:[#allocation6 + $0x780] sm:$0xff]  ;;  %v3403_v50 = vld [vmem:[#allocation6 + $0x790] sm:$0xff] }
 0x309   : > { %4559 = vmatprep.subr.bf16.mxu1 %v4558_v32  ;;  %4687 = vmatprep.subr.bf16.mxu0 %v4686_v43  ;;  %v3273_v32 = vld [vmem:[#allocation6 + $0x380] sm:$0xff]  ;;  %v3275_v43 = vld [vmem:[#allocation6 + $0x390] sm:$0xff]  ;;  %v4580_v56 = vpack.c.bf16 %v3403_v50, %v3401_v51  ;;  %v3914_v50 = vld [vmem:[%s8135_s4 + $0x30] sm:$0xff] }
 0x30a   : > { %v4708_v24 = vpack.c.bf16 %v3275_v43, %v3273_v32  ;;  %v3933_v32 = vld [vmem:[%s8135_s4 + $0xc8] sm:$0xff] }
 0x30c   : > { %4561 = vmatpush1.bf16.msra.mxu1 %v4560_v39  ;;  %4689 = vmatpush1.bf16.msra.mxu0 %v4688_v21  ;;  %v3405_v39 = vld [vmem:[#allocation6 + $0x7a0] sm:$0xff]  ;;  %v3407_v21 = vld [vmem:[#allocation6 + $0x7b0] sm:$0xff] }
 0x30d   : > { %4563 = vmatprep.subr.bf16.mxu1 %v4562_v13  ;;  %4691 = vmatprep.subr.bf16.mxu0 %v4690_v11  ;;  %v3277_v13 = vld [vmem:[#allocation6 + $0x3a0] sm:$0xff]  ;;  %v3279_v11 = vld [vmem:[#allocation6 + $0x3b0] sm:$0xff]  ;;  %v4584_v44 = vpack.c.bf16 %v3407_v21, %v3405_v39  ;;  %v3918_v21 = vld [vmem:[%s8135_s4 + $0x50] sm:$0xff] }
 0x30e   : > { %v4712_v41 = vpack.c.bf16 %v3279_v11, %v3277_v13  ;;  %v3936_v13 = vld [vmem:[%s8135_s4 + $0xe0] sm:$0xff]  ;;  %v3937_v11 = vld [vmem:[%s8135_s4 + $0xe8] sm:$0xff] }
 0x30f   : > { %v4746_v19 = vpack.c.bf16 %v3937_v11, %v3936_v13 }
 0x310   : > { %4565 = vmatpush1.bf16.msra.mxu1 %v4564_v36  ;;  %4693 = vmatpush1.bf16.msra.mxu0 %v4692_v27  ;;  %v3409_v36 = vld [vmem:[#allocation6 + $0x7c0] sm:$0xff]  ;;  %v3411_v27 = vld [vmem:[#allocation6 + $0x7d0] sm:$0xff] }
 0x311   : > { %4567 = vmatprep.subr.bf16.mxu1 %v4566_v23  ;;  %4695 = vmatprep.subr.bf16.mxu0 %v4694_v55  ;;  %v3281_v23 = vld [vmem:[#allocation6 + $0x3c0] sm:$0xff]  ;;  %v3283_v55 = vld [vmem:[#allocation6 + $0x3d0] sm:$0xff]  ;;  %v4588_v58 = vpack.c.bf16 %v3411_v27, %v3409_v36  ;;  %v3922_v27 = vld [vmem:[%s8135_s4 + $0x70] sm:$0xff] }
 0x312   : > { %v4716_v0 = vpack.c.bf16 %v3283_v55, %v3281_v23  ;;  %v3894_v23 = vlaneseq }
 0x314   : > { %4569 = vmatpush1.bf16.msra.mxu1 %v4568_v54  ;;  %4697 = vmatpush1.bf16.msra.mxu0 %v4696_v7  ;;  %v3413_v54 = vld [vmem:[#allocation6 + $0x7e0] sm:$0xff]  ;;  %v4590_v7 = vpack.c.bf16 %v3416_v37, %v3414_v25  ;;  %v3895_v55 = vshrl.u32 %v3894_v23, 7 }
 0x315   : > { %4571 = vmatprep.subr.bf16.mxu1 %v4570_v52  ;;  %4699 = vmatprep.subr.bf16.mxu0 %v4698_v60  ;;  %v3285_v52 = vld [vmem:[#allocation6 + $0x3e0] sm:$0xff]  ;;  %v3287_v60 = vld [vmem:[#allocation6 + $0x3f0] sm:$0xff]  ;;  %v4592_v29 = vpack.c.bf16 %v3415_v31, %v3413_v54 }
 0x316   : > { %v4720_v16 = vpack.c.bf16 %v3287_v60, %v3285_v52  ;;  %v3896_v25 = vsub.s32 0, %v3895_v55  ;;  %v3892_v37 = vld [vmem:[#allocation7] sm:$0x3]  ;;  %v3900_v34 = vsub.s32 1, %v3895_v55 }
 0x318   : > { %4573 = vmatpush1.bf16.msra.mxu1 %v4572_v26  ;;  %4701 = vmatpush1.bf16.msra.mxu0 %v4700_v8  ;;  %v3909_v26 = vld [vmem:[%s8135_s4 + $0x8] sm:$0xff]  ;;  %v3926_v8 = vld [vmem:[%s8135_s4 + $0x90] sm:$0xff]  ;;  %v3897_v59 = vrot.slane %v3892_v37, %v3896_v25  ;;  %v3901_v54 = vrot.slane %v3892_v37, %v3900_v34 }
 0x319   : > { %4575 = vmatprep.subr.bf16.mxu1 %v4574_v47  ;;  %4703 = vmatprep.subr.bf16.mxu0 %v4702_v4  ;;  %v4724_v14 = vpack.c.bf16 %v3909_v26, %v3908_v61  ;;  %v4726_v47 = vpack.c.bf16 %v3927_v49, %v3926_v8  ;;  %v3910_v4 = vld [vmem:[%s8135_s4 + $0x10] sm:$0xff] }
 0x31a   : > { %v4728_v20 = vpack.c.bf16 %v3911_v33, %v3910_v4 }
 0x31c   : > { %4577 = vmatpush1.bf16.msra.mxu1 %v4576_v42  ;;  %4705 = vmatpush1.bf16.msra.mxu0 %v4704_v35  ;;  %v3913_v42 = vld [vmem:[%s8135_s4 + $0x28] sm:$0xff]  ;;  %v3930_v35 = vld [vmem:[%s8135_s4 + $0xb0] sm:$0xff] }
 0x31d   : > { %4579 = vmatprep.subr.bf16.mxu1 %v4578_v9  ;;  %4707 = vmatprep.subr.bf16.mxu0 %v4706_v57  ;;  %v3915_v9 = vld [vmem:[%s8135_s4 + $0x38] sm:$0xff]  ;;  %v3932_v57 = vld [vmem:[%s8135_s4 + $0xc0] sm:$0xff] }
 0x31e   : > { %v4736_v43 = vpack.c.bf16 %v3915_v9, %v3914_v50  ;;  %v4738_v18 = vpack.c.bf16 %v3933_v32, %v3932_v57 }
 0x320   : > { %4581 = vmatpush1.bf16.msra.mxu1 %v4580_v56  ;;  %4709 = vmatpush1.bf16.msra.mxu0 %v4708_v24  ;;  %v3935_v56 = vld [vmem:[%s8135_s4 + $0xd8] sm:$0xff]  ;;  %v4740_v24 = vpack.c.bf16 %v3917_v30, %v3916_v3 }
 0x321   : > { %4583 = vmatprep.subr.bf16.mxu1 %v4582_v46  ;;  %4711 = vmatprep.subr.bf16.mxu0 %v4710_v40  ;;  %v4742_v39 = vpack.c.bf16 %v3935_v56, %v3934_v10  ;;  %v3919_v46 = vld [vmem:[%s8135_s4 + $0x58] sm:$0xff] }
 0x322   : > { %v4744_v40 = vpack.c.bf16 %v3919_v46, %v3918_v21 }
 0x324   : > { %4585 = vmatpush1.bf16.msra.mxu1 %v4584_v44  ;;  %4713 = vmatpush1.bf16.msra.mxu0 %v4712_v41  ;;  %v3938_v44 = vld [vmem:[%s8135_s4 + $0xf0] sm:$0xff]  ;;  %v3939_v41 = vld [vmem:[%s8135_s4 + $0xf8] sm:$0xff] }
 0x325   : > { %4587 = vmatprep.subr.bf16.mxu1 %v4586_v63  ;;  %4715 = vmatprep.subr.bf16.mxu0 %v4714_v17  ;;  %v4750_v36 = vpack.c.bf16 %v3939_v41, %v3938_v44  ;;  %v3923_v63 = vld [vmem:[%s8135_s4 + $0x78] sm:$0xff] }
 0x326   : > { %v4752_v17 = vpack.c.bf16 %v3923_v63, %v3922_v27 }
 0x328   : > { %4589 = vmatpush1.bf16.msra.mxu1 %v4588_v58  ;;  %4717 = vmatpush1.bf16.msra.mxu0 %v4716_v0 }
 0x329   : > { %4591 = vmatprep.subr.bf16.mxu1 %v4590_v7  ;;  %4719 = vmatprep.subr.bf16.mxu0 %v4718_v48 }
 0x32c   : > { %4593 = vmatpush1.bf16.msra.mxu1 %v4592_v29  ;;  %4721 = vmatpush1.bf16.msra.mxu0 %v4720_v16 }
 0x32d   : > { %4723 = vmatprep.subr.bf16.mxu1 %v4722_v45  ;;  %v4170_v45 = vld [vmem:[#allocation9] ss:$0 sm:$0xff] }
 0x32f   : > { %3652 = vmatmul.mubr.f32.vlgmr.msra.gmra.mrb[14].mxu1 %v7992_v5  ;;  %3886 = vmatmul.mubr.f32.vlgmr.msra.gmra.mrb[18].mxu0 %v7995_v2  ;;  %v3931_v5 = vld [vmem:[%s8135_s4 + $0xb8] sm:$0xff]  ;;  %v4732_v2 = vpack.c.bf16 %v3913_v42, %v3912_v53 }
 0x330   : > { %4725 = vmatpush3.bf16.msra.mxu1 %v4724_v14  ;;  %v4734_v51 = vpack.c.bf16 %v3931_v5, %v3930_v35 }
 0x331   : > { %4727 = vmatprep.subr.bf16.mxu1 %v4726_v47 }
 0x334   : > { %4729 = vmatpush3.bf16.msra.mxu1 %v4728_v20 }
 0x335   : > { %4731 = vmatprep.subr.bf16.mxu1 %v4730_v12 }
 0x338   : > { %4733 = vmatpush3.bf16.msra.mxu1 %v4732_v2 }
 0x339   : > { %4735 = vmatprep.subr.bf16.mxu1 %v4734_v51 }
 0x33c   : > { %4737 = vmatpush3.bf16.msra.mxu1 %v4736_v43 }
 0x33d   : > { %4739 = vmatprep.subr.bf16.mxu1 %v4738_v18 }
 0x340   : > { %4741 = vmatpush3.bf16.msra.mxu1 %v4740_v24 }
 0x341   : > { %4743 = vmatprep.subr.bf16.mxu1 %v4742_v39 }
 0x344   : > { %4745 = vmatpush3.bf16.msra.mxu1 %v4744_v40 }
 0x345   : > { %4747 = vmatprep.subr.bf16.mxu1 %v4746_v19 }
 0x348   : > { %4749 = vmatpush3.bf16.msra.mxu1 %v4748_v6 }
 0x349   : > { %4751 = vmatprep.subr.bf16.mxu1 %v4750_v36 }
 0x34c   : > { %4753 = vmatpush3.bf16.msra.mxu1 %v4752_v17 }
 0x402   : > { %v3653_v58 = vpop.f32.mrb[14].mxu1  ;;  %v3887_v0 = vpop.f32.mrb[18].mxu0 }
 0x403   : > { %v4754_v7 = vadd.f32 %v3887_v0, %v3653_v58  ;;  %v3655_v48 = vpop.f32.mrb[15].mxu1  ;;  %v3889_v31 = vpop.f32.mrb[19].mxu0 }
 0x404   : > { %v4755_v52 = vadd.f32 %v3889_v31, %v3655_v48 }
 0x405   : > { %v3904_v60 = vadd.f32 %v4754_v7, %v3897_v59 }
 0x406   : > { %v3905_v38 = vadd.f32 %v4755_v52, %v3901_v54 }
 0x407   : > { %v3906_v29 = vmax.f32 %v3904_v60, 0.0 }
 0x408   : > { %v3907_v1 = vmax.f32 %v3905_v38, 0.0 }
 0x40a   : > { %4011 = vmatprep.mubr.f32.mxu1 %v3907_v1 }
 0x40b   : > { %4012 = vmatmul.mubr.f32.vlgmr.msra.gmra.mrb[16].mxu1 %v3906_v29 }
 0x4de   : > { %v4207_v16 = vpop.f32.mrb[16].mxu1 }
 0x4df   : > { %v4208_v61 = vpop.f32.mrb[17].mxu1 }
 0x4e0   : > { %v4209_v26 = vadd.f32 %v4208_v61, %v4207_v16 }
 0x4e2   : > { %v4014_v8 = vadd.f32 %v4209_v26, %v4170_v45 }
 0x4e4   : > { %v4017_v49 = vmul.f32 %v4014_v8, %v4014_v8 }
 0x4e6   : > { %v4019_v14 = vsel %vm4018_vm8, %v4017_v49, 0.0 }
 0x4e7   : > { %4020 = vadd.xlane.f32.xlu0 %v4019_v14 }
 0x574   : > { %v4021_v47 = vpop.xlane.xlu0 %4020 }
 0x575   : > { %5421 = vrsqrt.f32 %v4021_v47  ;;  %vm4024_vm9 = vcmp.eq.f32.partialorder %v4021_v47, inf  ;;  %v4027_v62 = vand.u32 2147483648, %v4021_v47  ;;  %vm4026_vm10 = vcmp.eq.f32.partialorder %v4021_v47, 0.0 }
 0x57f   : > { %v5422_v4 = vpop.eup %5421 }
 0x580   : > { %v4023_v33 = vmul.f32 %v5422_v4, %v4021_v47 }
 0x582   : > { %v4025_v15 = vsel %vm4024_vm9, %v4021_v47, %v4023_v33 }
 0x583   : > { %v4028_v20 = vsel %vm4026_vm10, %v4027_v62, %v4025_v15 }
 0x584   : > { %v4029_v12 = vmax.f32 %v4028_v20, 1e-12 }
 0x586   : > { %5423 = vrcp.f32 %v4029_v12 }
 0x590   : > { %v5424_v53 = vpop.eup %5423 }
 0x591   : > { %v4031_v42 = vmul.f32 %v5424_v53, %v4014_v8 }
 0x593   : > { %4032 = vst.msk [vmem:[%s323_s8] sm:$0xff] %vm4018_vm8, %v4031_v42 }
 0x594 PF: > { %p18_p10 = scmp.ge.s32.totalorder %s5794_s16, 10   ;;  %s8275_s21 = smov %s5603_s22 }
 0x595   : > { %s8276_s22 = smov %s5607_s23  ;;  %s8277_s23 = smov %s5805_s14 }
 0x596   : > { %s8278_s24 = smov %s5794_s16  ;;  %20 = sbr.rel (!%p18_p10) target bundleno = 5 (0x5), region = 100 }
 0x59d   :  { %4052 = vsyncpa [#allocation3], 1 }
 0x59e   :  { %4054 = vsyncpa [#allocation3 + $0x1], 1 }
 0x59f   :  { %4055 = vsyncpa [#allocation5], 1 }
 0x5a0   :  { %4056 = vsyncpa [#allocation8], 1 }

</bundles_post_ra>
